<compile_context>
chip_gen: v5e
topology: v5e:2x2
jax: 0.10.0
libtpu: 0.0.40
codegen_flags: <defaults>
</compile_context>

<pallas_src>
import jax
import jax.numpy as jnp
from jax.experimental import pallas as pl
from jax.experimental.pallas import tpu as pltpu


def _vae_kernel(inv_temp_ref, gm_ref, x_ref, g_ref,
                w1_ref, b1_ref, w2_ref, b2_ref, w3_ref, b3_ref,
                w4_ref, b4_ref, w5_ref, b5_ref, w6_ref, b6_ref,
                recon_ref, soft_ref):
    inv_temp = inv_temp_ref[0, 0]

    def linear(a, w_ref, b_ref, relu=True):
        # bf16 x bf16 -> f32 on the MXU; bias add / ReLU stay f32 on the VPU.
        y = jnp.dot(a.astype(jnp.bfloat16), w_ref[...],
                    preferred_element_type=jnp.float32) + b_ref[...]
        return jnp.maximum(y, 0.0) if relu else y

    # ---- encoder -------------------------------------------------------
    h1 = linear(x_ref[...], w1_ref, b1_ref)       # (tb, 512)
    h2 = linear(h1, w2_ref, b2_ref)               # (tb, 256)
    q = linear(h2, w3_ref, b3_ref)                # (tb, K)

    # ---- fused group softmax: gumbel-softmax sample + posterior --------
    # Stack the two softmax inputs along the sublane axis and do one
    # max / exp / block-diag-matmul group-sum / normalize pass.
    tb = q.shape[0]
    y = jnp.concatenate([(q + g_ref[...]) * inv_temp, q], axis=0)   # (2*tb, K)
    m = jnp.max(y, axis=-1, keepdims=True)        # per-row max (softmax-invariant per group)
    e = jnp.exp(y - m)
    s = jnp.dot(e, gm_ref[...], preferred_element_type=jnp.float32)  # per-group sums
    s = jnp.maximum(s, 1e-30)                     # guard against exp underflow -> 0/0
    p = e * pl.reciprocal(s, approx=True)

    z = p[:tb]                                    # rsample
    soft_ref[...] = p[tb:]                        # softmax(q_y, dim=-1) flattened

    # ---- decoder -------------------------------------------------------
    h4 = linear(z, w4_ref, b4_ref)                # (tb, 256)
    h5 = linear(h4, w5_ref, b5_ref)               # (tb, 512)
    logits = linear(h5, w6_ref, b6_ref, relu=False)
    recon_ref[...] = jax.nn.sigmoid(logits)       # (tb, 784)


def _round_up(n, m):
    return ((n + m - 1) // m) * m


def vae_forward(x, temp, gumbel, params, latent_dim, categorical_dim, tile_b=None):
    """Fused VAE forward. Returns (recon (B,784), softmax(q_y) reshaped to (B,K))."""
    B = x.shape[0]
    K = latent_dim * categorical_dim
    x2d = x.reshape(B, 784).astype(jnp.float32)
    g = gumbel.reshape(B, K).astype(jnp.float32)

    if tile_b is None:
        tile_b = min(128, _round_up(B, 8))
    tile_b = max(8, _round_up(tile_b, 8))
    B_pad = _round_up(B, tile_b)
    if B_pad != B:
        x2d = jnp.pad(x2d, ((0, B_pad - B), (0, 0)))
        g = jnp.pad(g, ((0, B_pad - B), (0, 0)))
    grid = (B_pad // tile_b,)

    (w1, b1, w2, b2, w3, b3, w4, b4, w5, b5, w6, b6) = params
    ws = [w.astype(jnp.bfloat16) for w in (w1, w2, w3, w4, w5, w6)]
    bs = [jnp.asarray(b, jnp.float32).reshape(1, -1) for b in (b1, b2, b3, b4, b5, b6)]
    # TODO(synk): on v7x the two big matrices (fc1/fc6) could additionally be
    # fp8-quantized with per-channel scales; not implemented here.

    # (K, K) block-diagonal ones matrix: sums exp() within each categorical
    # group via one tiny MXU matmul (avoids any 3-D reshape in the kernel).
    grp = jnp.arange(K, dtype=jnp.int32) // categorical_dim
    gm = (grp[:, None] == grp[None, :]).astype(jnp.float32)

    inv_temp = jnp.full((1, 1), 1.0 / float(temp), jnp.float32)

    def resident(arr):
        nd = arr.ndim
        return pl.BlockSpec(arr.shape, lambda i: (0,) * nd)

    in_specs = [
        pl.BlockSpec(memory_space=pltpu.MemorySpace.SMEM),   # 1/temp scalar
        resident(gm),                                        # group-sum matrix (VMEM-resident)
        pl.BlockSpec((tile_b, 784), lambda i: (i, 0)),       # x tile
        pl.BlockSpec((tile_b, K), lambda i: (i, 0)),         # gumbel tile
    ]
    flat_params = []
    for w, b in zip(ws, bs):
        in_specs += [resident(w), resident(b)]               # weights stay resident
        flat_params += [w, b]

    recon, soft = pl.pallas_call(
        _vae_kernel,
        out_shape=(
            jax.ShapeDtypeStruct((B_pad, 784), jnp.float32),
            jax.ShapeDtypeStruct((B_pad, K), jnp.float32),
        ),
        grid_spec=pltpu.PrefetchScalarGridSpec(
            num_scalar_prefetch=0,
            grid=grid,
            in_specs=in_specs,
            out_specs=(
                pl.BlockSpec((tile_b, 784), lambda i: (i, 0)),
                pl.BlockSpec((tile_b, K), lambda i: (i, 0)),
            ),
        ),
        compiler_params=pltpu.CompilerParams(
            dimension_semantics=("parallel",),
        ),
    )(inv_temp, gm, x2d, g, *flat_params)

    return recon[:B], soft[:B]


def _reference_forward(x, temp, gumbel, params, latent_dim, categorical_dim):
    """Pure-JAX reference mirroring the kernel's bf16-weight numerics."""
    B = x.shape[0]
    K = latent_dim * categorical_dim
    x2d = x.reshape(B, 784).astype(jnp.float32)
    (w1, b1, w2, b2, w3, b3, w4, b4, w5, b5, w6, b6) = params

    def lin(a, w, b, relu=True):
        y = jnp.dot(a.astype(jnp.bfloat16), w.astype(jnp.bfloat16),
                    preferred_element_type=jnp.float32) + b.reshape(1, -1)
        return jnp.maximum(y, 0.0) if relu else y

    q = lin(lin(lin(x2d, w1, b1), w2, b2), w3, b3)
    q_y = q.reshape(B, latent_dim, categorical_dim)
    g_y = gumbel.reshape(B, latent_dim, categorical_dim)
    z = jax.nn.softmax((q_y + g_y) / temp, axis=-1).reshape(B, K)
    soft = jax.nn.softmax(q_y, axis=-1).reshape(B, K)
    recon = jax.nn.sigmoid(lin(lin(lin(z, w4, b4), w5, b5), w6, b6, relu=False))
    return recon, soft


def init_linear(key, in_f, out_f):
    """Deterministic torch.nn.Linear-style init; weight returned as (in, out)."""
    kw, kb = jax.random.split(key)
    bound = 1.0 / jnp.sqrt(jnp.float32(in_f))
    w = jax.random.uniform(kw, (in_f, out_f), jnp.float32, -bound, bound)
    b = jax.random.uniform(kb, (1, out_f), jnp.float32, -bound, bound)
    return w, b


if __name__ == "__main__":
    latent_dim, categorical_dim = 4, 8
    K = latent_dim * categorical_dim
    B = 16

    key = jax.random.PRNGKey(0)
    k_x, k_g, k1, k2, k3, k4, k5, k6 = jax.random.split(key, 8)

    # input "images" (B, 1, 28, 28) -> flattened to (B, 784) inside the wrapper
    x = jax.random.uniform(k_x, (B, 1, 28, 28), jnp.float32)

    # deterministic Gumbel(0, 1) noise for rsample
    # TODO(synk): `latent_distribution` is injected in the PyTorch module; the
    # standard Gumbel-softmax rsample (softmax((logits + g) / temp)) with
    # externally supplied noise is assumed here.
    u = jax.random.uniform(k_g, (B, K), jnp.float32, 1e-20, 1.0)
    gumbel = -jnp.log(-jnp.log(u))

    w1, b1 = init_linear(k1, 784, 512)
    w2, b2 = init_linear(k2, 512, 256)
    w3, b3 = init_linear(k3, 256, K)
    w4, b4 = init_linear(k4, K, 256)
    w5, b5 = init_linear(k5, 256, 512)
    w6, b6 = init_linear(k6, 512, 784)
    params = (w1, b1, w2, b2, w3, b3, w4, b4, w5, b5, w6, b6)

    temp = 0.5
    # tile_b=8 -> grid=(2,) to exercise the batch-tiled (weight-resident) path.
    recon, soft = vae_forward(x, temp, gumbel, params, latent_dim,
                              categorical_dim, tile_b=8)
    jax.block_until_ready((recon, soft))

    assert recon.shape == (B, 784) and soft.shape == (B, K)
    assert bool(jnp.all(jnp.isfinite(recon))) and bool(jnp.all(jnp.isfinite(soft)))
    assert bool(jnp.all((recon >= 0.0) & (recon <= 1.0)))
    # posterior probabilities sum to 1 within each categorical group
    gsum = soft.reshape(B, latent_dim, categorical_dim).sum(-1)
    assert bool(jnp.all(jnp.abs(gsum - 1.0) < 1e-2))

    # parity with a pure-JAX (bf16-weight) reference
    ref_recon, ref_soft = _reference_forward(x, temp, gumbel, params,
                                             latent_dim, categorical_dim)
    assert float(jnp.max(jnp.abs(recon - ref_recon))) < 2e-2
    assert float(jnp.max(jnp.abs(soft - ref_soft))) < 2e-2

    print("KERNEL_OK")
</pallas_src>

<mosaic_0001>
module attributes {stable_mosaic.version = 11 : i64} {
  func.func @_vae_kernel(%arg0: i32, %arg1: memref<1x1xf32, #tpu.memory_space<smem>>, %arg2: memref<32x32xf32, #tpu.memory_space<vmem>>, %arg3: memref<8x784xf32, #tpu.memory_space<vmem>>, %arg4: memref<8x32xf32, #tpu.memory_space<vmem>>, %arg5: memref<784x512xbf16, #tpu.memory_space<vmem>>, %arg6: memref<1x512xf32, #tpu.memory_space<vmem>>, %arg7: memref<512x256xbf16, #tpu.memory_space<vmem>>, %arg8: memref<1x256xf32, #tpu.memory_space<vmem>>, %arg9: memref<256x32xbf16, #tpu.memory_space<vmem>>, %arg10: memref<1x32xf32, #tpu.memory_space<vmem>>, %arg11: memref<32x256xbf16, #tpu.memory_space<vmem>>, %arg12: memref<1x256xf32, #tpu.memory_space<vmem>>, %arg13: memref<256x512xbf16, #tpu.memory_space<vmem>>, %arg14: memref<1x512xf32, #tpu.memory_space<vmem>>, %arg15: memref<512x784xbf16, #tpu.memory_space<vmem>>, %arg16: memref<1x784xf32, #tpu.memory_space<vmem>>, %arg17: memref<8x784xf32, #tpu.memory_space<vmem>>, %arg18: memref<8x32xf32, #tpu.memory_space<vmem>>) attributes {dimension_semantics = [#tpu.dimension_semantics<parallel>], iteration_bounds = array<i64: 2>, scalar_prefetch = 0 : i64, scratch_operands = 0 : i64, tpu.core_type = #tpu.core_type<tc>, window_params = [{transform_indices = @transform_0, window_bounds = array<i64: 1, 1>}, {pipeline_mode = #tpu.pipeline_mode<synchronous>, transform_indices = @transform_1, window_bounds = array<i64: 32, 32>}, {transform_indices = @transform_2, window_bounds = array<i64: 8, 784>}, {transform_indices = @transform_3, window_bounds = array<i64: 8, 32>}, {pipeline_mode = #tpu.pipeline_mode<synchronous>, transform_indices = @transform_4, window_bounds = array<i64: 784, 512>}, {pipeline_mode = #tpu.pipeline_mode<synchronous>, transform_indices = @transform_5, window_bounds = array<i64: 1, 512>}, {pipeline_mode = #tpu.pipeline_mode<synchronous>, transform_indices = @transform_6, window_bounds = array<i64: 512, 256>}, {pipeline_mode = #tpu.pipeline_mode<synchronous>, transform_indices = @transform_7, window_bounds = array<i64: 1, 256>}, {pipeline_mode = #tpu.pipeline_mode<synchronous>, transform_indices = @transform_8, window_bounds = array<i64: 256, 32>}, {pipeline_mode = #tpu.pipeline_mode<synchronous>, transform_indices = @transform_9, window_bounds = array<i64: 1, 32>}, {pipeline_mode = #tpu.pipeline_mode<synchronous>, transform_indices = @transform_10, window_bounds = array<i64: 32, 256>}, {pipeline_mode = #tpu.pipeline_mode<synchronous>, transform_indices = @transform_11, window_bounds = array<i64: 1, 256>}, {pipeline_mode = #tpu.pipeline_mode<synchronous>, transform_indices = @transform_12, window_bounds = array<i64: 256, 512>}, {pipeline_mode = #tpu.pipeline_mode<synchronous>, transform_indices = @transform_13, window_bounds = array<i64: 1, 512>}, {pipeline_mode = #tpu.pipeline_mode<synchronous>, transform_indices = @transform_14, window_bounds = array<i64: 512, 784>}, {pipeline_mode = #tpu.pipeline_mode<synchronous>, transform_indices = @transform_15, window_bounds = array<i64: 1, 784>}, {transform_indices = @transform_16, window_bounds = array<i64: 8, 784>}, {transform_indices = @transform_17, window_bounds = array<i64: 8, 32>}]} {
    %c0 = arith.constant 0 : index
    %c0_0 = arith.constant 0 : index
    %0 = memref.load %arg1[%c0, %c0_0] : memref<1x1xf32, #tpu.memory_space<smem>>
    %c0_1 = arith.constant 0 : index
    %c0_2 = arith.constant 0 : index
    %1 = vector.load %arg3[%c0_1, %c0_2] : memref<8x784xf32, #tpu.memory_space<vmem>>, vector<8x784xf32>
    %2 = arith.truncf %1 : vector<8x784xf32> to vector<8x784xbf16>
    %c0_3 = arith.constant 0 : index
    %c0_4 = arith.constant 0 : index
    %3 = vector.load %arg5[%c0_3, %c0_4] : memref<784x512xbf16, #tpu.memory_space<vmem>>, vector<784x512xbf16>
    %cst = arith.constant dense<0.000000e+00> : vector<8x512xf32>
    %4 = tpu.matmul %2, %3, %cst {dimension_numbers = #tpu.dot_dimension_numbers<[1], [0], [0], [1], [0, 0, 1, 1], [], []>} : vector<8x784xbf16>, vector<784x512xbf16>, vector<8x512xf32> -> vector<8x512xf32>
    %c0_5 = arith.constant 0 : index
    %c0_6 = arith.constant 0 : index
    %5 = vector.load %arg6[%c0_5, %c0_6] : memref<1x512xf32, #tpu.memory_space<vmem>>, vector<1x512xf32>
    %6 = vector.broadcast %5 : vector<1x512xf32> to vector<8x512xf32>
    %7 = arith.addf %4, %6 : vector<8x512xf32>
    %cst_7 = arith.constant 0.000000e+00 : f32
    %8 = vector.broadcast %cst_7 : f32 to vector<8x512xf32>
    %9 = arith.maximumf %7, %8 : vector<8x512xf32>
    %10 = arith.truncf %9 : vector<8x512xf32> to vector<8x512xbf16>
    %c0_8 = arith.constant 0 : index
    %c0_9 = arith.constant 0 : index
    %11 = vector.load %arg7[%c0_8, %c0_9] : memref<512x256xbf16, #tpu.memory_space<vmem>>, vector<512x256xbf16>
    %cst_10 = arith.constant dense<0.000000e+00> : vector<8x256xf32>
    %12 = tpu.matmul %10, %11, %cst_10 {dimension_numbers = #tpu.dot_dimension_numbers<[1], [0], [0], [1], [0, 0, 1, 1], [], []>} : vector<8x512xbf16>, vector<512x256xbf16>, vector<8x256xf32> -> vector<8x256xf32>
    %c0_11 = arith.constant 0 : index
    %c0_12 = arith.constant 0 : index
    %13 = vector.load %arg8[%c0_11, %c0_12] : memref<1x256xf32, #tpu.memory_space<vmem>>, vector<1x256xf32>
    %14 = vector.broadcast %13 : vector<1x256xf32> to vector<8x256xf32>
    %15 = arith.addf %12, %14 : vector<8x256xf32>
    %cst_13 = arith.constant 0.000000e+00 : f32
    %16 = vector.broadcast %cst_13 : f32 to vector<8x256xf32>
    %17 = arith.maximumf %15, %16 : vector<8x256xf32>
    %18 = arith.truncf %17 : vector<8x256xf32> to vector<8x256xbf16>
    %c0_14 = arith.constant 0 : index
    %c0_15 = arith.constant 0 : index
    %19 = vector.load %arg9[%c0_14, %c0_15] : memref<256x32xbf16, #tpu.memory_space<vmem>>, vector<256x32xbf16>
    %cst_16 = arith.constant dense<0.000000e+00> : vector<8x32xf32>
    %20 = tpu.matmul %18, %19, %cst_16 {dimension_numbers = #tpu.dot_dimension_numbers<[1], [0], [0], [1], [0, 0, 1, 1], [], []>} : vector<8x256xbf16>, vector<256x32xbf16>, vector<8x32xf32> -> vector<8x32xf32>
    %c0_17 = arith.constant 0 : index
    %c0_18 = arith.constant 0 : index
    %21 = vector.load %arg10[%c0_17, %c0_18] : memref<1x32xf32, #tpu.memory_space<vmem>>, vector<1x32xf32>
    %22 = vector.broadcast %21 : vector<1x32xf32> to vector<8x32xf32>
    %23 = arith.addf %20, %22 : vector<8x32xf32>
    %cst_19 = arith.constant 0.000000e+00 : f32
    %24 = vector.broadcast %cst_19 : f32 to vector<8x32xf32>
    %25 = arith.maximumf %23, %24 : vector<8x32xf32>
    %c0_20 = arith.constant 0 : index
    %c0_21 = arith.constant 0 : index
    %26 = vector.load %arg4[%c0_20, %c0_21] : memref<8x32xf32, #tpu.memory_space<vmem>>, vector<8x32xf32>
    %27 = arith.addf %25, %26 : vector<8x32xf32>
    %28 = vector.broadcast %0 : f32 to vector<8x32xf32>
    %29 = arith.mulf %27, %28 : vector<8x32xf32>
    %30 = tpu.concatenate %29, %25 in 0 : vector<8x32xf32>, vector<8x32xf32> -> vector<16x32xf32>
    %cst_22 = arith.constant dense<0xFF800000> : vector<16xf32>
    %31 = vector.multi_reduction <maximumf>, %30, %cst_22 [1] : vector<16x32xf32> to vector<16xf32>
    %32 = vector.shape_cast %31 : vector<16xf32> to vector<16x1xf32>
    %33 = vector.broadcast %32 : vector<16x1xf32> to vector<16x32xf32>
    %34 = arith.subf %30, %33 : vector<16x32xf32>
    %35 = math.exp %34 : vector<16x32xf32>
    %c0_23 = arith.constant 0 : index
    %c0_24 = arith.constant 0 : index
    %36 = vector.load %arg2[%c0_23, %c0_24] : memref<32x32xf32, #tpu.memory_space<vmem>>, vector<32x32xf32>
    %cst_25 = arith.constant dense<0.000000e+00> : vector<16x32xf32>
    %37 = tpu.matmul %35, %36, %cst_25 {dimension_numbers = #tpu.dot_dimension_numbers<[1], [0], [0], [1], [0, 0, 1, 1], [], []>} : vector<16x32xf32>, vector<32x32xf32>, vector<16x32xf32> -> vector<16x32xf32>
    %cst_26 = arith.constant 1.000000e-30 : f32
    %38 = vector.broadcast %cst_26 : f32 to vector<16x32xf32>
    %39 = arith.maximumf %37, %38 : vector<16x32xf32>
    %40 = tpu.reciprocal %39 {approx = true} : vector<16x32xf32> -> vector<16x32xf32>
    %41 = arith.mulf %35, %40 : vector<16x32xf32>
    %42 = vector.extract_strided_slice %41 {offsets = [0, 0], sizes = [8, 32], strides = [1, 1]} : vector<16x32xf32> to vector<8x32xf32>
    %43 = vector.extract_strided_slice %41 {offsets = [8, 0], sizes = [8, 32], strides = [1, 1]} : vector<16x32xf32> to vector<8x32xf32>
    %c0_27 = arith.constant 0 : index
    %c0_28 = arith.constant 0 : index
    %44 = vector.load %arg18[%c0_27, %c0_28] : memref<8x32xf32, #tpu.memory_space<vmem>>, vector<8x32xf32>
    tpu.vector_store %arg18[%c0_27, %c0_28], %43 {strides = array<i32>} : memref<8x32xf32, #tpu.memory_space<vmem>>, vector<8x32xf32>,
    %45 = arith.truncf %42 : vector<8x32xf32> to vector<8x32xbf16>
    %c0_29 = arith.constant 0 : index
    %c0_30 = arith.constant 0 : index
    %46 = vector.load %arg11[%c0_29, %c0_30] : memref<32x256xbf16, #tpu.memory_space<vmem>>, vector<32x256xbf16>
    %cst_31 = arith.constant dense<0.000000e+00> : vector<8x256xf32>
    %47 = tpu.matmul %45, %46, %cst_31 {dimension_numbers = #tpu.dot_dimension_numbers<[1], [0], [0], [1], [0, 0, 1, 1], [], []>} : vector<8x32xbf16>, vector<32x256xbf16>, vector<8x256xf32> -> vector<8x256xf32>
    %c0_32 = arith.constant 0 : index
    %c0_33 = arith.constant 0 : index
    %48 = vector.load %arg12[%c0_32, %c0_33] : memref<1x256xf32, #tpu.memory_space<vmem>>, vector<1x256xf32>
    %49 = vector.broadcast %48 : vector<1x256xf32> to vector<8x256xf32>
    %50 = arith.addf %47, %49 : vector<8x256xf32>
    %cst_34 = arith.constant 0.000000e+00 : f32
    %51 = vector.broadcast %cst_34 : f32 to vector<8x256xf32>
    %52 = arith.maximumf %50, %51 : vector<8x256xf32>
    %53 = arith.truncf %52 : vector<8x256xf32> to vector<8x256xbf16>
    %c0_35 = arith.constant 0 : index
    %c0_36 = arith.constant 0 : index
    %54 = vector.load %arg13[%c0_35, %c0_36] : memref<256x512xbf16, #tpu.memory_space<vmem>>, vector<256x512xbf16>
    %cst_37 = arith.constant dense<0.000000e+00> : vector<8x512xf32>
    %55 = tpu.matmul %53, %54, %cst_37 {dimension_numbers = #tpu.dot_dimension_numbers<[1], [0], [0], [1], [0, 0, 1, 1], [], []>} : vector<8x256xbf16>, vector<256x512xbf16>, vector<8x512xf32> -> vector<8x512xf32>
    %c0_38 = arith.constant 0 : index
    %c0_39 = arith.constant 0 : index
    %56 = vector.load %arg14[%c0_38, %c0_39] : memref<1x512xf32, #tpu.memory_space<vmem>>, vector<1x512xf32>
    %57 = vector.broadcast %56 : vector<1x512xf32> to vector<8x512xf32>
    %58 = arith.addf %55, %57 : vector<8x512xf32>
    %cst_40 = arith.constant 0.000000e+00 : f32
    %59 = vector.broadcast %cst_40 : f32 to vector<8x512xf32>
    %60 = arith.maximumf %58, %59 : vector<8x512xf32>
    %61 = arith.truncf %60 : vector<8x512xf32> to vector<8x512xbf16>
    %c0_41 = arith.constant 0 : index
    %c0_42 = arith.constant 0 : index
    %62 = vector.load %arg15[%c0_41, %c0_42] : memref<512x784xbf16, #tpu.memory_space<vmem>>, vector<512x784xbf16>
    %cst_43 = arith.constant dense<0.000000e+00> : vector<8x784xf32>
    %63 = tpu.matmul %61, %62, %cst_43 {dimension_numbers = #tpu.dot_dimension_numbers<[1], [0], [0], [1], [0, 0, 1, 1], [], []>} : vector<8x512xbf16>, vector<512x784xbf16>, vector<8x784xf32> -> vector<8x784xf32>
    %c0_44 = arith.constant 0 : index
    %c0_45 = arith.constant 0 : index
    %64 = vector.load %arg16[%c0_44, %c0_45] : memref<1x784xf32, #tpu.memory_space<vmem>>, vector<1x784xf32>
    %65 = vector.broadcast %64 : vector<1x784xf32> to vector<8x784xf32>
    %66 = arith.addf %63, %65 : vector<8x784xf32>
    %67 = arith.negf %66 : vector<8x784xf32>
    %68 = math.exp %67 : vector<8x784xf32>
    %cst_46 = arith.constant 1.000000e+00 : f32
    %69 = vector.broadcast %cst_46 : f32 to vector<8x784xf32>
    %70 = arith.addf %69, %68 : vector<8x784xf32>
    %71 = arith.divf %69, %70 : vector<8x784xf32>
    %c0_47 = arith.constant 0 : index
    %c0_48 = arith.constant 0 : index
    %72 = vector.load %arg17[%c0_47, %c0_48] : memref<8x784xf32, #tpu.memory_space<vmem>>, vector<8x784xf32>
    tpu.vector_store %arg17[%c0_47, %c0_48], %71 {strides = array<i32>} : memref<8x784xf32, #tpu.memory_space<vmem>>, vector<8x784xf32>,
    return
  }
  func.func @transform_0(%arg0: i32) -> (i32, i32) {
    %c0_i32 = arith.constant 0 : i32
    %c0_i32_0 = arith.constant 0 : i32
    %c0_i32_1 = arith.constant 0 : i32
    return %c0_i32, %c0_i32_0 : i32, i32
  }
  func.func @transform_1(%arg0: i32) -> (i32, i32) {
    %c0_i32 = arith.constant 0 : i32
    %c0_i32_0 = arith.constant 0 : i32
    %c0_i32_1 = arith.constant 0 : i32
    return %c0_i32, %c0_i32_0 : i32, i32
  }
  func.func @transform_2(%arg0: i32) -> (i32, i32) {
    %c0_i32 = arith.constant 0 : i32
    %c0_i32_0 = arith.constant 0 : i32
    return %arg0, %c0_i32 : i32, i32
  }
  func.func @transform_3(%arg0: i32) -> (i32, i32) {
    %c0_i32 = arith.constant 0 : i32
    %c0_i32_0 = arith.constant 0 : i32
    return %arg0, %c0_i32 : i32, i32
  }
  func.func @transform_4(%arg0: i32) -> (i32, i32) {
    %c0_i32 = arith.constant 0 : i32
    %c0_i32_0 = arith.constant 0 : i32
    %c0_i32_1 = arith.constant 0 : i32
    return %c0_i32, %c0_i32_0 : i32, i32
  }
  func.func @transform_5(%arg0: i32) -> (i32, i32) {
    %c0_i32 = arith.constant 0 : i32
    %c0_i32_0 = arith.constant 0 : i32
    %c0_i32_1 = arith.constant 0 : i32
    return %c0_i32, %c0_i32_0 : i32, i32
  }
  func.func @transform_6(%arg0: i32) -> (i32, i32) {
    %c0_i32 = arith.constant 0 : i32
    %c0_i32_0 = arith.constant 0 : i32
    %c0_i32_1 = arith.constant 0 : i32
    return %c0_i32, %c0_i32_0 : i32, i32
  }
  func.func @transform_7(%arg0: i32) -> (i32, i32) {
    %c0_i32 = arith.constant 0 : i32
    %c0_i32_0 = arith.constant 0 : i32
    %c0_i32_1 = arith.constant 0 : i32
    return %c0_i32, %c0_i32_0 : i32, i32
  }
  func.func @transform_8(%arg0: i32) -> (i32, i32) {
    %c0_i32 = arith.constant 0 : i32
    %c0_i32_0 = arith.constant 0 : i32
    %c0_i32_1 = arith.constant 0 : i32
    return %c0_i32, %c0_i32_0 : i32, i32
  }
  func.func @transform_9(%arg0: i32) -> (i32, i32) {
    %c0_i32 = arith.constant 0 : i32
    %c0_i32_0 = arith.constant 0 : i32
    %c0_i32_1 = arith.constant 0 : i32
    return %c0_i32, %c0_i32_0 : i32, i32
  }
  func.func @transform_10(%arg0: i32) -> (i32, i32) {
    %c0_i32 = arith.constant 0 : i32
    %c0_i32_0 = arith.constant 0 : i32
    %c0_i32_1 = arith.constant 0 : i32
    return %c0_i32, %c0_i32_0 : i32, i32
  }
  func.func @transform_11(%arg0: i32) -> (i32, i32) {
    %c0_i32 = arith.constant 0 : i32
    %c0_i32_0 = arith.constant 0 : i32
    %c0_i32_1 = arith.constant 0 : i32
    return %c0_i32, %c0_i32_0 : i32, i32
  }
  func.func @transform_12(%arg0: i32) -> (i32, i32) {
    %c0_i32 = arith.constant 0 : i32
    %c0_i32_0 = arith.constant 0 : i32
    %c0_i32_1 = arith.constant 0 : i32
    return %c0_i32, %c0_i32_0 : i32, i32
  }
  func.func @transform_13(%arg0: i32) -> (i32, i32) {
    %c0_i32 = arith.constant 0 : i32
    %c0_i32_0 = arith.constant 0 : i32
    %c0_i32_1 = arith.constant 0 : i32
    return %c0_i32, %c0_i32_0 : i32, i32
  }
  func.func @transform_14(%arg0: i32) -> (i32, i32) {
    %c0_i32 = arith.constant 0 : i32
    %c0_i32_0 = arith.constant 0 : i32
    %c0_i32_1 = arith.constant 0 : i32
    return %c0_i32, %c0_i32_0 : i32, i32
  }
  func.func @transform_15(%arg0: i32) -> (i32, i32) {
    %c0_i32 = arith.constant 0 : i32
    %c0_i32_0 = arith.constant 0 : i32
    %c0_i32_1 = arith.constant 0 : i32
    return %c0_i32, %c0_i32_0 : i32, i32
  }
  func.func @transform_16(%arg0: i32) -> (i32, i32) {
    %c0_i32 = arith.constant 0 : i32
    %c0_i32_0 = arith.constant 0 : i32
    return %arg0, %c0_i32 : i32, i32
  }
  func.func @transform_17(%arg0: i32) -> (i32, i32) {
    %c0_i32 = arith.constant 0 : i32
    %c0_i32_0 = arith.constant 0 : i32
    return %arg0, %c0_i32 : i32, i32
  }
}

</mosaic_0001>

<bundles_post_ra>
// kernel: tpu_custom_call.1
= control target key start
LH: loop header
LB: loop body
LE: loop exit
PB: predicated region body
PF: predicated region fallthrough
CT: control target
= control target key end

     0   :  { %s12332_s0 = inlined_call_operand.<no memory space> [shape: f32[1,1], index: 0, kind: input, shape index: {}]   ;;  %s12333_s1 = inlined_call_operand.vmem [shape: f32[32,32], index: 1, kind: input, shape index: {}]   ;;  %s12334_s2 = inlined_call_operand.vmem [shape: f32[16,784], index: 2, kind: input, shape index: {}]   ;;  %s12335_s3 = inlined_call_operand.vmem [shape: f32[16,32], index: 3, kind: input, shape index: {}]   ;;  %s12336_s4 = inlined_call_operand.vmem [shape: bf16[784,512], index: 4, kind: input, shape index: {}]   ;;  %s12337_s5 = inlined_call_operand.vmem [shape: f32[1,512], index: 5, kind: input, shape index: {}]   ;;  %s12338_s6 = inlined_call_operand.vmem [shape: bf16[512,256], index: 6, kind: input, shape index: {}]   ;;  %s12339_s7 = inlined_call_operand.vmem [shape: f32[1,256], index: 7, kind: input, shape index: {}]   ;;  %s12340_s8 = inlined_call_operand.vmem [shape: bf16[256,32], index: 8, kind: input, shape index: {}]   ;;  %s12341_s9 = inlined_call_operand.vmem [shape: f32[1,32], index: 9, kind: input, shape index: {}]   ;;  %s12342_s10 = inlined_call_operand.vmem [shape: bf16[32,256], index: 10, kind: input, shape index: {}]   ;;  %s12343_s11 = inlined_call_operand.vmem [shape: f32[1,256], index: 11, kind: input, shape index: {}]   ;;  %s12344_s12 = inlined_call_operand.vmem [shape: bf16[256,512], index: 12, kind: input, shape index: {}]   ;;  %s12345_s13 = inlined_call_operand.vmem [shape: f32[1,512], index: 13, kind: input, shape index: {}]   ;;  %s12346_s14 = inlined_call_operand.vmem [shape: bf16[512,784], index: 14, kind: input, shape index: {}]   ;;  %s12347_s15 = inlined_call_operand.vmem [shape: f32[1,784], index: 15, kind: input, shape index: {}]   ;;  %s12348_s16 = inlined_call_operand.hbm [shape: f32[16,784], index: 16, kind: output, shape index: {0}]   ;;  %s12349_s17 = inlined_call_operand.hbm [shape: f32[16,32], index: 17, kind: output, shape index: {1}]  }
   0x1   :  { %12358 = sst [smem:[#allocation15_spill]] %s12332_s0 }
   0x2   :  { %12359 = sst [smem:[#allocation16_spill]] %s12333_s1 }
   0x3   :  { %12360 = sst [smem:[#allocation17_spill]] %s12334_s2 }
   0x4   :  { %12361 = sst [smem:[#allocation18_spill]] %s12335_s3 }
   0x5   :  { %12362 = sst [smem:[#allocation19_spill]] %s12348_s16 }
   0x6   :  { %s12363_s26 = sld [smem:[#allocation15_spill]] }
   0xc   :  { %23 = sst [smem:[#allocation2]] %s12363_s26 }
   0xd   :  { %24 = vsyncpa [#allocation4], 0 }
   0xe   :  { %26 = vsyncpa [#allocation4 + $0x1], 0 }
   0xf   :  { %27 = vsyncpa [#allocation6], 0 }
  0x10   :  { %29 = vsyncpa [#allocation6 + $0x1], 0  ;;  %s8646_s27 = smov 0   ;;  %s8648_s28 = smov 0  }
  0x11   :  { %s8650_s29 = smov 0   ;;  %s8652_s0 = smov 0  }
  0x12 LB: > { %12364 = sst [smem:[#allocation9_spill]] %s8539_s27  ;;  %s8667_s30 = sadd.s32 4294967295, %s8551_s0   ;;  %s8551_s0 = sphi %s8652_s0, %s12379_s0   ;;  %s8547_s29 = sphi %s8650_s29, %s12381_s29   ;;  %s8543_s28 = sphi %s8648_s28, %s12383_s28   ;;  %s8539_s27 = sphi %s8646_s27, %s12382_s27  }
  0x13   : > { %12365 = sst [smem:[#allocation10_spill]] %s8547_s29  ;;  %s5506_s18 = sadd.s32 4294967294, %s8551_s0  }
  0x14   : > { %12366 = sst [smem:[#allocation11_spill]] %s8551_s0  ;;  %s8671_s19 = sadd.s32 1, %s8551_s0  }
  0x15   : > { %12367 = sst [smem:[#allocation12_spill]] %s8671_s19  ;;  %s388_s1 = sadd.s32 1, %s8547_s29 }
  0x16   : > { %s385_s20 = ssub.s32 %s8551_s0, %s8671_s19  ;;  %p398_p0 = scmp.ne.s32.totalorder %s8547_s29, %s8543_s28 }
  0x17   : > { %p386_p1 = scmp.eq.s32.totalorder %s385_s20, 0  ;;  %p399_p2 = scmp.eq.s32.totalorder %s8667_s30, 1 }
  0x18   : > { %p404_p3 = scmp.ne.s32.totalorder %s8543_s28, %s8539_s27  ;;  %p405_p4 = scmp.eq.s32.totalorder %s5506_s18, 1 }
  0x19   : > { %s8682_s21 = scalar_select %p386_p1, %s8547_s29, %s388_s1  }
  0x1a   : > { %p8684_p5 = por %p399_p2, %p398_p0  ;;  %p8688_p6 = por %p405_p4, %p404_p3 }
  0x1b   : > { %12368 = sst [smem:[#allocation13_spill]] %s8682_s21  ;;  %p5509_p7 = scmp.ge.s32.totalorder %s8551_s0, 1 }
  0x1c   : > { %s12370_s23 = scalar_select %p8688_p6, 1, 0 }
  0x1d   : > { %p506_p8 = scmp.lt.s32.totalorder %s8551_s0, 3 }
  0x1e   : > { %12371 = sst [smem:[#allocation14_spill]] %s12370_s23 }
  0x1f   : > { %p507_p9 = pnand %p5509_p7, %p506_p8 }
  0x20   : > { %p567_p10 = scmp.lt.s32.totalorder (!%p507_p9), %s8667_s30, 1  ;;  %s12372_s2 = sld [smem:[#allocation17_spill]] (!%p507_p9) }
  0x21   : > { %510 = sbr.rel (%p507_p9) target bundleno = 1554 (0x612), region = 84  ;;  %s12373_s3 = sld [smem:[#allocation18_spill]] (!%p507_p9) }
  0x22   : > { %s12374_s20 = sld [smem:[#allocation16_spill]] (!%p507_p9) }
  0x26   : > { %v5627_v0 = vld [vmem:[%s12336_s4 + $0xe0] sm:$0xf]  ;;  %v7835_v1 = vld [vmem:[%s12336_s4 + $0xec] sm:$0xf0]  ;;  %s8894_s27 = scalar_select %p567_p10, %s8667_s30, 1  ;;  %vm1778_vm0 = vcmask 130048  }
  0x27   : > { %v5755_v2 = vld [vmem:[%s12336_s4 + $0x1e0] sm:$0xf]  ;;  %v5628_v3 = vor.u32 %v7835_v1, %v5627_v0  ;;  %v7867_v4 = vld [vmem:[%s12336_s4 + $0x1ec] sm:$0xf0]  ;;  %vm2815_vm1 = vcmask 261120  }
  0x28   : > { %v5883_v5 = vld [vmem:[%s12336_s4 + $0x2e0] sm:$0xf]  ;;  %v7899_v6 = vld [vmem:[%s12336_s4 + $0x2ec] sm:$0xf0]  ;;  %v5756_v7 = vor.u32 %v7867_v4, %v5755_v2  ;;  %s8374_s21 = smul.u32 56, %s8894_s27  ;;  %s5512_s26 = sshll.u32 %s8894_s27, 3 }
  0x29   : > { %v5884_v8 = vor.u32 %v7899_v6, %v5883_v5  ;;  %v6011_v9 = vld [vmem:[%s12336_s4 + $0x3e0] sm:$0xf]  ;;  %v7931_v10 = vld [vmem:[%s12336_s4 + $0x3ec] sm:$0xf0]  ;;  %1782 = vmatpush.bf16.msra.mxu0 %v5628_v3  ;;  %s575_s29 = scalar_lea.vmem %s12373_s3, %s5512_s26  ;;  %s7802_s27 = sshll.u32 %s8667_s30, 3 }
  0x2a   : > { %v5611_v11 = vld [vmem:[%s12336_s4 + $0xc0] sm:$0xf]  ;;  %v6012_v12 = vor.u32 %v7931_v10, %v6011_v9  ;;  %v7831_v13 = vld [vmem:[%s12336_s4 + $0xcc] sm:$0xf0]  ;;  %1795 = vmatpush.bf16.msra.mxu1 %v5756_v7  ;;  %s8924_s19 = scalar_lea.vmem %s12372_s2, %s8374_s21  ;;  %s577_s2 = sld [smem:[#allocation2]] }
  0x2b   : > { %v5739_v14 = vld [vmem:[%s12336_s4 + $0x1c0] sm:$0xf]  ;;  %v7863_v15 = vld [vmem:[%s12336_s4 + $0x1cc] sm:$0xf0]  ;;  %1808 = vmatpush.bf16.msra.mxu2 %v5884_v8  ;;  %v5612_v16 = vor.u32 %v7831_v13, %v5611_v11 }
  0x2c   : > { %v5740_v17 = vor.u32 %v7863_v15, %v5739_v14  ;;  %v5867_v18 = vld [vmem:[%s12336_s4 + $0x2c0] sm:$0xf]  ;;  %v7895_v19 = vld [vmem:[%s12336_s4 + $0x2cc] sm:$0xf0]  ;;  %1821 = vmatpush.bf16.msra.mxu3 %v6012_v12 }
  0x2d   : > { %v5995_v20 = vld [vmem:[%s12336_s4 + $0x3c0] sm:$0xf]  ;;  %v5868_v21 = vor.u32 %v7895_v19, %v5867_v18  ;;  %v7927_v22 = vld [vmem:[%s12336_s4 + $0x3cc] sm:$0xf0]  ;;  %1783 = vmatpush.bf16.msra.mxu0 %v5612_v16 }
  0x2e   : > { %v5595_v23 = vld [vmem:[%s12336_s4 + $0xa0] sm:$0xf]  ;;  %v7827_v24 = vld [vmem:[%s12336_s4 + $0xac] sm:$0xf0]  ;;  %v5996_v25 = vor.u32 %v7927_v22, %v5995_v20  ;;  %1796 = vmatpush.bf16.msra.mxu1 %v5740_v17 }
  0x2f   : > { %v5723_v26 = vld [vmem:[%s12336_s4 + $0x1a0] sm:$0xf]  ;;  %v7859_v27 = vld [vmem:[%s12336_s4 + $0x1ac] sm:$0xf0]  ;;  %v5596_v29 = vor.u32 %v7827_v24, %v5595_v23  ;;  %1809 = vmatpush.bf16.msra.mxu2 %v5868_v21 }
  0x30   : > { %v5851_v28 = vld [vmem:[%s12336_s4 + $0x2a0] sm:$0xf]  ;;  %v7891_v30 = vld [vmem:[%s12336_s4 + $0x2ac] sm:$0xf0]  ;;  %v5724_v33 = vor.u32 %v7859_v27, %v5723_v26  ;;  %1822 = vmatpush.bf16.msra.mxu3 %v5996_v25 }
  0x31   : > { %v5979_v31 = vld [vmem:[%s12336_s4 + $0x3a0] sm:$0xf]  ;;  %v7923_v32 = vld [vmem:[%s12336_s4 + $0x3ac] sm:$0xf0]  ;;  %v5852_v34 = vor.u32 %v7891_v30, %v5851_v28  ;;  %1784 = vmatpush.bf16.msra.mxu0 %v5596_v29 }
  0x32   : > { %v5579_v35 = vld [vmem:[%s12336_s4 + $0x80] sm:$0xf]  ;;  %v7823_v36 = vld [vmem:[%s12336_s4 + $0x8c] sm:$0xf0]  ;;  %v5980_v38 = vor.u32 %v7923_v32, %v5979_v31  ;;  %1797 = vmatpush.bf16.msra.mxu1 %v5724_v33  ;;  %v7833_v32 = vld [vmem:[%s12336_s4 + $0xe4] sm:$0xf] }
  0x33   : > { %v5707_v37 = vld [vmem:[%s12336_s4 + $0x180] sm:$0xf]  ;;  %v7855_v39 = vld [vmem:[%s12336_s4 + $0x18c] sm:$0xf0]  ;;  %v5580_v44 = vor.u32 %v7823_v36, %v5579_v35  ;;  %1810 = vmatpush.bf16.msra.mxu2 %v5852_v34  ;;  %v5629_v34 = vld [vmem:[%s12336_s4 + $0xf0] sm:$0xf0] }
  0x34   : > { %v5835_v40 = vld [vmem:[%s12336_s4 + $0x280] sm:$0xf]  ;;  %v7887_v41 = vld [vmem:[%s12336_s4 + $0x28c] sm:$0xf0]  ;;  %v5708_v45 = vor.u32 %v7855_v39, %v5707_v37  ;;  %1823 = vmatpush.bf16.msra.mxu3 %v5980_v38  ;;  %v7865_v39 = vld [vmem:[%s12336_s4 + $0x1e4] sm:$0xf] }
  0x35   : > { %v5963_v42 = vld [vmem:[%s12336_s4 + $0x380] sm:$0xf]  ;;  %v7919_v43 = vld [vmem:[%s12336_s4 + $0x38c] sm:$0xf0]  ;;  %v5836_v46 = vor.u32 %v7887_v41, %v5835_v40  ;;  %1785 = vmatpush.bf16.msra.mxu0 %v5580_v44  ;;  %v5757_v40 = vld [vmem:[%s12336_s4 + $0x1f0] sm:$0xf0] }
  0x36   : > { %v5563_v47 = vld [vmem:[%s12336_s4 + $0x60] sm:$0xf]  ;;  %v7819_v48 = vld [vmem:[%s12336_s4 + $0x6c] sm:$0xf0]  ;;  %v5964_v50 = vor.u32 %v7919_v43, %v5963_v42  ;;  %1798 = vmatpush.bf16.msra.mxu1 %v5708_v45 }
  0x37   : > { %v5691_v49 = vld [vmem:[%s12336_s4 + $0x160] sm:$0xf]  ;;  %v7851_v51 = vld [vmem:[%s12336_s4 + $0x16c] sm:$0xf0]  ;;  %v5564_v56 = vor.u32 %v7819_v48, %v5563_v47  ;;  %1811 = vmatpush.bf16.msra.mxu2 %v5836_v46  ;;  %v5632_v47 = vor.u32 %v7833_v32, %v5629_v34 }
  0x38   : > { %v5819_v52 = vld [vmem:[%s12336_s4 + $0x260] sm:$0xf]  ;;  %v7883_v53 = vld [vmem:[%s12336_s4 + $0x26c] sm:$0xf0]  ;;  %v5692_v57 = vor.u32 %v7851_v51, %v5691_v49  ;;  %1824 = vmatpush.bf16.msra.mxu3 %v5964_v50  ;;  %v581_v50 = vld [vmem:[%s8924_s19 + $0x18] sm:$0xff] }
  0x39   : > { %v5947_v54 = vld [vmem:[%s12336_s4 + $0x360] sm:$0xf]  ;;  %v7915_v55 = vld [vmem:[%s12336_s4 + $0x36c] sm:$0xf0]  ;;  %v5820_v58 = vor.u32 %v7883_v53, %v5819_v52  ;;  %1786 = vmatpush.bf16.msra.mxu0 %v5564_v56  ;;  %v7829_v53 = vld [vmem:[%s12336_s4 + $0xc4] sm:$0xf] }
  0x3a   : > { %v5547_v59 = vld [vmem:[%s12336_s4 + $0x40] sm:$0xf]  ;;  %v7815_v60 = vld [vmem:[%s12336_s4 + $0x4c] sm:$0xf0]  ;;  %v5948_v62 = vor.u32 %v7915_v55, %v5947_v54  ;;  %1799 = vmatpush.bf16.msra.mxu1 %v5692_v57  ;;  %v5613_v54 = vld [vmem:[%s12336_s4 + $0xd0] sm:$0xf0]  ;;  %v8951_v57 = vpack.c.bf16 %v581_v50, %v581_v50 }
  0x3b   : > { %v5675_v61 = vld [vmem:[%s12336_s4 + $0x140] sm:$0xf]  ;;  %v7847_v63 = vld [vmem:[%s12336_s4 + $0x14c] sm:$0xf0]  ;;  %v5548_v4 = vor.u32 %v7815_v60, %v5547_v59  ;;  %1812 = vmatpush.bf16.msra.mxu2 %v5820_v58  ;;  %v579_v58 = vld [vmem:[%s8924_s19 + $0x8] sm:$0xff]  ;;  %v5760_v59 = vor.u32 %v7865_v39, %v5757_v40 }
  0x3c   : > { %v5803_v0 = vld [vmem:[%s12336_s4 + $0x240] sm:$0xf]  ;;  %v7879_v1 = vld [vmem:[%s12336_s4 + $0x24c] sm:$0xf0]  ;;  %v5676_v6 = vor.u32 %v7847_v63, %v5675_v61  ;;  %1825 = vmatpush.bf16.msra.mxu3 %v5948_v62  ;;  %v7861_v61 = vld [vmem:[%s12336_s4 + $0x1c4] sm:$0xf] }
  0x3d   : > { %v5931_v2 = vld [vmem:[%s12336_s4 + $0x340] sm:$0xf]  ;;  %v7911_v3 = vld [vmem:[%s12336_s4 + $0x34c] sm:$0xf0]  ;;  %v5804_v7 = vor.u32 %v7879_v1, %v5803_v0  ;;  %1787 = vmatpush.bf16.msra.mxu0 %v5548_v4  ;;  %v5741_v62 = vld [vmem:[%s12336_s4 + $0x1d0] sm:$0xf0]  ;;  %v5616_v0 = vor.u32 %v7829_v53, %v5613_v54 }
  0x3e   : > { %v5531_v5 = vld [vmem:[%s12336_s4 + $0x20] sm:$0xf]  ;;  %v7811_v8 = vld [vmem:[%s12336_s4 + $0x2c] sm:$0xf0]  ;;  %v5932_v11 = vor.u32 %v7911_v3, %v5931_v2  ;;  %1800 = vmatpush.bf16.msra.mxu1 %v5676_v6  ;;  %v5597_v6 = vld [vmem:[%s12336_s4 + $0xb0] sm:$0xf0] }
  0x3f   : > { %v5659_v9 = vld [vmem:[%s12336_s4 + $0x120] sm:$0xf]  ;;  %v7843_v10 = vld [vmem:[%s12336_s4 + $0x12c] sm:$0xf0]  ;;  %v5532_v18 = vor.u32 %v7811_v8, %v5531_v5  ;;  %1813 = vmatpush.bf16.msra.mxu2 %v5804_v7  ;;  %v7825_v5 = vld [vmem:[%s12336_s4 + $0xa4] sm:$0xf]  ;;  %v8980_v7 = vpack.c.bf16 %v579_v58, %v579_v58  ;;  %v5744_v8 = vor.u32 %v7861_v61, %v5741_v62 }
  0x40   : > { %v5787_v12 = vld [vmem:[%s12336_s4 + $0x220] sm:$0xf]  ;;  %v7875_v13 = vld [vmem:[%s12336_s4 + $0x22c] sm:$0xf0]  ;;  %v5660_v22 = vor.u32 %v7843_v10, %v5659_v9  ;;  %1826 = vmatpush.bf16.msra.mxu3 %v5932_v11  ;;  %v7857_v10 = vld [vmem:[%s12336_s4 + $0x1a4] sm:$0xf] }
  0x41   : > { %v5915_v14 = vld [vmem:[%s12336_s4 + $0x320] sm:$0xf]  ;;  %v7907_v15 = vld [vmem:[%s12336_s4 + $0x32c] sm:$0xf0]  ;;  %v5788_v23 = vor.u32 %v7875_v13, %v5787_v12  ;;  %1788 = vmatpush.bf16.msra.mxu0 %v5532_v18  ;;  %v5725_v11 = vld [vmem:[%s12336_s4 + $0x1b0] sm:$0xf0]  ;;  %v5600_v13 = vor.u32 %v7825_v5, %v5597_v6 }
  0x42   : > { %v5515_v16 = vld [vmem:[%s12336_s4] sm:$0xf]  ;;  %v7807_v17 = vld [vmem:[%s12336_s4 + $0xc] sm:$0xf0]  ;;  %v5916_v27 = vor.u32 %v7907_v15, %v5915_v14  ;;  %1801 = vmatpush.bf16.msra.mxu1 %v5660_v22  ;;  %v7821_v18 = vld [vmem:[%s12336_s4 + $0x84] sm:$0xf] }
  0x43   : > { %v5643_v19 = vld [vmem:[%s12336_s4 + $0x100] sm:$0xf]  ;;  %v7839_v20 = vld [vmem:[%s12336_s4 + $0x10c] sm:$0xf0]  ;;  %v5516_v33 = vor.u32 %v7807_v17, %v5515_v16  ;;  %1814 = vmatpush.bf16.msra.mxu2 %v5788_v23  ;;  %v7853_v22 = vld [vmem:[%s12336_s4 + $0x184] sm:$0xf] }
  0x44   : > { %v5771_v21 = vld [vmem:[%s12336_s4 + $0x200] sm:$0xf]  ;;  %v7871_v24 = vld [vmem:[%s12336_s4 + $0x20c] sm:$0xf0]  ;;  %v5644_v36 = vor.u32 %v7839_v20, %v5643_v19  ;;  %1827 = vmatpush.bf16.msra.mxu3 %v5916_v27  ;;  %v5581_v19 = vld [vmem:[%s12336_s4 + $0x90] sm:$0xf0]  ;;  %v5728_v20 = vor.u32 %v7857_v10, %v5725_v11 }
  0x45   : > { %v5899_v25 = vld [vmem:[%s12336_s4 + $0x300] sm:$0xf]  ;;  %v7903_v26 = vld [vmem:[%s12336_s4 + $0x30c] sm:$0xf0]  ;;  %v5772_v37 = vor.u32 %v7871_v24, %v5771_v21  ;;  %1789 = vmatpush.bf16.msra.mxu0 %v5516_v33  ;;  %v5709_v23 = vld [vmem:[%s12336_s4 + $0x190] sm:$0xf0] }
  0x46   : > { %v6139_v28 = vld [vmem:[%s12336_s4 + $0x4e0] sm:$0xf]  ;;  %v7963_v29 = vld [vmem:[%s12336_s4 + $0x4ec] sm:$0xf0]  ;;  %v5900_v41 = vor.u32 %v7903_v26, %v5899_v25  ;;  %1802 = vmatpush.bf16.msra.mxu1 %v5644_v36  ;;  %v5584_v25 = vor.u32 %v7821_v18, %v5581_v19  ;;  %v5712_v33 = vor.u32 %v7853_v22, %v5709_v23  ;;  %v5693_v36 = vld [vmem:[%s12336_s4 + $0x170] sm:$0xf0] }
  0x47   : > { %v6267_v30 = vld [vmem:[%s12336_s4 + $0x5e0] sm:$0xf]  ;;  %v7995_v31 = vld [vmem:[%s12336_s4 + $0x5ec] sm:$0xf0]  ;;  %v6140_v42 = vor.u32 %v7963_v29, %v6139_v28  ;;  %1815 = vmatpush.bf16.msra.mxu2 %v5772_v37  ;;  %v7897_v10 = vld [vmem:[%s12336_s4 + $0x2e4] sm:$0xf] }
  0x48   : > { %v6283_v35 = vld [vmem:[%s12336_s4 + $0x600] sm:$0xf]  ;;  %v7999_v38 = vld [vmem:[%s12336_s4 + $0x60c] sm:$0xf0]  ;;  %v6268_v46 = vor.u32 %v7995_v31, %v6267_v30  ;;  %1828 = vmatpush.bf16.msra.mxu3 %v5900_v41  ;;  %v7817_v30 = vld [vmem:[%s12336_s4 + $0x64] sm:$0xf] }
  0x49   : > { %v6123_v43 = vld [vmem:[%s12336_s4 + $0x4c0] sm:$0xf]  ;;  %v7959_v44 = vld [vmem:[%s12336_s4 + $0x4cc] sm:$0xf0]  ;;  %v6284_v56 = vor.u32 %v7999_v38, %v6283_v35  ;;  %1834 = vmatpush.bf16.msrb.mxu0 %v6140_v42  ;;  %1803 = vmatmul.bf16.vlgmr.msra.gmra.mxu1 %v8980_v7  ;;  %v5565_v31 = vld [vmem:[%s12336_s4 + $0x70] sm:$0xf0] }
  0x4a   : > { %v6251_v45 = vld [vmem:[%s12336_s4 + $0x5c0] sm:$0xf]  ;;  %v580_v48 = vld [vmem:[%s8924_s19 + $0x10] sm:$0xff]  ;;  %v6124_v60 = vor.u32 %v7959_v44, %v6123_v43  ;;  %1847 = vmatpush.bf16.msrb.mxu1 %v6268_v46  ;;  %v7849_v35 = vld [vmem:[%s12336_s4 + $0x164] sm:$0xf]  ;;  %v5568_v38 = vor.u32 %v7817_v30, %v5565_v31 }
  0x4b   : > { %v578_v49 = vld [vmem:[%s8924_s19] sm:$0xff]  ;;  %v8938_v51 = vpack.c.bf16 %v580_v48, %v580_v48  ;;  %v7991_v52 = vld [vmem:[%s12336_s4 + $0x5cc] sm:$0xf0]  ;;  %1867 = vmatpush.bf16.msrb.mxu2 %v6284_v56  ;;  %1829 = vmatmul.bf16.vlgmr.msra.gmra.mxu3 %v8951_v57  ;;  %v5549_v44 = vld [vmem:[%s12336_s4 + $0x50] sm:$0xf0]  ;;  %v5696_v46 = vor.u32 %v7849_v35, %v5693_v36 }
  0x4c   : > { %v8949_v55 = vpack.c.bf16 %v578_v49, %v578_v49  ;;  %1873 = vmatpush.bf16.msrb.mxu3 %v5632_v47  ;;  %v6252_v63 = vor.u32 %v7991_v52, %v6251_v45  ;;  %v6107_v1 = vld [vmem:[%s12336_s4 + $0x4a0] sm:$0xf]  ;;  %v7955_v2 = vld [vmem:[%s12336_s4 + $0x4ac] sm:$0xf0]  ;;  %v7813_v43 = vld [vmem:[%s12336_s4 + $0x44] sm:$0xf] }
  0x4d   : > { %v6235_v3 = vld [vmem:[%s12336_s4 + $0x5a0] sm:$0xf]  ;;  %1816 = vmatmul.bf16.vlgmr.msra.gmra.mxu2 %v8938_v51  ;;  %v7987_v4 = vld [vmem:[%s12336_s4 + $0x5ac] sm:$0xf0]  ;;  %1835 = vmatpush.bf16.msrb.mxu0 %v6124_v60  ;;  %v6108_v9 = vor.u32 %v7955_v2, %v6107_v1  ;;  %v7845_v48 = vld [vmem:[%s12336_s4 + $0x144] sm:$0xf]  ;;  %v5552_v52 = vor.u32 %v7813_v43, %v5549_v44 }
  0x4e   : > { %1790 = vmatmul.bf16.vlgmr.msra.gmra.mxu0 %v8949_v55  ;;  %1848 = vmatpush.bf16.msrb.mxu1 %v6252_v63  ;;  %v6236_v12 = vor.u32 %v7987_v4, %v6235_v3  ;;  %v6091_v14 = vld [vmem:[%s12336_s4 + $0x480] sm:$0xf]  ;;  %v7951_v15 = vld [vmem:[%s12336_s4 + $0x48c] sm:$0xf0]  ;;  %v5677_v49 = vld [vmem:[%s12336_s4 + $0x150] sm:$0xf0] }
  0x4f   : > { %1886 = vmatpush.bf16.msra.mxu2 %v5760_v59  ;;  %v6219_v16 = vld [vmem:[%s12336_s4 + $0x580] sm:$0xf]  ;;  %v7983_v17 = vld [vmem:[%s12336_s4 + $0x58c] sm:$0xf0]  ;;  %v6092_v21 = vor.u32 %v7951_v15, %v6091_v14  ;;  %v7809_v59 = vld [vmem:[%s12336_s4 + $0x24] sm:$0xf]  ;;  %v5680_v61 = vor.u32 %v7845_v48, %v5677_v49 }
  0x50   : > { %1874 = vmatpush.bf16.msrb.mxu3 %v5616_v0  ;;  %v6220_v24 = vor.u32 %v7983_v17, %v6219_v16  ;;  %v6075_v26 = vld [vmem:[%s12336_s4 + $0x460] sm:$0xf]  ;;  %v7947_v27 = vld [vmem:[%s12336_s4 + $0x46c] sm:$0xf0]  ;;  %v5533_v60 = vld [vmem:[%s12336_s4 + $0x30] sm:$0xf0] }
  0x51   : > { %1836 = vmatpush.bf16.msrb.mxu0 %v6108_v9  ;;  %v6203_v28 = vld [vmem:[%s12336_s4 + $0x560] sm:$0xf]  ;;  %v7979_v29 = vld [vmem:[%s12336_s4 + $0x56c] sm:$0xf0]  ;;  %v6076_v34 = vor.u32 %v7947_v27, %v6075_v26  ;;  %v7841_v63 = vld [vmem:[%s12336_s4 + $0x124] sm:$0xf]  ;;  %v5536_v3 = vor.u32 %v7809_v59, %v5533_v60 }
  0x52   : > { %1849 = vmatpush.bf16.msrb.mxu1 %v6236_v12  ;;  %v584_v32 = vld [vmem:[%s8924_s19 + $0x30] sm:$0xff]  ;;  %v6204_v37 = vor.u32 %v7979_v29, %v6203_v28  ;;  %v6059_v39 = vld [vmem:[%s12336_s4 + $0x440] sm:$0xf]  ;;  %v7929_v12 = vld [vmem:[%s12336_s4 + $0x3e4] sm:$0xf] }
  0x53   : > { %1887 = vmatpush.bf16.msra.mxu2 %v5744_v8  ;;  %v7943_v40 = vld [vmem:[%s12336_s4 + $0x44c] sm:$0xf0]  ;;  %v6187_v41 = vld [vmem:[%s12336_s4 + $0x540] sm:$0xf]  ;;  %v9057_v45 = vpack.c.bf16 %v584_v32, %v584_v32  ;;  %v5661_v0 = vld [vmem:[%s12336_s4 + $0x130] sm:$0xf0] }
  0x54   : > { %1875 = vmatpush.bf16.msrb.mxu3 %v5600_v13  ;;  %v7975_v42 = vld [vmem:[%s12336_s4 + $0x54c] sm:$0xf0]  ;;  %v6060_v47 = vor.u32 %v7943_v40, %v6059_v39  ;;  %v6043_v53 = vld [vmem:[%s12336_s4 + $0x420] sm:$0xf]  ;;  %v7805_v8 = vld [vmem:[%s12336_s4 + $0x4] sm:$0xf]  ;;  %v5664_v14 = vor.u32 %v7841_v63, %v5661_v0 }
  0x55   : > { %1837 = vmatpush.bf16.msrb.mxu0 %v6092_v21  ;;  %v6188_v50 = vor.u32 %v7975_v42, %v6187_v41  ;;  %v7939_v54 = vld [vmem:[%s12336_s4 + $0x42c] sm:$0xf0]  ;;  %v6171_v56 = vld [vmem:[%s12336_s4 + $0x520] sm:$0xf]  ;;  %v5517_v9 = vld [vmem:[%s12336_s4 + $0x10] sm:$0xf0] }
  0x56   : > { %1850 = vmatpush.bf16.msrb.mxu1 %v6220_v24  ;;  %v7971_v58 = vld [vmem:[%s12336_s4 + $0x52c] sm:$0xf0]  ;;  %v6044_v62 = vor.u32 %v7939_v54, %v6043_v53  ;;  %v6027_v1 = vld [vmem:[%s12336_s4 + $0x400] sm:$0xf]  ;;  %v5885_v11 = vld [vmem:[%s12336_s4 + $0x2f0] sm:$0xf0] }
  0x57   : > { %1888 = vmatpush.bf16.msra.mxu2 %v5728_v20  ;;  %v6172_v2 = vor.u32 %v7971_v58, %v6171_v56  ;;  %v7935_v4 = vld [vmem:[%s12336_s4 + $0x40c] sm:$0xf0]  ;;  %v6155_v5 = vld [vmem:[%s12336_s4 + $0x500] sm:$0xf]  ;;  %v6013_v13 = vld [vmem:[%s12336_s4 + $0x3f0] sm:$0xf0]  ;;  %v5520_v20 = vor.u32 %v7805_v8, %v5517_v9  ;;  %v5888_v24 = vor.u32 %v7897_v10, %v5885_v11 }
  0x58   : > { %1876 = vmatpush.bf16.msrb.mxu3 %v5584_v25  ;;  %v7967_v6 = vld [vmem:[%s12336_s4 + $0x50c] sm:$0xf0]  ;;  %v6028_v15 = vor.u32 %v7935_v4, %v6027_v1  ;;  %v7961_v16 = vld [vmem:[%s12336_s4 + $0x4e4] sm:$0xf]  ;;  %v6141_v17 = vld [vmem:[%s12336_s4 + $0x4f0] sm:$0xf0]  ;;  %v6016_v25 = vor.u32 %v7929_v12, %v6013_v13 }
  0x59   : > { %1838 = vmatpush.bf16.msrb.mxu0 %v6076_v34  ;;  %v582_v18 = vld [vmem:[%s8924_s19 + $0x20] sm:$0xff]  ;;  %v6156_v19 = vor.u32 %v7967_v6, %v6155_v5  ;;  %v5645_v22 = vld [vmem:[%s12336_s4 + $0x110] sm:$0xf0]  ;;  %v583_v23 = vld [vmem:[%s8924_s19 + $0x28] sm:$0xff]  ;;  %v6144_v29 = vor.u32 %v7961_v16, %v6141_v17  ;;  %s5397_s19 = scalar_lea.hbm %s12349_s17, %s7802_s27  ;;  %s8477_s27 = scalar_lea.hbm %s12349_s17, 16 }
  0x5a   : > { %1851 = vmatpush.bf16.msrb.mxu1 %v6204_v37  ;;  %v7837_v21 = vld [vmem:[%s12336_s4 + $0x104] sm:$0xf]  ;;  %v6269_v27 = vld [vmem:[%s12336_s4 + $0x5f0] sm:$0xf0]  ;;  %v9144_v30 = vpack.c.bf16 %v582_v18, %v582_v18  ;;  %v9155_v35 = vpack.c.bf16 %v583_v23, %v583_v23  ;;  %s5401_s25 = sshll.u32 %s5397_s19, 4  ;;  %s5402_s25 = int_to_ptr.hbm [resolvable:$true] %s5401_s25 }
  0x5b   : > { %1889 = vmatpush.bf16.msra.mxu2 %v5712_v33  ;;  %v7993_v26 = vld [vmem:[%s12336_s4 + $0x5e4] sm:$0xf]  ;;  %v5869_v31 = vld [vmem:[%s12336_s4 + $0x2d0] sm:$0xf0]  ;;  %v5648_v34 = vor.u32 %v7837_v21, %v5645_v22  ;;  %s8471_s21 = sshra.s32 %s5402_s25, 4  ;;  %s8472_s21 = int_to_ptr.hbm [resolvable:$true] %s8471_s21 }
  0x5c   : > { %1877 = vmatpush.bf16.msrb.mxu3 %v5568_v38  ;;  %v7893_v28 = vld [vmem:[%s12336_s4 + $0x2c4] sm:$0xf]  ;;  %v5997_v33 = vld [vmem:[%s12336_s4 + $0x3d0] sm:$0xf0]  ;;  %v6272_v38 = vor.u32 %v7993_v26, %v6269_v27  ;;  %s8473_s3 = scalar_lea.hbm %s8472_s21, 8  ;;  %p8478_p0 = scmp.lt.s32.totalorder %s8472_s21, %s12349_s17 }
  0x5d   : > { %6297 = vmatmul.msk.bf16.vlgmr.msrb.gmra.mxu2 %vm1778_vm0, %v9057_v45  ;;  %1839 = vmatpush.bf16.msrb.mxu0 %v6060_v47  ;;  %v7925_v32 = vld [vmem:[%s12336_s4 + $0x3c4] sm:$0xf]  ;;  %v6125_v37 = vld [vmem:[%s12336_s4 + $0x4d0] sm:$0xf0]  ;;  %v5872_v39 = vor.u32 %v7893_v28, %v5869_v31  ;;  %p8474_p11 = scmp.ne.s32.totalorder %s8472_s21, %s8473_s3  ;;  %p8479_p1 = scmp.lt.s32.totalorder %s8477_s27, %s8473_s3 }
  0x5e   : > { %1852 = vmatpush.bf16.msrb.mxu1 %v6188_v50  ;;  %v7957_v36 = vld [vmem:[%s12336_s4 + $0x4c4] sm:$0xf]  ;;  %v6000_v40 = vor.u32 %v7925_v32, %v5997_v33  ;;  %v6253_v42 = vld [vmem:[%s12336_s4 + $0x5d0] sm:$0xf0] }
  0x5f   : > { %1890 = vmatpush.bf16.msra.mxu2 %v5696_v46  ;;  %v7989_v41 = vld [vmem:[%s12336_s4 + $0x5c4] sm:$0xf]  ;;  %v6128_v44 = vor.u32 %v7957_v36, %v6125_v37  ;;  %v5853_v46 = vld [vmem:[%s12336_s4 + $0x2b0] sm:$0xf0]  ;;  %p8475_p12 = pnand %p8474_p11, %p8684_p5  ;;  %p8480_p2 = por %p8479_p1, %p8478_p0 }
  0x60   : > { %1878 = vmatpush.bf16.msrb.mxu3 %v5552_v52  ;;  %v7889_v43 = vld [vmem:[%s12336_s4 + $0x2a4] sm:$0xf]  ;;  %v5981_v48 = vld [vmem:[%s12336_s4 + $0x3b0] sm:$0xf0]  ;;  %v6256_v52 = vor.u32 %v7989_v41, %v6253_v42 }
  0x61   : > { %1840 = vmatpush.bf16.msrb.mxu0 %v6044_v62  ;;  %v7921_v47 = vld [vmem:[%s12336_s4 + $0x3a4] sm:$0xf]  ;;  %v6109_v50 = vld [vmem:[%s12336_s4 + $0x4b0] sm:$0xf0]  ;;  %v5856_v53 = vor.u32 %v7889_v43, %v5853_v46  ;;  %p8476_p13 = pneg %p8475_p12 }
  0x62   : > { %1853 = vmatpush.bf16.msrb.mxu1 %v6172_v2  ;;  %v7953_v49 = vld [vmem:[%s12336_s4 + $0x4a4] sm:$0xf]  ;;  %v5984_v54 = vor.u32 %v7921_v47, %v5981_v48  ;;  %v6237_v58 = vld [vmem:[%s12336_s4 + $0x5b0] sm:$0xf0] }
  0x63   : > { %1891 = vmatpush.bf16.msra.mxu2 %v5680_v61  ;;  %v7985_v56 = vld [vmem:[%s12336_s4 + $0x5a4] sm:$0xf]  ;;  %v6112_v60 = vor.u32 %v7953_v49, %v6109_v50  ;;  %v5837_v61 = vld [vmem:[%s12336_s4 + $0x290] sm:$0xf0]  ;;  %p8481_p3 = pnand %p8480_p2, %p8476_p13 }
  0x64   : > { %1879 = vmatpush.bf16.msrb.mxu3 %v5536_v3  ;;  %v7885_v59 = vld [vmem:[%s12336_s4 + $0x284] sm:$0xf]  ;;  %v5965_v63 = vld [vmem:[%s12336_s4 + $0x390] sm:$0xf0]  ;;  %v6240_v2 = vor.u32 %v7985_v56, %v6237_v58  ;;  %v5635_v56 = vld [vmem:[%s12336_s4 + $0xe8] sm:$0xf] }
  0x65   : > { %1841 = vmatpush.bf16.msrb.mxu0 %v6028_v15  ;;  %v7917_v62 = vld [vmem:[%s12336_s4 + $0x384] sm:$0xf]  ;;  %v6093_v1 = vld [vmem:[%s12336_s4 + $0x490] sm:$0xf0]  ;;  %v5840_v3 = vor.u32 %v7885_v59, %v5837_v61  ;;  %v7836_v58 = vld [vmem:[%s12336_s4 + $0xf4] sm:$0xf0] }
  0x66   : > { %1854 = vmatpush.bf16.msrb.mxu1 %v6156_v19  ;;  %v7949_v0 = vld [vmem:[%s12336_s4 + $0x484] sm:$0xf]  ;;  %v5968_v4 = vor.u32 %v7917_v62, %v5965_v63  ;;  %v6221_v6 = vld [vmem:[%s12336_s4 + $0x590] sm:$0xf0]  ;;  %v5763_v59 = vld [vmem:[%s12336_s4 + $0x1e8] sm:$0xf] }
  0x67   : > { %1892 = vmatpush.bf16.msra.mxu2 %v5664_v14  ;;  %v7981_v5 = vld [vmem:[%s12336_s4 + $0x584] sm:$0xf]  ;;  %v6096_v9 = vor.u32 %v7949_v0, %v6093_v1  ;;  %v5821_v10 = vld [vmem:[%s12336_s4 + $0x270] sm:$0xf0]  ;;  %v7868_v61 = vld [vmem:[%s12336_s4 + $0x1f4] sm:$0xf0] }
  0x68   : > { %1880 = vmatpush.bf16.msrb.mxu3 %v5520_v20  ;;  %1842 = vmatmul.bf16.vlgmr.msrb.gmra.mxu0 %v9144_v30  ;;  %v7881_v8 = vld [vmem:[%s12336_s4 + $0x264] sm:$0xf]  ;;  %v5949_v12 = vld [vmem:[%s12336_s4 + $0x370] sm:$0xf0]  ;;  %v6224_v15 = vor.u32 %v7981_v5, %v6221_v6  ;;  %v5636_v6 = vor.u32 %v7836_v58, %v5635_v56  ;;  %v7820_v56 = vld [vmem:[%s12336_s4 + $0x74] sm:$0xf0] }
  0x69   : > { %1899 = vmatpush.bf16.msra.mxu0 %v5888_v24  ;;  %1855 = vmatmul.bf16.vlgmr.msrb.gmra.mxu1 %v9155_v35  ;;  %v7913_v11 = vld [vmem:[%s12336_s4 + $0x364] sm:$0xf]  ;;  %v6077_v14 = vld [vmem:[%s12336_s4 + $0x470] sm:$0xf0]  ;;  %v5824_v16 = vor.u32 %v7881_v8, %v5821_v10  ;;  %v7900_v8 = vld [vmem:[%s12336_s4 + $0x2f4] sm:$0xf0] }
  0x6a   : > { %1912 = vmatpush.bf16.msra.mxu1 %v6016_v25  ;;  %v7945_v13 = vld [vmem:[%s12336_s4 + $0x464] sm:$0xf]  ;;  %v5952_v17 = vor.u32 %v7913_v11, %v5949_v12  ;;  %v6205_v19 = vld [vmem:[%s12336_s4 + $0x570] sm:$0xf0]  ;;  %v7932_v10 = vld [vmem:[%s12336_s4 + $0x3f4] sm:$0xf0]  ;;  %v5764_v11 = vor.u32 %v7868_v61, %v5763_v59 }
  0x6b   : > { %1893 = vmatpush.bf16.msra.mxu2 %v5648_v34  ;;  %1881 = vmatmul.bf16.vlgmr.msrb.gmra.mxu3 %v8949_v55  ;;  %v7977_v18 = vld [vmem:[%s12336_s4 + $0x564] sm:$0xf]  ;;  %v6080_v21 = vor.u32 %v7945_v13, %v6077_v14  ;;  %v5805_v22 = vld [vmem:[%s12336_s4 + $0x250] sm:$0xf0]  ;;  %v5619_v13 = vld [vmem:[%s12336_s4 + $0xc8] sm:$0xf] }
  0x6c   : > { %1925 = vmatpush.bf16.msra.mxu3 %v6144_v29  ;;  %v7877_v20 = vld [vmem:[%s12336_s4 + $0x244] sm:$0xf]  ;;  %v5933_v24 = vld [vmem:[%s12336_s4 + $0x350] sm:$0xf0]  ;;  %v6208_v27 = vor.u32 %v7977_v18, %v6205_v19  ;;  %v7832_v14 = vld [vmem:[%s12336_s4 + $0xd4] sm:$0xf0] }
  0x6d   : > { %1900 = vmatpush.bf16.msra.mxu0 %v5872_v39  ;;  %v7909_v23 = vld [vmem:[%s12336_s4 + $0x344] sm:$0xf]  ;;  %v6061_v26 = vld [vmem:[%s12336_s4 + $0x450] sm:$0xf0]  ;;  %v5808_v28 = vor.u32 %v7877_v20, %v5805_v22  ;;  %v5875_v20 = vld [vmem:[%s12336_s4 + $0x2c8] sm:$0xf] }
  0x6e   : > { %1913 = vmatpush.bf16.msra.mxu1 %v6000_v40  ;;  %1894 = vmatmul.bf16.vlgmr.msra.gmra.mxu2 %v8980_v7  ;;  %v7941_v25 = vld [vmem:[%s12336_s4 + $0x444] sm:$0xf]  ;;  %v5936_v29 = vor.u32 %v7909_v23, %v5933_v24  ;;  %v6189_v32 = vld [vmem:[%s12336_s4 + $0x550] sm:$0xf0]  ;;  %v7896_v22 = vld [vmem:[%s12336_s4 + $0x2d4] sm:$0xf0] }
  0x6f   : > { %1938 = vmatpush.bf16.msrb.mxu2 %v6272_v38  ;;  %v7973_v31 = vld [vmem:[%s12336_s4 + $0x544] sm:$0xf]  ;;  %v6064_v34 = vor.u32 %v7941_v25, %v6061_v26  ;;  %v5789_v36 = vld [vmem:[%s12336_s4 + $0x230] sm:$0xf0]  ;;  %v6003_v23 = vld [vmem:[%s12336_s4 + $0x3c8] sm:$0xf] }
  0x70   : > { %1926 = vmatpush.bf16.msra.mxu3 %v6128_v44  ;;  %v7873_v33 = vld [vmem:[%s12336_s4 + $0x224] sm:$0xf]  ;;  %v5917_v38 = vld [vmem:[%s12336_s4 + $0x330] sm:$0xf0]  ;;  %v6192_v41 = vor.u32 %v7973_v31, %v6189_v32  ;;  %v7928_v24 = vld [vmem:[%s12336_s4 + $0x3d4] sm:$0xf0]  ;;  %v5876_v31 = vor.u32 %v7896_v22, %v5875_v20 }
  0x71   : > { %1901 = vmatpush.bf16.msra.mxu0 %v5856_v53  ;;  %v7905_v37 = vld [vmem:[%s12336_s4 + $0x324] sm:$0xf]  ;;  %v6045_v40 = vld [vmem:[%s12336_s4 + $0x430] sm:$0xf0]  ;;  %v5792_v44 = vor.u32 %v7873_v33, %v5789_v36  ;;  %v5603_v26 = vld [vmem:[%s12336_s4 + $0xa8] sm:$0xf]  ;;  %v6004_v32 = vor.u32 %v7928_v24, %v6003_v23 }
  0x72   : > { %1914 = vmatpush.bf16.msra.mxu1 %v5984_v54  ;;  %v7937_v39 = vld [vmem:[%s12336_s4 + $0x424] sm:$0xf]  ;;  %v6173_v43 = vld [vmem:[%s12336_s4 + $0x530] sm:$0xf0]  ;;  %v5920_v46 = vor.u32 %v7905_v37, %v5917_v38  ;;  %v5859_v33 = vld [vmem:[%s12336_s4 + $0x2a8] sm:$0xf] }
  0x73   : > { %1939 = vmatpush.bf16.msrb.mxu2 %v6256_v52  ;;  %v7969_v42 = vld [vmem:[%s12336_s4 + $0x524] sm:$0xf]  ;;  %v5773_v48 = vld [vmem:[%s12336_s4 + $0x210] sm:$0xf0]  ;;  %v6048_v50 = vor.u32 %v7937_v39, %v6045_v40  ;;  %v5987_v37 = vld [vmem:[%s12336_s4 + $0x3a8] sm:$0xf] }
  0x74   : > { %1927 = vmatpush.bf16.msra.mxu3 %v6112_v60  ;;  %v7869_v47 = vld [vmem:[%s12336_s4 + $0x204] sm:$0xf]  ;;  %v5901_v52 = vld [vmem:[%s12336_s4 + $0x310] sm:$0xf0]  ;;  %v6176_v60 = vor.u32 %v7969_v42, %v6173_v43  ;;  %v7924_v38 = vld [vmem:[%s12336_s4 + $0x3b4] sm:$0xf0] }
  0x75   : > { %1902 = vmatpush.bf16.msra.mxu0 %v5840_v3  ;;  %v7901_v49 = vld [vmem:[%s12336_s4 + $0x304] sm:$0xf]  ;;  %v6029_v54 = vld [vmem:[%s12336_s4 + $0x410] sm:$0xf0]  ;;  %v5776_v0 = vor.u32 %v7869_v47, %v5773_v48  ;;  %v5587_v40 = vld [vmem:[%s12336_s4 + $0x88] sm:$0xf] }
  0x76   : > { %1915 = vmatpush.bf16.msra.mxu1 %v5968_v4  ;;  %v7933_v53 = vld [vmem:[%s12336_s4 + $0x404] sm:$0xf]  ;;  %v6285_v63 = vld [vmem:[%s12336_s4 + $0x610] sm:$0xf0]  ;;  %v5904_v1 = vor.u32 %v7901_v49, %v5901_v52  ;;  %v5891_v4 = vld [vmem:[%s12336_s4 + $0x2e8] sm:$0xf] }
  0x77   : > { %1940 = vmatpush.bf16.msrb.mxu2 %v6240_v2  ;;  %v7997_v62 = vld [vmem:[%s12336_s4 + $0x604] sm:$0xf]  ;;  %v6157_v3 = vld [vmem:[%s12336_s4 + $0x510] sm:$0xf0]  ;;  %v6032_v5 = vor.u32 %v7933_v53, %v6029_v54  ;;  %v5892_v18 = vor.u32 %v7900_v8, %v5891_v4  ;;  %v5715_v42 = vld [vmem:[%s12336_s4 + $0x188] sm:$0xf] }
  0x78   : > { %1928 = vmatpush.bf16.msra.mxu3 %v6096_v9  ;;  %v7965_v2 = vld [vmem:[%s12336_s4 + $0x504] sm:$0xf]  ;;  %v6019_v9 = vld [vmem:[%s12336_s4 + $0x3e8] sm:$0xf]  ;;  %v6288_v12 = vor.u32 %v7997_v62, %v6285_v63  ;;  %v7856_v43 = vld [vmem:[%s12336_s4 + $0x194] sm:$0xf0] }
  0x79   : > { %1903 = vmatpush.bf16.msra.mxu0 %v5824_v16  ;;  %v5747_v16 = vld [vmem:[%s12336_s4 + $0x1c8] sm:$0xf]  ;;  %v6020_v19 = vor.u32 %v7932_v10, %v6019_v9  ;;  %v7888_v49 = vld [vmem:[%s12336_s4 + $0x294] sm:$0xf0]  ;;  %v5716_v53 = vor.u32 %v7856_v43, %v5715_v42 }
  0x7a   : > { %1916 = vmatpush.bf16.msra.mxu1 %v5952_v17  ;;  %v7864_v17 = vld [vmem:[%s12336_s4 + $0x1d4] sm:$0xf0]  ;;  %v5843_v47 = vld [vmem:[%s12336_s4 + $0x288] sm:$0xf] }
  0x7b   : > { %1941 = vmatpush.bf16.msrb.mxu2 %v6224_v15  ;;  %v6160_v15 = vor.u32 %v7965_v2, %v6157_v3  ;;  %v5748_v25 = vor.u32 %v7864_v17, %v5747_v16  ;;  %v7920_v52 = vld [vmem:[%s12336_s4 + $0x394] sm:$0xf0]  ;;  %v5571_v54 = vld [vmem:[%s12336_s4 + $0x68] sm:$0xf] }
  0x7c   : > { %1929 = vmatpush.bf16.msra.mxu3 %v6080_v21  ;;  %v5620_v21 = vor.u32 %v7832_v14, %v5619_v13  ;;  %v5699_v58 = vld [vmem:[%s12336_s4 + $0x168] sm:$0xf]  ;;  %v7852_v59 = vld [vmem:[%s12336_s4 + $0x174] sm:$0xf0]  ;;  %v5572_v63 = vor.u32 %v7820_v56, %v5571_v54 }
  0x7d   : > { %1904 = vmatpush.bf16.msra.mxu0 %v5808_v28  ;;  %v5731_v28 = vld [vmem:[%s12336_s4 + $0x1a8] sm:$0xf]  ;;  %v7916_v2 = vld [vmem:[%s12336_s4 + $0x374] sm:$0xf0]  ;;  %v5700_v3 = vor.u32 %v7852_v59, %v5699_v58 }
  0x7e   : > { %1917 = vmatpush.bf16.msra.mxu1 %v5936_v29  ;;  %v7860_v29 = vld [vmem:[%s12336_s4 + $0x1b4] sm:$0xf0]  ;;  %v5827_v62 = vld [vmem:[%s12336_s4 + $0x268] sm:$0xf] }
  0x7f   : > { %1942 = vmatpush.bf16.msrb.mxu2 %v6208_v27  ;;  %v7828_v27 = vld [vmem:[%s12336_s4 + $0xb4] sm:$0xf0]  ;;  %v5732_v39 = vor.u32 %v7860_v29, %v5731_v28  ;;  %v5555_v4 = vld [vmem:[%s12336_s4 + $0x48] sm:$0xf] }
  0x80   : > { %1930 = vmatpush.bf16.msra.mxu3 %v6064_v34  ;;  %v7892_v34 = vld [vmem:[%s12336_s4 + $0x2b4] sm:$0xf0]  ;;  %v5604_v36 = vor.u32 %v7828_v27, %v5603_v26  ;;  %v5939_v14 = vld [vmem:[%s12336_s4 + $0x348] sm:$0xf] }
  0x81   : > { %1905 = vmatpush.bf16.msra.mxu0 %v5792_v44  ;;  %v5860_v44 = vor.u32 %v7892_v34, %v5859_v33  ;;  %v7848_v8 = vld [vmem:[%s12336_s4 + $0x154] sm:$0xf0]  ;;  %v5539_v17 = vld [vmem:[%s12336_s4 + $0x28] sm:$0xf] }
  0x82   : > { %1918 = vmatpush.bf16.msra.mxu1 %v5920_v46  ;;  %v5988_v46 = vor.u32 %v7924_v38, %v5987_v37  ;;  %v7880_v13 = vld [vmem:[%s12336_s4 + $0x254] sm:$0xf0]  ;;  %v5795_v23 = vld [vmem:[%s12336_s4 + $0x228] sm:$0xf] }
  0x83   : > { %1943 = vmatpush.bf16.msrb.mxu2 %v6192_v41  ;;  %v7824_v41 = vld [vmem:[%s12336_s4 + $0x94] sm:$0xf0]  ;;  %v5923_v26 = vld [vmem:[%s12336_s4 + $0x328] sm:$0xf] }
  0x84   : > { %1931 = vmatpush.bf16.msra.mxu3 %v6048_v50  ;;  %v5588_v48 = vor.u32 %v7824_v41, %v5587_v40  ;;  %v5971_v50 = vld [vmem:[%s12336_s4 + $0x388] sm:$0xf]  ;;  %v7844_v20 = vld [vmem:[%s12336_s4 + $0x134] sm:$0xf0] }
  0x85   : > { %1906 = vmatpush.bf16.msra.mxu0 %v5776_v0  ;;  %v5972_v61 = vor.u32 %v7920_v52, %v5971_v50  ;;  %v7884_v0 = vld [vmem:[%s12336_s4 + $0x274] sm:$0xf0]  ;;  %v5523_v28 = vld [vmem:[%s12336_s4 + $0x8] sm:$0xf]  ;;  %v5637_v50 = vld [vmem:[%s12336_s4 + $0xf8] sm:$0xf0] }
  0x86   : > { %1919 = vmatpush.bf16.msra.mxu1 %v5904_v1  ;;  %v5955_v1 = vld [vmem:[%s12336_s4 + $0x368] sm:$0xf]  ;;  %v5828_v9 = vor.u32 %v7884_v0, %v5827_v62  ;;  %v7876_v24 = vld [vmem:[%s12336_s4 + $0x234] sm:$0xf0] }
  0x87   : > { %1944 = vmatpush.bf16.msrb.mxu2 %v6176_v60  ;;  %v5844_v60 = vor.u32 %v7888_v49, %v5843_v47  ;;  %v5956_v10 = vor.u32 %v7916_v2, %v5955_v1  ;;  %v7908_v27 = vld [vmem:[%s12336_s4 + $0x334] sm:$0xf0]  ;;  %v6147_v34 = vld [vmem:[%s12336_s4 + $0x4e8] sm:$0xf]  ;;  %v5796_v38 = vor.u32 %v7876_v24, %v5795_v23  ;;  %v7834_v47 = vld [vmem:[%s12336_s4 + $0xec] sm:$0xf] }
  0x88   : > { %1932 = vmatpush.bf16.msra.mxu3 %v6032_v5  ;;  %1907 = vmatmul.bf16.vlgmr.msra.gmra.mxu0 %v8938_v51  ;;  %v7816_v5 = vld [vmem:[%s12336_s4 + $0x54] sm:$0xf0]  ;;  %v6275_v37 = vld [vmem:[%s12336_s4 + $0x5e8] sm:$0xf]  ;;  %v7866_v1 = vld [vmem:[%s12336_s4 + $0x1ec] sm:$0xf] }
  0x89   : > { %1958 = vmatpush.bf16.msrb.mxu0 %v6288_v12  ;;  %1920 = vmatmul.bf16.vlgmr.msra.gmra.mxu1 %v8951_v57  ;;  %v5556_v12 = vor.u32 %v7816_v5, %v5555_v4  ;;  %v7840_v33 = vld [vmem:[%s12336_s4 + $0x114] sm:$0xf0]  ;;  %v5779_v41 = vld [vmem:[%s12336_s4 + $0x208] sm:$0xf]  ;;  %v5765_v2 = vld [vmem:[%s12336_s4 + $0x1f8] sm:$0xf0] }
  0x8a   : > { %1964 = vmatpush.bf16.msrb.mxu1 %v5636_v6  ;;  %v5683_v6 = vld [vmem:[%s12336_s4 + $0x148] sm:$0xf]  ;;  %v7996_v40 = vld [vmem:[%s12336_s4 + $0x5f4] sm:$0xf0]  ;;  %v7830_v4 = vld [vmem:[%s12336_s4 + $0xcc] sm:$0xf] }
  0x8b   : > { %1945 = vmatpush.bf16.msrb.mxu2 %v6160_v15  ;;  %1933 = vmatmul.bf16.vlgmr.msra.gmra.mxu3 %v9144_v30  ;;  %v7912_v15 = vld [vmem:[%s12336_s4 + $0x354] sm:$0xf0]  ;;  %v5684_v16 = vor.u32 %v7848_v8, %v5683_v6  ;;  %v6291_v52 = vld [vmem:[%s12336_s4 + $0x608] sm:$0xf]  ;;  %v6276_v54 = vor.u32 %v7996_v40, %v6275_v37  ;;  %v5621_v5 = vld [vmem:[%s12336_s4 + $0xd8] sm:$0xf0] }
  0x8c   : > { %1977 = vmatpush.bf16.msrb.mxu3 %v5764_v11  ;;  %v5811_v11 = vld [vmem:[%s12336_s4 + $0x248] sm:$0xf]  ;;  %v5940_v22 = vor.u32 %v7912_v15, %v5939_v14  ;;  %v7872_v42 = vld [vmem:[%s12336_s4 + $0x214] sm:$0xf0]  ;;  %v7862_v14 = vld [vmem:[%s12336_s4 + $0x1cc] sm:$0xf] }
  0x8d   : > { %1990 = vmatpush.bf16.msra.mxu0 %v5892_v18  ;;  %v7812_v18 = vld [vmem:[%s12336_s4 + $0x34] sm:$0xf0]  ;;  %v6131_v56 = vld [vmem:[%s12336_s4 + $0x4c8] sm:$0xf]  ;;  %v5780_v59 = vor.u32 %v7872_v42, %v5779_v41  ;;  %v5749_v15 = vld [vmem:[%s12336_s4 + $0x1d8] sm:$0xf0] }
  0x8e   : > { %1965 = vmatpush.bf16.msrb.mxu1 %v5620_v21  ;;  %1946 = vmatmul.bf16.vlgmr.msrb.gmra.mxu2 %v9155_v35  ;;  %v5812_v21 = vor.u32 %v7880_v13, %v5811_v11  ;;  %v7960_v58 = vld [vmem:[%s12336_s4 + $0x4d4] sm:$0xf0]  ;;  %v6115_v8 = vld [vmem:[%s12336_s4 + $0x4a8] sm:$0xf]  ;;  %v5624_v13 = vor.u32 %v7830_v4, %v5621_v5  ;;  %v7854_v40 = vld [vmem:[%s12336_s4 + $0x18c] sm:$0xf] }
  0x8f   : > { %2003 = vmatpush.bf16.msra.mxu2 %v6020_v19  ;;  %v5667_v19 = vld [vmem:[%s12336_s4 + $0x128] sm:$0xf]  ;;  %v7992_v62 = vld [vmem:[%s12336_s4 + $0x5d4] sm:$0xf0]  ;;  %v5717_v41 = vld [vmem:[%s12336_s4 + $0x198] sm:$0xf0] }
  0x90   : > { %1978 = vmatpush.bf16.msrb.mxu3 %v5748_v25  ;;  %v5540_v25 = vor.u32 %v7812_v18, %v5539_v17  ;;  %v5668_v29 = vor.u32 %v7844_v20, %v5667_v19  ;;  %v6243_v11 = vld [vmem:[%s12336_s4 + $0x5a8] sm:$0xf]  ;;  %v7826_v17 = vld [vmem:[%s12336_s4 + $0xac] sm:$0xf]  ;;  %v5605_v18 = vld [vmem:[%s12336_s4 + $0xb8] sm:$0xf0] }
  0x91   : > { %1991 = vmatpush.bf16.msra.mxu0 %v5876_v31  ;;  %v7808_v31 = vld [vmem:[%s12336_s4 + $0x14] sm:$0xf0]  ;;  %v6099_v20 = vld [vmem:[%s12336_s4 + $0x488] sm:$0xf]  ;;  %v7846_v4 = vld [vmem:[%s12336_s4 + $0x14c] sm:$0xf] }
  0x92   : > { %1966 = vmatpush.bf16.msrb.mxu1 %v5604_v36  ;;  %v7964_v36 = vld [vmem:[%s12336_s4 + $0x4f4] sm:$0xf0]  ;;  %v5524_v43 = vor.u32 %v7808_v31, %v5523_v28  ;;  %v6227_v23 = vld [vmem:[%s12336_s4 + $0x588] sm:$0xf]  ;;  %v5589_v31 = vld [vmem:[%s12336_s4 + $0x98] sm:$0xf0] }
  0x93   : > { %2004 = vmatpush.bf16.msra.mxu2 %v6004_v32  ;;  %v5651_v32 = vld [vmem:[%s12336_s4 + $0x108] sm:$0xf]  ;;  %v6148_v49 = vor.u32 %v7964_v36, %v6147_v34  ;;  %v7984_v24 = vld [vmem:[%s12336_s4 + $0x594] sm:$0xf0]  ;;  %v5685_v5 = vld [vmem:[%s12336_s4 + $0x158] sm:$0xf0] }
  0x94   : > { %1979 = vmatpush.bf16.msrb.mxu3 %v5732_v39  ;;  %v5924_v39 = vor.u32 %v7908_v27, %v5923_v26  ;;  %v7858_v26 = vld [vmem:[%s12336_s4 + $0x1ac] sm:$0xf]  ;;  %v5733_v27 = vld [vmem:[%s12336_s4 + $0x1b8] sm:$0xf0]  ;;  %v7948_v34 = vld [vmem:[%s12336_s4 + $0x474] sm:$0xf0] }
  0x95   : > { %1992 = vmatpush.bf16.msra.mxu0 %v5860_v44  ;;  %v5907_v44 = vld [vmem:[%s12336_s4 + $0x308] sm:$0xf]  ;;  %v5736_v36 = vor.u32 %v7858_v26, %v5733_v27 }
  0x96   : > { %1967 = vmatpush.bf16.msrb.mxu1 %v5588_v48  ;;  %v5652_v48 = vor.u32 %v7840_v33, %v5651_v32  ;;  %v6228_v32 = vor.u32 %v7984_v24, %v6227_v23  ;;  %v6083_v33 = vld [vmem:[%s12336_s4 + $0x468] sm:$0xf]  ;;  %v7806_v24 = vld [vmem:[%s12336_s4 + $0xc] sm:$0xf] }
  0x97   : > { %2005 = vmatpush.bf16.msra.mxu2 %v5988_v46  ;;  %v7904_v46 = vld [vmem:[%s12336_s4 + $0x314] sm:$0xf0]  ;;  %v6211_v37 = vld [vmem:[%s12336_s4 + $0x568] sm:$0xf]  ;;  %v6084_v42 = vor.u32 %v7948_v34, %v6083_v33  ;;  %v7894_v33 = vld [vmem:[%s12336_s4 + $0x2cc] sm:$0xf] }
  0x98   : > { %1980 = vmatpush.bf16.msrb.mxu3 %v5716_v53  ;;  %6298 = vmatmul.msk.bf16.vlgmr.msrb.gmra.mxu0 %vm1778_vm0, %v9057_v45  ;;  %v8000_v53 = vld [vmem:[%s12336_s4 + $0x614] sm:$0xf0]  ;;  %v5877_v34 = vld [vmem:[%s12336_s4 + $0x2d8] sm:$0xf0] }
  0x99   : > { %1993 = vmatpush.bf16.msra.mxu0 %v5844_v60  ;;  %v5908_v60 = vor.u32 %v7904_v46, %v5907_v44  ;;  %v6292_v0 = vor.u32 %v8000_v53, %v6291_v52  ;;  %v5573_v44 = vld [vmem:[%s12336_s4 + $0x78] sm:$0xf0]  ;;  %v7976_v52 = vld [vmem:[%s12336_s4 + $0x554] sm:$0xf0] }
  0x9a   : > { %1968 = vmatpush.bf16.msrb.mxu1 %v5572_v63  ;;  %v5640_v63 = vor.u32 %v7834_v47, %v5637_v50  ;;  %v6067_v47 = vld [vmem:[%s12336_s4 + $0x448] sm:$0xf] }
  0x9b   : > { %2006 = vmatpush.bf16.msra.mxu2 %v5972_v61  ;;  %v6259_v61 = vld [vmem:[%s12336_s4 + $0x5c8] sm:$0xf] }
  0x9c   : > { %1981 = vmatpush.bf16.msrb.mxu3 %v5700_v3  ;;  %v6132_v3 = vor.u32 %v7960_v58, %v6131_v56  ;;  %v6260_v6 = vor.u32 %v7992_v62, %v6259_v61  ;;  %v6195_v50 = vld [vmem:[%s12336_s4 + $0x548] sm:$0xf]  ;;  %v5701_v56 = vld [vmem:[%s12336_s4 + $0x178] sm:$0xf0] }
  0x9d   : > { %1994 = vmatpush.bf16.msra.mxu0 %v5828_v9  ;;  %v7956_v9 = vld [vmem:[%s12336_s4 + $0x4b4] sm:$0xf0]  ;;  %v6196_v61 = vor.u32 %v7976_v52, %v6195_v50  ;;  %v6051_v62 = vld [vmem:[%s12336_s4 + $0x428] sm:$0xf]  ;;  %v7890_v50 = vld [vmem:[%s12336_s4 + $0x2ac] sm:$0xf] }
  0x9e   : > { %1969 = vmatpush.bf16.msrb.mxu1 %v5556_v12  ;;  %v7988_v12 = vld [vmem:[%s12336_s4 + $0x5b4] sm:$0xf0]  ;;  %v5861_v52 = vld [vmem:[%s12336_s4 + $0x2b8] sm:$0xf0] }
  0x9f   : > { %2007 = vmatpush.bf16.msra.mxu2 %v5956_v10  ;;  %v5768_v10 = vor.u32 %v7866_v1, %v5765_v2  ;;  %v6244_v19 = vor.u32 %v7988_v12, %v6243_v11  ;;  %v6179_v1 = vld [vmem:[%s12336_s4 + $0x528] sm:$0xf]  ;;  %v7972_v2 = vld [vmem:[%s12336_s4 + $0x534] sm:$0xf0] }
  0xa0   : > { %1982 = vmatpush.bf16.msrb.mxu3 %v5684_v16  ;;  %v6116_v16 = vor.u32 %v7956_v9, %v6115_v8  ;;  %v7810_v8 = vld [vmem:[%s12336_s4 + $0x2c] sm:$0xf]  ;;  %v5541_v9 = vld [vmem:[%s12336_s4 + $0x38] sm:$0xf0]  ;;  %v6180_v11 = vor.u32 %v7972_v2, %v6179_v1  ;;  %v7936_v12 = vld [vmem:[%s12336_s4 + $0x414] sm:$0xf0] }
  0xa1   : > { %1995 = vmatpush.bf16.msra.mxu0 %v5812_v21  ;;  %v7952_v21 = vld [vmem:[%s12336_s4 + $0x494] sm:$0xf0]  ;;  %v7886_v1 = vld [vmem:[%s12336_s4 + $0x28c] sm:$0xf]  ;;  %v5845_v2 = vld [vmem:[%s12336_s4 + $0x298] sm:$0xf0] }
  0xa2   : > { %1970 = vmatpush.bf16.msrb.mxu1 %v5540_v25  ;;  %v5608_v25 = vor.u32 %v7826_v17, %v5605_v18  ;;  %v6100_v28 = vor.u32 %v7952_v21, %v6099_v20  ;;  %v5893_v17 = vld [vmem:[%s12336_s4 + $0x2f8] sm:$0xf0]  ;;  %v7930_v18 = vld [vmem:[%s12336_s4 + $0x3ec] sm:$0xf] }
  0xa3   : > { %2008 = vmatpush.bf16.msra.mxu2 %v5940_v22  ;;  %v5752_v22 = vor.u32 %v7862_v14, %v5749_v15  ;;  %v7968_v14 = vld [vmem:[%s12336_s4 + $0x514] sm:$0xf0]  ;;  %v5688_v15 = vor.u32 %v7846_v4, %v5685_v5  ;;  %v6021_v20 = vld [vmem:[%s12336_s4 + $0x3f8] sm:$0xf0]  ;;  %v7842_v21 = vld [vmem:[%s12336_s4 + $0x12c] sm:$0xf] }
  0xa4   : > { %1983 = vmatpush.bf16.msrb.mxu3 %v5668_v29  ;;  %v7822_v29 = vld [vmem:[%s12336_s4 + $0x8c] sm:$0xf]  ;;  %v5973_v5 = vld [vmem:[%s12336_s4 + $0x398] sm:$0xf0] }
  0xa5   : > { %1996 = vmatpush.bf16.msra.mxu0 %v5796_v38  ;;  %v7980_v38 = vld [vmem:[%s12336_s4 + $0x574] sm:$0xf0]  ;;  %v7918_v4 = vld [vmem:[%s12336_s4 + $0x38c] sm:$0xf] }
  0xa6   : > { %1971 = vmatpush.bf16.msrb.mxu1 %v5524_v43  ;;  %v7818_v43 = vld [vmem:[%s12336_s4 + $0x6c] sm:$0xf]  ;;  %v6212_v46 = vor.u32 %v7980_v38, %v6211_v37  ;;  %v6005_v38 = vld [vmem:[%s12336_s4 + $0x3d8] sm:$0xf0] }
  0xa7   : > { %2009 = vmatpush.bf16.msra.mxu2 %v5924_v39  ;;  %v5592_v39 = vor.u32 %v7822_v29, %v5589_v31  ;;  %v5576_v53 = vor.u32 %v7818_v43, %v5573_v44  ;;  %v6149_v29 = vld [vmem:[%s12336_s4 + $0x4f8] sm:$0xf0]  ;;  %v6024_v31 = vor.u32 %v7930_v18, %v6021_v20  ;;  %v5880_v44 = vor.u32 %v7894_v33, %v5877_v34  ;;  %v7978_v33 = vld [vmem:[%s12336_s4 + $0x56c] sm:$0xf] }
  0xa8   : > { %1984 = vmatpush.bf16.msrb.mxu3 %v5652_v48  ;;  %v7944_v48 = vld [vmem:[%s12336_s4 + $0x454] sm:$0xf0]  ;;  %v6277_v43 = vld [vmem:[%s12336_s4 + $0x5f8] sm:$0xf0] }
  0xa9   : > { %1997 = vmatpush.bf16.msra.mxu0 %v5780_v59  ;;  %1972 = vmatmul.bf16.vlgmr.msrb.gmra.mxu1 %v8949_v55  ;;  %v6068_v58 = vor.u32 %v7944_v48, %v6067_v47  ;;  %v7814_v59 = vld [vmem:[%s12336_s4 + $0x4c] sm:$0xf]  ;;  %v6133_v47 = vld [vmem:[%s12336_s4 + $0x4d8] sm:$0xf0] }
  0xaa   : > { %2016 = vmatpush.bf16.msra.mxu1 %v6148_v49  ;;  %v5720_v49 = vor.u32 %v7854_v40, %v5717_v41  ;;  %v5653_v40 = vld [vmem:[%s12336_s4 + $0x118] sm:$0xf0] }
  0xab   : > { %2010 = vmatpush.bf16.msra.mxu2 %v5908_v60  ;;  %1985 = vmatmul.bf16.vlgmr.msrb.gmra.mxu3 %v8980_v7  ;;  %v5557_v60 = vld [vmem:[%s12336_s4 + $0x58] sm:$0xf0] }
  0xac   : > { %2029 = vmatpush.bf16.msra.mxu3 %v6276_v54  ;;  %1998 = vmatmul.bf16.vlgmr.msra.gmra.mxu0 %v8938_v51  ;;  %v7850_v54 = vld [vmem:[%s12336_s4 + $0x16c] sm:$0xf]  ;;  %v6229_v20 = vld [vmem:[%s12336_s4 + $0x598] sm:$0xf0] }
  0xad   : > { %2049 = vmatpush.bf16.msrb.mxu0 %v6292_v0  ;;  %v5704_v0 = vor.u32 %v7850_v54, %v5701_v56  ;;  %v7922_v54 = vld [vmem:[%s12336_s4 + $0x3ac] sm:$0xf]  ;;  %v5989_v56 = vld [vmem:[%s12336_s4 + $0x3b8] sm:$0xf0] }
  0xae   : > { %2017 = vmatpush.bf16.msra.mxu1 %v6132_v3  ;;  %2011 = vmatmul.bf16.vlgmr.msra.gmra.mxu2 %v8951_v57  ;;  %v5560_v3 = vor.u32 %v7814_v59, %v5557_v60  ;;  %v7990_v59 = vld [vmem:[%s12336_s4 + $0x5cc] sm:$0xf]  ;;  %v6261_v60 = vld [vmem:[%s12336_s4 + $0x5d8] sm:$0xf0] }
  0xaf   : > { %2055 = vmatpush.bf16.msrb.mxu2 %v5640_v63  ;;  %v7940_v63 = vld [vmem:[%s12336_s4 + $0x434] sm:$0xf0]  ;;  %v6213_v34 = vld [vmem:[%s12336_s4 + $0x578] sm:$0xf0] }
  0xb0   : > { %2030 = vmatpush.bf16.msra.mxu3 %v6260_v6  ;;  %v6052_v6 = vor.u32 %v7940_v63, %v6051_v62  ;;  %v7954_v62 = vld [vmem:[%s12336_s4 + $0x4ac] sm:$0xf]  ;;  %v6117_v63 = vld [vmem:[%s12336_s4 + $0x4b8] sm:$0xf0] }
  0xb1   : > { %2068 = vmatpush.bf16.msra.mxu0 %v5768_v10  ;;  %v6035_v10 = vld [vmem:[%s12336_s4 + $0x408] sm:$0xf] }
  0xb2   : > { %2018 = vmatpush.bf16.msra.mxu1 %v6116_v16  ;;  %v7898_v16 = vld [vmem:[%s12336_s4 + $0x2ec] sm:$0xf]  ;;  %v6036_v23 = vor.u32 %v7936_v12, %v6035_v10  ;;  %v5848_v10 = vor.u32 %v7886_v1, %v5845_v2  ;;  %v5976_v12 = vor.u32 %v7918_v4, %v5973_v5  ;;  %v6359_v1 = vld [vmem:[%s12338_s6 + $0x70] sm:$0xf]  ;;  %v6293_v4 = vld [vmem:[%s12336_s4 + $0x618] sm:$0xf0] }
  0xb3   : > { %2056 = vmatpush.bf16.msrb.mxu2 %v5624_v13  ;;  %v6163_v13 = vld [vmem:[%s12336_s4 + $0x508] sm:$0xf]  ;;  %v5896_v27 = vor.u32 %v7898_v16, %v5893_v17  ;;  %v7914_v16 = vld [vmem:[%s12336_s4 + $0x36c] sm:$0xf] }
  0xb4   : > { %2031 = vmatpush.bf16.msra.mxu3 %v6244_v19  ;;  %v5544_v19 = vor.u32 %v7810_v8, %v5541_v9  ;;  %v6164_v26 = vor.u32 %v7968_v14, %v6163_v13  ;;  %v7986_v8 = vld [vmem:[%s12336_s4 + $0x5ac] sm:$0xf]  ;;  %v6245_v9 = vld [vmem:[%s12336_s4 + $0x5b8] sm:$0xf0] }
  0xb5   : > { %2069 = vmatpush.bf16.msra.mxu0 %v5752_v22  ;;  %v5669_v22 = vld [vmem:[%s12336_s4 + $0x138] sm:$0xf0]  ;;  %v7882_v13 = vld [vmem:[%s12336_s4 + $0x26c] sm:$0xf] }
  0xb6   : > { %2019 = vmatpush.bf16.msra.mxu1 %v6100_v28  ;;  %v7962_v28 = vld [vmem:[%s12336_s4 + $0x4ec] sm:$0xf]  ;;  %v5829_v14 = vld [vmem:[%s12336_s4 + $0x278] sm:$0xf0] }
  0xb7   : > { %2057 = vmatpush.bf16.msrb.mxu2 %v5608_v25  ;;  %v5525_v25 = vld [vmem:[%s12336_s4 + $0x18] sm:$0xf0]  ;;  %v6152_v41 = vor.u32 %v7962_v28, %v6149_v29  ;;  %v7910_v29 = vld [vmem:[%s12336_s4 + $0x34c] sm:$0xf] }
  0xb8   : > { %2032 = vmatpush.bf16.msra.mxu3 %v6228_v32  ;;  %v5672_v32 = vor.u32 %v7842_v21, %v5669_v22  ;;  %v5528_v37 = vor.u32 %v7806_v24, %v5525_v25  ;;  %v5832_v21 = vor.u32 %v7882_v13, %v5829_v14  ;;  %v7946_v22 = vld [vmem:[%s12336_s4 + $0x46c] sm:$0xf] }
  0xb9   : > { %2070 = vmatpush.bf16.msra.mxu0 %v5736_v36  ;;  %v7926_v36 = vld [vmem:[%s12336_s4 + $0x3cc] sm:$0xf] }
  0xba   : > { %2020 = vmatpush.bf16.msra.mxu1 %v6084_v42  ;;  %v7994_v42 = vld [vmem:[%s12336_s4 + $0x5ec] sm:$0xf]  ;;  %v6008_v48 = vor.u32 %v7926_v36, %v6005_v38 }
  0xbb   : > { %2058 = vmatpush.bf16.msrb.mxu2 %v5592_v39  ;;  %v7838_v39 = vld [vmem:[%s12336_s4 + $0x10c] sm:$0xf] }
  0xbc   : > { %2033 = vmatpush.bf16.msra.mxu3 %v6212_v46  ;;  %6299 = vmatmul.msk.bf16.vlgmr.msrb.gmra.mxu0 %vm1778_vm0, %v9057_v45  ;;  %v7958_v46 = vld [vmem:[%s12336_s4 + $0x4cc] sm:$0xf] }
  0xbd   : > { %2071 = vmatpush.bf16.msra.mxu0 %v5720_v49  ;;  %v5656_v49 = vor.u32 %v7838_v39, %v5653_v40  ;;  %v7878_v25 = vld [vmem:[%s12336_s4 + $0x24c] sm:$0xf]  ;;  %v6069_v39 = vld [vmem:[%s12336_s4 + $0x458] sm:$0xf0] }
  0xbe   : > { %2021 = vmatpush.bf16.msra.mxu1 %v6068_v58  ;;  %v6136_v58 = vor.u32 %v7958_v46, %v6133_v47  ;;  %v7942_v38 = vld [vmem:[%s12336_s4 + $0x44c] sm:$0xf]  ;;  %v5925_v47 = vld [vmem:[%s12336_s4 + $0x338] sm:$0xf0] }
  0xbf   : > { %2059 = vmatpush.bf16.msrb.mxu2 %v5576_v53  ;;  %v6280_v53 = vor.u32 %v7994_v42, %v6277_v43  ;;  %v7874_v42 = vld [vmem:[%s12336_s4 + $0x22c] sm:$0xf]  ;;  %v5797_v43 = vld [vmem:[%s12336_s4 + $0x238] sm:$0xf0] }
  0xc0   : > { %2034 = vmatpush.bf16.msra.mxu3 %v6196_v61  ;;  %v5864_v61 = vor.u32 %v7890_v50, %v5861_v52  ;;  %v7906_v46 = vld [vmem:[%s12336_s4 + $0x32c] sm:$0xf]  ;;  %v6197_v52 = vld [vmem:[%s12336_s4 + $0x558] sm:$0xf0] }
  0xc1   : > { %2072 = vmatpush.bf16.msra.mxu0 %v5704_v0  ;;  %v5992_v0 = vor.u32 %v7922_v54, %v5989_v56  ;;  %v7974_v50 = vld [vmem:[%s12336_s4 + $0x54c] sm:$0xf]  ;;  %v5800_v54 = vor.u32 %v7874_v42, %v5797_v43 }
  0xc2   : > { %2022 = vmatpush.bf16.msra.mxu1 %v6052_v6  ;;  %v6120_v6 = vor.u32 %v7954_v62, %v6117_v63  ;;  %v7938_v56 = vld [vmem:[%s12336_s4 + $0x42c] sm:$0xf]  ;;  %v5909_v63 = vld [vmem:[%s12336_s4 + $0x318] sm:$0xf0] }
  0xc3   : > { %2060 = vmatpush.bf16.msrb.mxu2 %v5560_v3  ;;  %v6264_v3 = vor.u32 %v7990_v59, %v6261_v60  ;;  %v7870_v59 = vld [vmem:[%s12336_s4 + $0x20c] sm:$0xf]  ;;  %v5928_v60 = vor.u32 %v7906_v46, %v5925_v47  ;;  %v6399_v46 = vld [vmem:[%s12338_s6 + $0xc0] sm:$0xf] }
  0xc4   : > { %2035 = vmatpush.bf16.msra.mxu3 %v6180_v11  ;;  %v7950_v11 = vld [vmem:[%s12336_s4 + $0x48c] sm:$0xf] }
  0xc5   : > { %2073 = vmatpush.bf16.msra.mxu0 %v5688_v15  ;;  %v6248_v15 = vor.u32 %v7986_v8, %v6245_v9  ;;  %v7902_v62 = vld [vmem:[%s12336_s4 + $0x30c] sm:$0xf]  ;;  %v6181_v9 = vld [vmem:[%s12336_s4 + $0x538] sm:$0xf0] }
  0xc6   : > { %2023 = vmatpush.bf16.msra.mxu1 %v6036_v23  ;;  %v6085_v23 = vld [vmem:[%s12336_s4 + $0x478] sm:$0xf0]  ;;  %v9851_v28 = vpop.f32.mrf.mxu1  ;;  %v7970_v8 = vld [vmem:[%s12336_s4 + $0x52c] sm:$0xf]  ;;  %v5912_v14 = vor.u32 %v7902_v62, %v5909_v63  ;;  %v8006_v62 = vld [vmem:[%s12338_s6 + $0x24] sm:$0xf0] }
  0xc7   : > { %2061 = vmatpush.bf16.msrb.mxu2 %v5544_v19  ;;  %v7982_v19 = vld [vmem:[%s12336_s4 + $0x58c] sm:$0xf]  ;;  %v6383_v63 = vld [vmem:[%s12338_s6 + $0xa0] sm:$0xf] }
  0xc8   : > { %2036 = vmatpush.bf16.msra.mxu3 %v6164_v26  ;;  %v5813_v26 = vld [vmem:[%s12336_s4 + $0x258] sm:$0xf0] }
  0xc9   : > { %2074 = vmatpush.bf16.msra.mxu0 %v5672_v32  ;;  %2024 = vmatmul.bf16.vlgmr.msra.gmra.mxu1 %v9144_v30  ;;  %v6088_v32 = vor.u32 %v7946_v22, %v6085_v23  ;;  %v6351_v22 = vld [vmem:[%s12338_s6 + $0x60] sm:$0xf]  ;;  %v8014_v23 = vld [vmem:[%s12338_s6 + $0x64] sm:$0xf0] }
  0xca   : > { %2081 = vmatpush.bf16.msrb.mxu1 %v5896_v27  ;;  %v6232_v27 = vor.u32 %v7982_v19, %v6229_v20  ;;  %v6184_v20 = vor.u32 %v7970_v8, %v6181_v9 }
  0xcb   : > { %2062 = vmatpush.bf16.msrb.mxu2 %v5528_v37  ;;  %2037 = vmatmul.bf16.vlgmr.msra.gmra.mxu3 %v9155_v35  ;;  %v9831_v17 = vpop.f32.mrf.mxu0  ;;  %v5816_v37 = vor.u32 %v7878_v25, %v5813_v26  ;;  %v6165_v25 = vld [vmem:[%s12336_s4 + $0x518] sm:$0xf0] }
  0xcc   : > { %2094 = vmatpush.bf16.msrb.mxu3 %v6024_v31  ;;  %v5941_v31 = vld [vmem:[%s12336_s4 + $0x358] sm:$0xf0] }
  0xcd   : > { %2075 = vmatpush.bf16.msra.mxu0 %v5656_v49  ;;  %v5944_v40 = vor.u32 %v7910_v29, %v5941_v31  ;;  %v6072_v49 = vor.u32 %v7942_v38, %v6069_v39  ;;  %v6415_v29 = vld [vmem:[%s12338_s6 + $0xe0] sm:$0xf]  ;;  %v8030_v31 = vld [vmem:[%s12338_s6 + $0xe4] sm:$0xf0] }
  0xce   : > { %2082 = vmatpush.bf16.msrb.mxu1 %v5880_v44  ;;  %2063 = vmatmul.bf16.vlgmr.msrb.gmra.mxu2 %v8949_v55  ;;  %v6101_v55 = vld [vmem:[%s12336_s4 + $0x498] sm:$0xf0]  ;;  %v6216_v44 = vor.u32 %v7978_v33, %v6213_v34  ;;  %v1806_v2 = vpop.f32.mrf.mxu1  ;;  %v8012_v34 = vld [vmem:[%s12338_s6 + $0x54] sm:$0xf0]  ;;  %v6416_v38 = vor.u32 %v8030_v31, %v6415_v29 }
  0xcf   : > { %2107 = vmatpush.bf16.msra.mxu2 %v6152_v41  ;;  %v6104_v18 = vor.u32 %v7950_v11, %v6101_v55  ;;  %v9873_v41 = vpop.f32.mrf.mxu3  ;;  %v7934_v55 = vld [vmem:[%s12336_s4 + $0x40c] sm:$0xf] }
  0xd0   : > { %2095 = vmatpush.bf16.msrb.mxu3 %v6008_v48  ;;  %2076 = vmatmul.bf16.vlgmr.msra.gmra.mxu0 %v8980_v7  ;;  %v5957_v7 = vld [vmem:[%s12336_s4 + $0x378] sm:$0xf0]  ;;  %v9865_v36 = vpop.f32.mrf.mxu2 }
  0xd1   : > { %2120 = vmatpush.bf16.msrb.mxu0 %v6280_v53  ;;  %v5960_v24 = vor.u32 %v7914_v16, %v5957_v7  ;;  %v9896_v53 = vld [vmem:[%s12337_s5] sm:$0xf]  ;;  %v6423_v7 = vld [vmem:[%s12338_s6 + $0xf0] sm:$0xf] }
  0xd2   : > { %2083 = vmatpush.bf16.msrb.mxu1 %v5864_v61  ;;  %v5781_v61 = vld [vmem:[%s12336_s4 + $0x218] sm:$0xf0]  ;;  %v790_v13 = vperm.slane %v9896_v53, 0 }
  0xd3   : > { %2108 = vmatpush.bf16.msra.mxu2 %v6136_v58  ;;  %v1793_v48 = vpop.f32.mrf.mxu0  ;;  %v6053_v58 = vld [vmem:[%s12336_s4 + $0x438] sm:$0xf0]  ;;  %v5784_v11 = vor.u32 %v7870_v59, %v5781_v61  ;;  %v6319_v61 = vld [vmem:[%s12338_s6 + $0x20] sm:$0xf] }
  0xd4   : > { %2096 = vmatpush.bf16.msrb.mxu3 %v5992_v0  ;;  %v6200_v0 = vor.u32 %v7974_v50, %v6197_v52  ;;  %v6056_v5 = vor.u32 %v7938_v56, %v6053_v58  ;;  %v8024_v58 = vld [vmem:[%s12338_s6 + $0xb4] sm:$0xf0] }
  0xd5   : > { %2121 = vmatpush.bf16.msrb.mxu0 %v6264_v3  ;;  %v7998_v3 = vld [vmem:[%s12336_s4 + $0x60c] sm:$0xf] }
  0xd6   : > { %2084 = vmatpush.bf16.msrb.mxu1 %v5848_v10 }
  0xd7   : > { %2109 = vmatpush.bf16.msra.mxu2 %v6120_v6  ;;  %v8016_v6 = vld [vmem:[%s12338_s6 + $0x74] sm:$0xf0]  ;;  %v1832_v16 = vpop.f32.mrf.mxu3 }
  0xd8   : > { %2097 = vmatpush.bf16.msrb.mxu3 %v5976_v12  ;;  %v1819_v10 = vpop.f32.mrf.mxu2  ;;  %v6037_v12 = vld [vmem:[%s12336_s4 + $0x418] sm:$0xf0]  ;;  %v6360_v19 = vor.u32 %v8016_v6, %v6359_v1  ;;  %v6320_v1 = vor.u32 %v8006_v62, %v6319_v61 }
  0xd9   : > { %2122 = vmatpush.bf16.msrb.mxu0 %v6248_v15  ;;  %v6296_v15 = vor.u32 %v7998_v3, %v6293_v4  ;;  %v6311_v3 = vld [vmem:[%s12338_s6 + $0x10] sm:$0xf]  ;;  %v8004_v4 = vld [vmem:[%s12338_s6 + $0x14] sm:$0xf0]  ;;  %v6361_v16 = vld [vmem:[%s12338_s6 + $0x78] sm:$0xf0] }
  0xda   : > { %2085 = vmatpush.bf16.msrb.mxu1 %v5832_v21  ;;  %v6040_v21 = vor.u32 %v7934_v55, %v6037_v12  ;;  %v6312_v55 = vor.u32 %v8004_v4, %v6311_v3  ;;  %v8044_v3 = vld [vmem:[%s12338_s6 + $0x154] sm:$0xf0]  ;;  %v8005_v4 = vld [vmem:[%s12338_s6 + $0x24] sm:$0xf] }
  0xdb   : > { %2110 = vmatpush.bf16.msra.mxu2 %v6104_v18  ;;  %v8032_v18 = vld [vmem:[%s12338_s6 + $0xf4] sm:$0xf0] }
  0xdc   : > { %2098 = vmatpush.bf16.msrb.mxu3 %v5960_v24  ;;  %v7966_v24 = vld [vmem:[%s12336_s4 + $0x50c] sm:$0xf]  ;;  %v6424_v26 = vor.u32 %v8032_v18, %v6423_v7  ;;  %v6367_v18 = vld [vmem:[%s12338_s6 + $0x80] sm:$0xf] }
  0xdd   : > { %2123 = vmatpush.bf16.msrb.mxu0 %v6232_v27  ;;  %v1792_v27 = vadd.f32 %v9831_v17, %v790_v13  ;;  %v6168_v33 = vor.u32 %v7966_v24, %v6165_v25  ;;  %v6343_v17 = vld [vmem:[%s12338_s6 + $0x50] sm:$0xf]  ;;  %v6303_v13 = vld [vmem:[%s12338_s6] sm:$0xf] }
  0xde   : > { %2086 = vmatpush.bf16.msrb.mxu1 %v5816_v37  ;;  %v6344_v42 = vor.u32 %v8012_v34, %v6343_v17  ;;  %v8029_v17 = vld [vmem:[%s12338_s6 + $0xe4] sm:$0xf]  ;;  %v6417_v34 = vld [vmem:[%s12338_s6 + $0xe8] sm:$0xf0] }
  0xdf   : > { %2111 = vmatpush.bf16.msra.mxu2 %v6088_v32  ;;  %v6352_v32 = vor.u32 %v8014_v23, %v6351_v22  ;;  %v1805_v39 = vadd.f32 %v9851_v28, %v1792_v27  ;;  %v8010_v28 = vld [vmem:[%s12338_s6 + $0x44] sm:$0xf0]  ;;  %v6425_v22 = vld [vmem:[%s12338_s6 + $0xf8] sm:$0xf0]  ;;  %v6353_v27 = vld [vmem:[%s12338_s6 + $0x68] sm:$0xf0] }
  0xe0   : > { %2099 = vmatpush.bf16.msrb.mxu3 %v5944_v40  ;;  %v1869_v37 = vpop.f32.mrf.mxu2  ;;  %v8028_v40 = vld [vmem:[%s12338_s6 + $0xd4] sm:$0xf0] }
  0xe1   : > { %2124 = vmatpush.bf16.msrb.mxu0 %v6216_v44  ;;  %v1818_v44 = vadd.f32 %v9865_v36, %v1805_v39  ;;  %v8008_v36 = vld [vmem:[%s12338_s6 + $0x34] sm:$0xf0]  ;;  %v8011_v39 = vld [vmem:[%s12338_s6 + $0x54] sm:$0xf] }
  0xe2   : > { %2087 = vmatpush.bf16.msrb.mxu1 %v5800_v54 }
  0xe3   : > { %2112 = vmatpush.bf16.msra.mxu2 %v6072_v49  ;;  %v6327_v49 = vld [vmem:[%s12338_s6 + $0x30] sm:$0xf]  ;;  %v1831_v56 = vadd.f32 %v9873_v41, %v1818_v44  ;;  %v8048_v44 = vld [vmem:[%s12338_s6 + $0x174] sm:$0xf0] }
  0xe4   : > { %2100 = vmatpush.bf16.msrb.mxu3 %v5928_v60  ;;  %v6328_v59 = vor.u32 %v8008_v36, %v6327_v49 }
  0xe5   : > { %2125 = vmatpush.bf16.msrb.mxu0 %v6200_v0  ;;  %v1843_v48 = vpop.f32.mrf.mxu0  ;;  %v8022_v0 = vld [vmem:[%s12338_s6 + $0xa4] sm:$0xf0] }
  0xe6   : > { %2088 = vmatpush.bf16.msrb.mxu1 %v5784_v11  ;;  %v1856_v50 = vpop.f32.mrf.mxu1  ;;  %v1844_v60 = vadd.f32 %v1843_v48, %v1831_v56  ;;  %v6384_v9 = vor.u32 %v8022_v0, %v6383_v63  ;;  %v6375_v11 = vld [vmem:[%s12338_s6 + $0x90] sm:$0xf]  ;;  %v6337_v48 = vld [vmem:[%s12338_s6 + $0x48] sm:$0xf0]  ;;  %v8007_v56 = vld [vmem:[%s12338_s6 + $0x34] sm:$0xf] }
  0xe7   : > { %2113 = vmatpush.bf16.msra.mxu2 %v6056_v5  ;;  %v8023_v63 = vld [vmem:[%s12338_s6 + $0xb4] sm:$0xf]  ;;  %v6393_v0 = vld [vmem:[%s12338_s6 + $0xb8] sm:$0xf0] }
  0xe8   : > { %2101 = vmatpush.bf16.msrb.mxu3 %v5912_v14  ;;  %v1871_v52 = vpop.f32.mrf.mxu2  ;;  %v1857_v2 = vadd.f32 %v1856_v50, %v1844_v60  ;;  %v8002_v14 = vld [vmem:[%s12338_s6 + $0x4] sm:$0xf0]  ;;  %v8025_v50 = vld [vmem:[%s12338_s6 + $0xc4] sm:$0xf] }
  0xe9   : > { %2126 = vmatpush.bf16.msrb.mxu0 %v6184_v20  ;;  %2089 = vmatmul.bf16.vlgmr.msrb.gmra.mxu1 %v8938_v51  ;;  %v6407_v51 = vld [vmem:[%s12338_s6 + $0xd0] sm:$0xf]  ;;  %v6304_v20 = vor.u32 %v8002_v14, %v6303_v13  ;;  %v6401_v52 = vld [vmem:[%s12338_s6 + $0xc8] sm:$0xf0]  ;;  %v6313_v13 = vld [vmem:[%s12338_s6 + $0x18] sm:$0xf0] }
  0xea   : > { %2140 = vmatpush.bf16.msra.mxu1 %v6296_v15  ;;  %v6408_v43 = vor.u32 %v8028_v40, %v6407_v51  ;;  %v1870_v12 = vadd.f32 %v1869_v37, %v1857_v2  ;;  %v8015_v15 = vld [vmem:[%s12338_s6 + $0x74] sm:$0xf]  ;;  %v6345_v51 = vld [vmem:[%s12338_s6 + $0x58] sm:$0xf0]  ;;  %v6420_v40 = vor.u32 %v8029_v17, %v6417_v34  ;;  %v6404_v61 = vor.u32 %v8025_v50, %v6401_v52  ;;  %v6471_v2 = vld [vmem:[%s12338_s6 + $0x150] sm:$0xf] }
  0xeb   : > { %2114 = vmatpush.bf16.msra.mxu2 %v6040_v21  ;;  %2102 = vmatmul.bf16.vlgmr.msrb.gmra.mxu3 %v8951_v57  ;;  %v6335_v57 = vld [vmem:[%s12338_s6 + $0x40] sm:$0xf]  ;;  %v8031_v21 = vld [vmem:[%s12338_s6 + $0xf4] sm:$0xf]  ;;  %v6364_v24 = vor.u32 %v8015_v15, %v6361_v16  ;;  %v8042_v15 = vld [vmem:[%s12338_s6 + $0x144] sm:$0xf0] }
  0xec   : > { %2544 = vmatpush.bf16.msra.mxu3 %v6360_v19  ;;  %v6336_v47 = vor.u32 %v8010_v28, %v6335_v57  ;;  %v8018_v19 = vld [vmem:[%s12338_s6 + $0x84] sm:$0xf0]  ;;  %v2146_v23 = vmax.f32 %v1870_v12, 0.0  ;;  %v8027_v28 = vld [vmem:[%s12338_s6 + $0xd4] sm:$0xf] }
  0xed   : > { %2127 = vmatpush.bf16.msrb.mxu0 %v6168_v33  ;;  %v1845_v5 = vpop.f32.mrf.mxu0  ;;  %v6368_v29 = vor.u32 %v8018_v19, %v6367_v18  ;;  %v791_v33 = vperm.slane %v9896_v53, 1  ;;  %v8003_v12 = vld [vmem:[%s12338_s6 + $0x14] sm:$0xf]  ;;  %v6463_v14 = vld [vmem:[%s12338_s6 + $0x140] sm:$0xf] }
  0xee   : > { %2557 = vmatpush.bf16.msrb.mxu1 %v6424_v26  ;;  %2115 = vmatmul.bf16.vlgmr.msra.gmra.mxu2 %v9144_v30  ;;  %v8026_v30 = vld [vmem:[%s12338_s6 + $0xc4] sm:$0xf0]  ;;  %v1882_v6 = vpop.f32.mrf.mxu3  ;;  %v1858_v8 = vpop.f32.mrf.mxu1  ;;  %v8013_v26 = vld [vmem:[%s12338_s6 + $0x64] sm:$0xf]  ;;  %v10072_v37 = vpack.c.bf16 %v2146_v23, %v2146_v23  ;;  %v6321_v5 = vld [vmem:[%s12338_s6 + $0x28] sm:$0xf0]  ;;  %v6464_v19 = vor.u32 %v8042_v15, %v6463_v14 }
  0xef   : > { %v6400_v54 = vor.u32 %v8026_v30, %v6399_v46  ;;  %v1883_v57 = vadd.f32 %v1882_v6, %v791_v33  ;;  %v6348_v46 = vor.u32 %v8011_v39, %v6345_v51  ;;  %v6472_v6 = vor.u32 %v8044_v3, %v6471_v2  ;;  %v6377_v23 = vld [vmem:[%s12338_s6 + $0x98] sm:$0xf0]  ;;  %v8038_v33 = vld [vmem:[%s12338_s6 + $0x124] sm:$0xf0]  ;;  %v8017_v39 = vld [vmem:[%s12338_s6 + $0x84] sm:$0xf] }
  0xf0   : > { %2545 = vmatpush.bf16.msra.mxu3 %v6352_v32  ;;  %2128 = vmatmul.bf16.vlgmr.msrb.gmra.mxu0 %v9155_v35  ;;  %v6391_v35 = vld [vmem:[%s12338_s6 + $0xb0] sm:$0xf]  ;;  %v6428_v32 = vor.u32 %v8031_v21, %v6425_v22  ;;  %v8019_v22 = vld [vmem:[%s12338_s6 + $0x94] sm:$0xf]  ;;  %v6369_v51 = vld [vmem:[%s12338_s6 + $0x88] sm:$0xf0] }
  0xf1   : > { %v6392_v41 = vor.u32 %v8024_v58, %v6391_v35  ;;  %v1895_v10 = vpop.f32.mrf.mxu2  ;;  %v6329_v35 = vld [vmem:[%s12338_s6 + $0x38] sm:$0xf0]  ;;  %v6479_v58 = vld [vmem:[%s12338_s6 + $0x160] sm:$0xf]  ;;  %v6380_v34 = vor.u32 %v8019_v22, %v6377_v23  ;;  %v8034_v50 = vld [vmem:[%s12338_s6 + $0x104] sm:$0xf0] }
  0xf2   : > { %2558 = vmatpush.bf16.msrb.mxu1 %v6416_v38  ;;  %v6356_v38 = vor.u32 %v8013_v26, %v6353_v27  ;;  %v1896_v36 = vadd.f32 %v1895_v10, %v1883_v57  ;;  %v6455_v26 = vld [vmem:[%s12338_s6 + $0x130] sm:$0xf]  ;;  %v8040_v27 = vld [vmem:[%s12338_s6 + $0x134] sm:$0xf0]  ;;  %v6473_v3 = vld [vmem:[%s12338_s6 + $0x158] sm:$0xf0] }
  0xf3   : > { %v6439_v57 = vld [vmem:[%s12338_s6 + $0x110] sm:$0xf]  ;;  %v8039_v14 = vld [vmem:[%s12338_s6 + $0x134] sm:$0xf]  ;;  %v8037_v23 = vld [vmem:[%s12338_s6 + $0x124] sm:$0xf] }
  0xf4   : > { %2546 = vmatpush.bf16.msra.mxu3 %v6344_v42  ;;  %v6487_v42 = vld [vmem:[%s12338_s6 + $0x170] sm:$0xf] }
  0xf5   : > { %v6488_v30 = vor.u32 %v8048_v44, %v6487_v42 }
  0xf6   : > { %2559 = vmatpush.bf16.msrb.mxu1 %v6408_v43  ;;  %v1884_v25 = vpop.f32.mrf.mxu3  ;;  %v6409_v43 = vld [vmem:[%s12338_s6 + $0xd8] sm:$0xf0] }
  0xf7   : > { %v6412_v49 = vor.u32 %v8027_v28, %v6409_v43  ;;  %2570 = vmatpush.bf16.msrb.mxu2 %v6488_v30  ;;  %v8001_v25 = vld [vmem:[%s12338_s6 + $0x4] sm:$0xf]  ;;  %v8036_v28 = vld [vmem:[%s12338_s6 + $0x114] sm:$0xf0] }
  0xf8   : > { %2547 = vmatpush.bf16.msra.mxu3 %v6336_v47  ;;  %v8009_v47 = vld [vmem:[%s12338_s6 + $0x44] sm:$0xf] }
  0xf9   : > { %6300 = vmatmul.msk.bf16.vlgmr.msra.gmra.mxu1 %vm1778_vm0, %v9057_v45  ;;  %v8020_v45 = vld [vmem:[%s12338_s6 + $0x94] sm:$0xf0]  ;;  %v1897_v31 = vpop.f32.mrf.mxu2 }
  0xfa   : > { %2560 = vmatpush.bf16.msrb.mxu1 %v6400_v54  ;;  %v6376_v7 = vor.u32 %v8020_v45, %v6375_v11  ;;  %v6340_v54 = vor.u32 %v8009_v47, %v6337_v48  ;;  %v8021_v11 = vld [vmem:[%s12338_s6 + $0xa4] sm:$0xf]  ;;  %v6385_v45 = vld [vmem:[%s12338_s6 + $0xa8] sm:$0xf0]  ;;  %v6456_v31 = vor.u32 %v8040_v27, %v6455_v26  ;;  %v6440_v48 = vor.u32 %v8036_v28, %v6439_v57  ;;  %v6519_v26 = vld [vmem:[%s12338_s6 + $0x1b0] sm:$0xf] }
  0xfb   : > { %v6388_v18 = vor.u32 %v8021_v11, %v6385_v45  ;;  %v6465_v11 = vld [vmem:[%s12338_s6 + $0x148] sm:$0xf0]  ;;  %v8056_v27 = vld [vmem:[%s12338_s6 + $0x1b4] sm:$0xf0] }
  0xfc   : > { %2548 = vmatpush.bf16.msra.mxu3 %v6328_v59  ;;  %v8046_v59 = vld [vmem:[%s12338_s6 + $0x164] sm:$0xf0]  ;;  %v6433_v57 = vld [vmem:[%s12338_s6 + $0x108] sm:$0xf0] }
  0xfd   : > { %v6480_v62 = vor.u32 %v8046_v59, %v6479_v58  ;;  %v6489_v58 = vld [vmem:[%s12338_s6 + $0x178] sm:$0xf0] }
  0xfe   : > { %2561 = vmatpush.bf16.msrb.mxu1 %v6392_v41 }
  0xff   : > { %2571 = vmatpush.bf16.msrb.mxu2 %v6480_v62 }
 0x100   : > { %2549 = vmatpush.bf16.msra.mxu3 %v6320_v1  ;;  %v6332_v1 = vor.u32 %v8007_v56, %v6329_v35  ;;  %v8047_v35 = vld [vmem:[%s12338_s6 + $0x174] sm:$0xf] }
 0x101   : > { %v6492_v59 = vor.u32 %v8047_v35, %v6489_v58  ;;  %v8063_v35 = vld [vmem:[%s12338_s6 + $0x1f4] sm:$0xf]  ;;  %v6553_v58 = vld [vmem:[%s12338_s6 + $0x1f8] sm:$0xf0] }
 0x102   : > { %2562 = vmatpush.bf16.msrb.mxu1 %v6384_v9  ;;  %v6396_v9 = vor.u32 %v8023_v63, %v6393_v0  ;;  %v8064_v63 = vld [vmem:[%s12338_s6 + $0x1f4] sm:$0xf0]  ;;  %v8043_v0 = vld [vmem:[%s12338_s6 + $0x154] sm:$0xf] }
 0x103   : > { %2572 = vmatpush.bf16.msrb.mxu2 %v6472_v6  ;;  %v8062_v6 = vld [vmem:[%s12338_s6 + $0x1e4] sm:$0xf0] }
 0x104   : > { %2550 = vmatpush.bf16.msra.mxu3 %v6312_v55  ;;  %v6324_v55 = vor.u32 %v8005_v4, %v6321_v5  ;;  %v6476_v4 = vor.u32 %v8043_v0, %v6473_v3  ;;  %v6543_v5 = vld [vmem:[%s12338_s6 + $0x1e0] sm:$0xf] }
 0x105   : > { %v1908_v60 = vpop.f32.mrf.mxu0 }
 0x106   : > { %2563 = vmatpush.bf16.msrb.mxu1 %v6376_v7  ;;  %v1909_v41 = vadd.f32 %v1908_v60, %v1896_v36  ;;  %v1921_v8 = vpop.f32.mrf.mxu1  ;;  %v6431_v36 = vld [vmem:[%s12338_s6 + $0x100] sm:$0xf]  ;;  %v8045_v60 = vld [vmem:[%s12338_s6 + $0x164] sm:$0xf] }
 0x107   : > { %2573 = vmatpush.bf16.msrb.mxu2 %v6464_v19 }
 0x108   : > { %2551 = vmatpush.bf16.msra.mxu3 %v6304_v20  ;;  %v1922_v10 = vadd.f32 %v1921_v8, %v1909_v41  ;;  %v6551_v41 = vld [vmem:[%s12338_s6 + $0x1f0] sm:$0xf]  ;;  %v8041_v8 = vld [vmem:[%s12338_s6 + $0x144] sm:$0xf] }
 0x109   : > { %v6552_v2 = vor.u32 %v8064_v63, %v6551_v41  ;;  %v6468_v45 = vor.u32 %v8041_v8, %v6465_v11  ;;  %v8061_v41 = vld [vmem:[%s12338_s6 + $0x1e4] sm:$0xf]  ;;  %v6545_v63 = vld [vmem:[%s12338_s6 + $0x1e8] sm:$0xf0] }
 0x10a   : > { %2564 = vmatpush.bf16.msrb.mxu1 %v6368_v29  ;;  %v6305_v29 = vld [vmem:[%s12338_s6 + $0x8] sm:$0xf0] }
 0x10b   : > { %2552 = vmatmul.bf16.vlgmr.msra.gmra.mxu3 %v10072_v37  ;;  %2574 = vmatpush.bf16.msrb.mxu2 %v6456_v31  ;;  %v8035_v31 = vld [vmem:[%s12338_s6 + $0x114] sm:$0xf] }
 0x10c   : > { %2596 = vmatpush.bf16.msrb.mxu3 %v6364_v24  ;;  %v6316_v24 = vor.u32 %v8003_v12, %v6313_v13  ;;  %2583 = vmatpush.bf16.msra.mxu0 %v6552_v2  ;;  %v6535_v12 = vld [vmem:[%s12338_s6 + $0x1d0] sm:$0xf]  ;;  %v8060_v13 = vld [vmem:[%s12338_s6 + $0x1d4] sm:$0xf0]  ;;  %v6548_v2 = vor.u32 %v8061_v41, %v6545_v63 }
 0x10d   : > { %v1910_v16 = vpop.f32.mrf.mxu0  ;;  %v8072_v63 = vld [vmem:[%s12340_s8 + $0x38] sm:$0xff] }
 0x10e   : > { %2609 = vmatpush.bf16.msra.mxu1 %v6428_v32  ;;  %v1934_v7 = vpop.f32.mrf.mxu3  ;;  %v6447_v32 = vld [vmem:[%s12338_s6 + $0x120] sm:$0xf]  ;;  %v1923_v17 = vpop.f32.mrf.mxu1 }
 0x10f   : > { %v1935_v20 = vadd.f32 %v1934_v7, %v1922_v10  ;;  %v6448_v42 = vor.u32 %v8038_v33, %v6447_v32  ;;  %v6544_v10 = vor.u32 %v8062_v6, %v6543_v5  ;;  %v6536_v7 = vor.u32 %v8060_v13, %v6535_v12  ;;  %v6441_v32 = vld [vmem:[%s12338_s6 + $0x118] sm:$0xf0]  ;;  %v8059_v5 = vld [vmem:[%s12338_s6 + $0x1d4] sm:$0xf]  ;;  %v6529_v12 = vld [vmem:[%s12338_s6 + $0x1c8] sm:$0xf0] }
 0x110   : > { %2597 = vmatpush.bf16.msrb.mxu3 %v6356_v38  ;;  %v792_v33 = vperm.slane %v9896_v53, 2  ;;  %v6520_v17 = vor.u32 %v8056_v27, %v6519_v26  ;;  %v6537_v6 = vld [vmem:[%s12338_s6 + $0x1d8] sm:$0xf0] }
 0x111   : > { %v1947_v21 = vpop.f32.mrf.mxu2  ;;  %2575 = vmatpush.bf16.msrb.mxu2 %v6448_v42  ;;  %2584 = vmatpush.bf16.msra.mxu0 %v6544_v10  ;;  %v8033_v42 = vld [vmem:[%s12338_s6 + $0x104] sm:$0xf] }
 0x112   : > { %2610 = vmatpush.bf16.msra.mxu1 %v6420_v40  ;;  %v1948_v38 = vadd.f32 %v1947_v21, %v1935_v20  ;;  %v6308_v40 = vor.u32 %v8001_v25, %v6305_v29  ;;  %v6527_v20 = vld [vmem:[%s12338_s6 + $0x1c0] sm:$0xf]  ;;  %v8058_v21 = vld [vmem:[%s12338_s6 + $0x1c4] sm:$0xf0] }
 0x113   : > { %v6528_v22 = vor.u32 %v8058_v21, %v6527_v20  ;;  %v793_v21 = vperm.slane %v9896_v53, 3  ;;  %v6497_v53 = vld [vmem:[%s12338_s6 + $0x188] sm:$0xf0] }
 0x114   : > { %2598 = vmatpush.bf16.msrb.mxu3 %v6348_v46  ;;  %v6372_v46 = vor.u32 %v8017_v39, %v6369_v51  ;;  %v6511_v39 = vld [vmem:[%s12338_s6 + $0x1a0] sm:$0xf]  ;;  %v8054_v51 = vld [vmem:[%s12338_s6 + $0x1a4] sm:$0xf0] }
 0x115   : > { %v1960_v43 = vpop.f32.mrf.mxu0  ;;  %2576 = vmatpush.bf16.msrb.mxu2 %v6440_v48  ;;  %2585 = vmatpush.bf16.msra.mxu0 %v6536_v7  ;;  %v8052_v48 = vld [vmem:[%s12338_s6 + $0x194] sm:$0xf0] }
 0x116   : > { %2611 = vmatpush.bf16.msra.mxu1 %v6412_v49  ;;  %v1936_v44 = vpop.f32.mrf.mxu3  ;;  %v1961_v30 = vadd.f32 %v1960_v43, %v1948_v38  ;;  %v6444_v38 = vor.u32 %v8035_v31, %v6441_v32  ;;  %v6512_v43 = vor.u32 %v8054_v51, %v6511_v39 }
 0x117   : > { %v6436_v44 = vor.u32 %v8033_v42, %v6433_v57 }
 0x118   : > { %2599 = vmatpush.bf16.msrb.mxu3 %v6340_v54  ;;  %v2147_v49 = vmax.f32 %v1961_v30, 0.0  ;;  %v6432_v54 = vor.u32 %v8034_v50, %v6431_v36 }
 0x119   : > { %v1949_v47 = vpop.f32.mrf.mxu2  ;;  %2586 = vmatpush.bf16.msra.mxu0 %v6528_v22  ;;  %v8051_v22 = vld [vmem:[%s12338_s6 + $0x194] sm:$0xf] }
 0x11a   : > { %2612 = vmatpush.bf16.msra.mxu1 %v6404_v61  ;;  %v2151_v52 = vpack.c.bf16 %v2147_v49, %v2147_v49  ;;  %2577 = vmatpush.bf16.msrb.mxu2 %v6432_v54  ;;  %v6503_v47 = vld [vmem:[%s12338_s6 + $0x190] sm:$0xf]  ;;  %v8050_v54 = vld [vmem:[%s12338_s6 + $0x184] sm:$0xf0] }
 0x11b   : > { %v6504_v49 = vor.u32 %v8052_v48, %v6503_v47 }
 0x11c   : > { %2600 = vmatpush.bf16.msrb.mxu3 %v6332_v1  ;;  %2565 = vmatmul.bf16.vlgmr.msrb.gmra.mxu1 %v2151_v52 }
 0x11d   : > { %v1962_v56 = vpop.f32.mrf.mxu0  ;;  %2587 = vmatpush.bf16.msra.mxu0 %v6520_v17 }
 0x11e   : > { %2613 = vmatpush.bf16.msra.mxu1 %v6396_v9  ;;  %2622 = vmatpush.bf16.msra.mxu2 %v6492_v59 }
 0x120   : > { %2601 = vmatpush.bf16.msrb.mxu3 %v6324_v55 }
 0x121   : > { %2588 = vmatpush.bf16.msra.mxu0 %v6512_v43 }
 0x122   : > { %2614 = vmatpush.bf16.msra.mxu1 %v6388_v18  ;;  %v6457_v18 = vld [vmem:[%s12338_s6 + $0x138] sm:$0xf0] }
 0x123   : > { %v6460_v19 = vor.u32 %v8039_v14, %v6457_v18  ;;  %v8053_v18 = vld [vmem:[%s12338_s6 + $0x1a4] sm:$0xf] }
 0x124   : > { %2602 = vmatpush.bf16.msrb.mxu3 %v6316_v24  ;;  %v6449_v24 = vld [vmem:[%s12338_s6 + $0x128] sm:$0xf0] }
 0x125   : > { %v6452_v25 = vor.u32 %v8037_v23, %v6449_v24  ;;  %2589 = vmatpush.bf16.msra.mxu0 %v6504_v49  ;;  %v6505_v23 = vld [vmem:[%s12338_s6 + $0x198] sm:$0xf0] }
 0x126   : > { %2615 = vmatpush.bf16.msra.mxu1 %v6380_v34  ;;  %v1973_v1 = vpop.f32.mrf.mxu1  ;;  %v6508_v24 = vor.u32 %v8051_v22, %v6505_v23 }
 0x127   : > { %v1974_v28 = vadd.f32 %v1973_v1, %v792_v33 }
 0x128   : > { %2603 = vmatpush.bf16.msrb.mxu3 %v6308_v40 }
 0x129   : > { %v10208_v62 = vpop.f32.mrf.mxu0 }
 0x12a   : > { %2616 = vmatpush.bf16.msra.mxu1 %v6372_v46 }
 0x12b   : > { %2604 = vmatmul.bf16.vlgmr.msrb.gmra.mxu3 %v10072_v37  ;;  %v6481_v37 = vld [vmem:[%s12338_s6 + $0x168] sm:$0xf0] }
 0x12c   : > { %v6484_v61 = vor.u32 %v8045_v60, %v6481_v37  ;;  %v6556_v60 = vor.u32 %v8063_v35, %v6553_v58  ;;  %2784 = vmatpush.bf16.msra.mxu3 %v8072_v63  ;;  %v6625_v63 = vld [vmem:[%s12342_s10] sm:$0xf] }
 0x12d   : > { %2617 = vmatmul.bf16.vlgmr.msra.gmra.mxu1 %v2151_v52  ;;  %v6495_v52 = vld [vmem:[%s12338_s6 + $0x180] sm:$0xf] }
 0x12e   : > { %2623 = vmatpush.bf16.msra.mxu2 %v6484_v61  ;;  %v1986_v9 = vpop.f32.mrf.mxu3  ;;  %v1975_v16 = vpop.f32.mrf.mxu1  ;;  %v6496_v56 = vor.u32 %v8050_v54, %v6495_v52 }
 0x12f   : > { %v1987_v46 = vadd.f32 %v1986_v9, %v1974_v28  ;;  %v6540_v9 = vor.u32 %v8059_v5, %v6537_v6  ;;  %v6521_v16 = vld [vmem:[%s12338_s6 + $0x1b8] sm:$0xf0]  ;;  %v8067_v5 = vld [vmem:[%s12340_s8 + $0x10] sm:$0xff] }
 0x130   : > { %2590 = vmatpush.bf16.msra.mxu0 %v6496_v56  ;;  %v8079_v6 = vld [vmem:[%s12340_s8 + $0x70] sm:$0xff] }
 0x131   : > { %v2001_v55 = vpop.f32.mrf.mxu0  ;;  %v2012_v15 = vpop.f32.mrf.mxu2  ;;  %v2000_v36 = vadd.f32 %v10208_v62, %v1987_v46 }
 0x132   : > { %2624 = vmatpush.bf16.msra.mxu2 %v6476_v4  ;;  %v8057_v55 = vld [vmem:[%s12338_s6 + $0x1c4] sm:$0xf] }
 0x133   : > { %v2013_v59 = vadd.f32 %v2012_v15, %v2000_v36  ;;  %v6532_v13 = vor.u32 %v8057_v55, %v6529_v12  ;;  %v8055_v15 = vld [vmem:[%s12338_s6 + $0x1b4] sm:$0xf]  ;;  %v2218_v36 = vld [vmem:[%s12339_s7] sm:$0x3]  ;;  %v8076_v55 = vld [vmem:[%s12340_s8 + $0x58] sm:$0xff] }
 0x134   : > { %2635 = vmatpush.bf16.msrb.mxu0 %v6556_v60  ;;  %v6524_v7 = vor.u32 %v8055_v15, %v6521_v16  ;;  %v8075_v12 = vld [vmem:[%s12340_s8 + $0x50] sm:$0xff]  ;;  %v8073_v16 = vld [vmem:[%s12340_s8 + $0x40] sm:$0xff] }
 0x136   : > { %2625 = vmatpush.bf16.msra.mxu2 %v6468_v45  ;;  %v1988_v29 = vpop.f32.mrf.mxu3 }
 0x137   : > { %v8049_v29 = vld [vmem:[%s12338_s6 + $0x184] sm:$0xf] }
 0x138   : > { %2636 = vmatpush.bf16.msrb.mxu0 %v6548_v2  ;;  %v6500_v31 = vor.u32 %v8049_v29, %v6497_v53  ;;  %v8069_v2 = vld [vmem:[%s12340_s8 + $0x20] sm:$0xff] }
 0x139   : > { %v2051_v34 = vpop.f32.mrf.mxu0  ;;  %v2014_v40 = vpop.f32.mrf.mxu2 }
 0x13a   : > { %2626 = vmatpush.bf16.msra.mxu2 %v6460_v19  ;;  %v6513_v19 = vld [vmem:[%s12338_s6 + $0x1a8] sm:$0xf0] }
 0x13b   : > { %v6516_v20 = vor.u32 %v8053_v18, %v6513_v19 }
 0x13c   : > { %2637 = vmatpush.bf16.msrb.mxu0 %v6540_v9  ;;  %v8078_v9 = vld [vmem:[%s12340_s8 + $0x68] sm:$0xff] }
 0x13e   : > { %2627 = vmatpush.bf16.msra.mxu2 %v6452_v25 }
 0x140   : > { %2638 = vmatpush.bf16.msrb.mxu0 %v6532_v13 }
 0x141   : > { %v2053_v30 = vpop.f32.mrf.mxu0 }
 0x142   : > { %2628 = vmatpush.bf16.msra.mxu2 %v6444_v38 }
 0x144   : > { %2639 = vmatpush.bf16.msrb.mxu0 %v6524_v7 }
 0x146   : > { %2629 = vmatpush.bf16.msra.mxu2 %v6436_v44  ;;  %v2025_v50 = vpop.f32.mrf.mxu1 }
 0x147   : > { %v2026_v37 = vadd.f32 %v2025_v50, %v2013_v59  ;;  %v2220_v50 = vperm.slane %v2218_v36, 0  ;;  %v2221_v59 = vperm.slane %v2218_v36, 1 }
 0x148   : > { %2640 = vmatpush.bf16.msrb.mxu0 %v6516_v20 }
 0x14c   : > { %2641 = vmatpush.bf16.msrb.mxu0 %v6508_v24 }
 0x14d   : > { %v2077_v61 = vpop.f32.mrf.mxu0 }
 0x14e   : > { %v2038_v62 = vpop.f32.mrf.mxu3  ;;  %v2027_v1 = vpop.f32.mrf.mxu1 }
 0x14f   : > { %v2039_v0 = vadd.f32 %v2038_v62, %v2026_v37  ;;  %v8070_v1 = vld [vmem:[%s12340_s8 + $0x28] sm:$0xff] }
 0x150   : > { %2642 = vmatpush.bf16.msrb.mxu0 %v6500_v31 }
 0x151   : > { %v2052_v3 = vadd.f32 %v2051_v34, %v2039_v0  ;;  %v2064_v4 = vpop.f32.mrf.mxu2  ;;  %v8071_v0 = vld [vmem:[%s12340_s8 + $0x30] sm:$0xff] }
 0x152   : > { %v2065_v25 = vadd.f32 %v2064_v4, %v793_v21  ;;  %2785 = vmatpush.bf16.msra.mxu3 %v8071_v0  ;;  %v8068_v4 = vld [vmem:[%s12340_s8 + $0x18] sm:$0xff]  ;;  %v8082_v0 = vld [vmem:[%s12342_s10 + $0x4] sm:$0xf0] }
 0x153   : > { %v2148_v8 = vmax.f32 %v2052_v3, 0.0  ;;  %v8080_v3 = vld [vmem:[%s12340_s8 + $0x78] sm:$0xff] }
 0x154   : > { %v2078_v27 = vadd.f32 %v2077_v61, %v2065_v25  ;;  %2797 = vmatpush.bf16.msrb.mxu1 %v8080_v3  ;;  %v6627_v3 = vld [vmem:[%s12342_s10 + $0x8] sm:$0xf0] }
 0x155   : > { %v2152_v10 = vpack.c.bf16 %v2148_v8, %v2148_v8  ;;  %v2079_v11 = vpop.f32.mrf.mxu0  ;;  %v8066_v8 = vld [vmem:[%s12340_s8 + $0x8] sm:$0xff] }
 0x156   : > { %v2040_v45 = vpop.f32.mrf.mxu3  ;;  %2786 = vmatpush.bf16.msra.mxu3 %v8070_v1  ;;  %v8065_v11 = vld [vmem:[%s12340_s8] sm:$0xff] }
 0x157   : > { %2578 = vmatmul.bf16.vlgmr.msrb.gmra.mxu2 %v2152_v10  ;;  %v8077_v45 = vld [vmem:[%s12340_s8 + $0x60] sm:$0xff] }
 0x158   : > { %2798 = vmatpush.bf16.msrb.mxu1 %v8079_v6  ;;  %v8081_v1 = vld [vmem:[%s12342_s10 + $0x4] sm:$0xf]  ;;  %v8115_v6 = vld [vmem:[%s12344_s12 + $0xec] sm:$0xf0] }
 0x159   : > { %v2066_v14 = vpop.f32.mrf.mxu2 }
 0x15a   : > { %2787 = vmatpush.bf16.msra.mxu3 %v8069_v2  ;;  %v8074_v14 = vld [vmem:[%s12340_s8 + $0x48] sm:$0xff]  ;;  %v6626_v2 = vor.u32 %v8082_v0, %v6625_v63  ;;  %v6821_v63 = vld [vmem:[%s12344_s12 + $0x170] sm:$0xf0] }
 0x15c   : > { %2799 = vmatpush.bf16.msrb.mxu1 %v8078_v9 }
 0x15e   : > { %2788 = vmatpush.bf16.msra.mxu3 %v8068_v4  ;;  %v6630_v4 = vor.u32 %v8081_v1, %v6627_v3  ;;  %v6675_v1 = vld [vmem:[%s12344_s12 + $0x40] sm:$0xf]  ;;  %v8093_v3 = vld [vmem:[%s12344_s12 + $0x44] sm:$0xf] }
 0x160   : > { %2800 = vmatpush.bf16.msrb.mxu1 %v8077_v45  ;;  %v8111_v45 = vld [vmem:[%s12344_s12 + $0xcc] sm:$0xf0] }
 0x162   : > { %2789 = vmatpush.bf16.msra.mxu3 %v8067_v5  ;;  %v6755_v5 = vld [vmem:[%s12344_s12 + $0xe0] sm:$0xf] }
 0x163   : > { %v6756_v9 = vor.u32 %v8115_v6, %v6755_v5 }
 0x164   : > { %2801 = vmatpush.bf16.msrb.mxu1 %v8076_v55 }
 0x166   : > { %v2090_v26 = vpop.f32.mrf.mxu1  ;;  %2790 = vmatpush.bf16.msra.mxu3 %v8066_v8  ;;  %v8113_v8 = vld [vmem:[%s12344_s12 + $0xe4] sm:$0xf] }
 0x167   : > { %2630 = vmatmul.bf16.vlgmr.msra.gmra.mxu2 %v2152_v10  ;;  %v2091_v32 = vadd.f32 %v2090_v26, %v2078_v27 }
 0x168   : > { %2802 = vmatpush.bf16.msrb.mxu1 %v8075_v12  ;;  %v8109_v12 = vld [vmem:[%s12344_s12 + $0xc4] sm:$0xf] }
 0x16a   : > { %2791 = vmatpush.bf16.msra.mxu3 %v8065_v11  ;;  %v6739_v11 = vld [vmem:[%s12344_s12 + $0xc0] sm:$0xf] }
 0x16c   : > { %2803 = vmatpush.bf16.msrb.mxu1 %v8074_v14  ;;  %v6883_v14 = vld [vmem:[%s12344_s12 + $0x1e0] sm:$0xf] }
 0x16d   : > { %v2129_v17 = vpop.f32.mrf.mxu0 }
 0x16e   : > { %v2103_v33 = vpop.f32.mrf.mxu3  ;;  %v2092_v38 = vpop.f32.mrf.mxu1  ;;  %3326 = vmatpush.bf16.msrb.mxu3 %v6756_v9  ;;  %v6803_v9 = vld [vmem:[%s12344_s12 + $0x140] sm:$0xf] }
 0x16f   : > { %v2104_v34 = vadd.f32 %v2103_v33, %v2091_v32  ;;  %v8420_v32 = vld [vmem:[%s12341_s9] ss:$0 sm:$0xff] }
 0x170   : > { %2804 = vmatpush.bf16.msrb.mxu1 %v8073_v16  ;;  %v8147_v16 = vld [vmem:[%s12344_s12 + $0x1ec] sm:$0xf0] }
 0x171   : > { %v2116_v39 = vpop.f32.mrf.mxu2 }
 0x172   : > { %v2117_v51 = vadd.f32 %v2116_v39, %v2104_v34  ;;  %v2811_v39 = vld [vmem:[%s575_s29] sm:$0xff]  ;;  %s10667_s29 = sand.u32 1, %s8543_s28  }
 0x173   : > { %s5510_s26 = sshll.u32 %s10667_s29, 3  ;;  %s8373_s18 = smul.u32 56, %s10667_s29 }
 0x174   : > { %v2130_v57 = vadd.f32 %v2129_v17, %v2117_v51  ;;  %s5372_s16 = scalar_lea.sflag [#allocation6], %s10667_s29 }
 0x175   : > { %v2131_v42 = vpop.f32.mrf.mxu0  ;;  %s12267_s1 = scalar_lea.vmem [#allocation3], %s8373_s18 }
 0x176   : > { %v2105_v40 = vpop.f32.mrf.mxu3  ;;  %v2142_v28 = vpop.f32.mrf.mxu1 }
 0x177   : > { %v2143_v43 = vadd.f32 %v2142_v28, %v2130_v57  ;;  %v2813_v40 = vstv %s577_s2  ;;  %s10685_s2 = scalar_lea.vmem [#allocation5], %s5510_s26 }
 0x178   : > { %s5399_s24 = sshll.u32 %s10685_s2, 4  ;;  %s5400_s24 = int_to_ptr.vmem [resolvable:$true] %s5399_s24 }
 0x179   : > { %v2118_v44 = vpop.f32.mrf.mxu2  ;;  %v2149_v46 = vmax.f32 %v2143_v43, 0.0 }
 0x17b   : > { %v2153_v30 = vpack.c.bf16 %v2149_v46, %v2149_v46  ;;  %v2831_v46 = vld [vmem:[%s12374_s20 + $0x18] sm:$0xff] }
 0x17c   : > { %2850 = vmatpush.msrb.mxu2 %v2831_v46  ;;  %v6835_v46 = vld [vmem:[%s12344_s12 + $0x180] sm:$0xf] }
 0x17d   : > { %2591 = vmatmul.bf16.vlgmr.msra.gmra.mxu0 %v2153_v30 }
 0x17e   : > { %v2144_v47 = vpop.f32.mrf.mxu1 }
 0x17f   : > { %v2829_v47 = vld [vmem:[%s12374_s20 + $0x8] sm:$0xff] }
 0x18d   : > { %2643 = vmatmul.bf16.vlgmr.msrb.gmra.mxu0 %v2153_v30  ;;  %v2830_v30 = vld [vmem:[%s12374_s20 + $0x10] sm:$0xff] }
 0x18e   : > { %v2553_v48 = vpop.f32.mrf.mxu3  ;;  %2851 = vmatpush.msrb.mxu2 %v2830_v30 }
 0x18f   : > { %v2554_v52 = vadd.f32 %v2553_v48, %v2220_v50  ;;  %v2828_v48 = vld [vmem:[%s12374_s20] sm:$0xff] }
 0x190   : > { %2852 = vmatpush.msrb.mxu2 %v2829_v47  ;;  %v8135_v47 = vld [vmem:[%s12344_s12 + $0x18c] sm:$0xf0] }
 0x192   : > { %2853 = vmatpush.msrb.mxu2 %v2828_v48  ;;  %v8133_v48 = vld [vmem:[%s12344_s12 + $0x184] sm:$0xf] }
 0x196   : > { %v2555_v49 = vpop.f32.mrf.mxu3 }
 0x199   : > { %v2566_v54 = vpop.f32.mrf.mxu1 }
 0x19a   : > { %v2567_v56 = vadd.f32 %v2566_v54, %v2554_v52 }
 0x1a1   : > { %v2568_v58 = vpop.f32.mrf.mxu1 }
 0x1aa   : > { %v2618_v61 = vpop.f32.mrf.mxu1 }
 0x1ae   : > { %v2605_v35 = vpop.f32.mrf.mxu3 }
 0x1af   : > { %v2606_v37 = vadd.f32 %v2605_v35, %v2221_v59  ;;  %v6633_v59 = vld [vmem:[%s12342_s10 + $0x10] sm:$0xf] }
 0x1b1   : > { %v2619_v62 = vadd.f32 %v2618_v61, %v2606_v37  ;;  %v8083_v37 = vld [vmem:[%s12342_s10 + $0x14] sm:$0xf] }
 0x1b2   : > { %v2620_v41 = vpop.f32.mrf.mxu1 }
 0x1b6   : > { %v2607_v60 = vpop.f32.mrf.mxu3 }
 0x1b7   : > { %v8084_v60 = vld [vmem:[%s12342_s10 + $0x14] sm:$0xf0] }
 0x1b8   : > { %v6634_v61 = vor.u32 %v8084_v60, %v6633_v59  ;;  %v6836_v59 = vor.u32 %v8135_v47, %v6835_v46  ;;  %v6773_v46 = vld [vmem:[%s12344_s12 + $0x110] sm:$0xf0]  ;;  %v8148_v47 = vld [vmem:[%s12344_s12 + $0x1f4] sm:$0xf0] }
 0x1ba   : > { %2908 = vmatpush.bf16.msra.mxu0 %v6634_v61 }
 0x1be   : > { %2909 = vmatpush.bf16.msra.mxu0 %v6626_v2  ;;  %v8095_v2 = vld [vmem:[%s12344_s12 + $0x4c] sm:$0xf0] }
 0x1da   : > { %v2579_v10 = vpop.f32.mrf.mxu2 }
 0x1db   : > { %v2580_v18 = vadd.f32 %v2579_v10, %v2567_v56  ;;  %v6757_v10 = vld [vmem:[%s12344_s12 + $0xf0] sm:$0xf0] }
 0x1dc   : > { %v6760_v55 = vor.u32 %v8113_v8, %v6757_v10  ;;  %v8127_v10 = vld [vmem:[%s12344_s12 + $0x14c] sm:$0xf0] }
 0x1de   : > { %3352 = vmatpush.bf16.msra.mxu1 %v6760_v55  ;;  %v8125_v55 = vld [vmem:[%s12344_s12 + $0x144] sm:$0xf] }
 0x1e2   : > { %v2581_v13 = vpop.f32.mrf.mxu2 }
 0x1e3   : > { %v6741_v13 = vld [vmem:[%s12344_s12 + $0xd0] sm:$0xf0] }
 0x1ea   : > { %v2631_v15 = vpop.f32.mrf.mxu2 }
 0x1eb   : > { %v2632_v24 = vadd.f32 %v2631_v15, %v2619_v62  ;;  %v6635_v62 = vld [vmem:[%s12342_s10 + $0x18] sm:$0xf0]  ;;  %v6740_v15 = vor.u32 %v8111_v45, %v6739_v11  ;;  %v6676_v45 = vor.u32 %v8095_v2, %v6675_v1 }
 0x1ec   : > { %v6638_v41 = vor.u32 %v8083_v37, %v6635_v62  ;;  %v6819_v37 = vld [vmem:[%s12344_s12 + $0x160] sm:$0xf]  ;;  %v8131_v62 = vld [vmem:[%s12344_s12 + $0x16c] sm:$0xf0] }
 0x1ed   : > { %3327 = vmatpush.bf16.msrb.mxu3 %v6740_v15  ;;  %v6820_v6 = vor.u32 %v8131_v62, %v6819_v37  ;;  %v8091_v15 = vld [vmem:[%s12344_s12 + $0x2c] sm:$0xf0]  ;;  %v6749_v37 = vld [vmem:[%s12344_s12 + $0xd8] sm:$0xf0] }
 0x1ee   : > { %2921 = vmatpush.bf16.msra.mxu2 %v6638_v41  ;;  %v8129_v41 = vld [vmem:[%s12344_s12 + $0x164] sm:$0xf] }
 0x1ef   : > { %v6824_v8 = vor.u32 %v8129_v41, %v6821_v63 }
 0x1f2   : > { %v2633_v7 = vpop.f32.mrf.mxu2  ;;  %2922 = vmatpush.bf16.msra.mxu2 %v6630_v4  ;;  %v6677_v4 = vld [vmem:[%s12344_s12 + $0x50] sm:$0xf0] }
 0x1f3   : > { %v8145_v7 = vld [vmem:[%s12344_s12 + $0x1e4] sm:$0xf] }
 0x1fa   : > { %v2592_v19 = vpop.f32.mrf.mxu0 }
 0x1fb   : > { %v2593_v20 = vadd.f32 %v2592_v19, %v2580_v18  ;;  %v6885_v18 = vld [vmem:[%s12344_s12 + $0x1f0] sm:$0xf0]  ;;  %v6744_v19 = vor.u32 %v8109_v12, %v6741_v13  ;;  %v6680_v13 = vor.u32 %v8093_v3, %v6677_v4  ;;  %v6731_v3 = vld [vmem:[%s12344_s12 + $0xa8] sm:$0xf]  ;;  %v8108_v4 = vld [vmem:[%s12344_s12 + $0xb4] sm:$0xf0] }
 0x1fc   : > { %v6805_v12 = vld [vmem:[%s12344_s12 + $0x150] sm:$0xf0] }
 0x1fd   : > { %v2648_v21 = vmax.f32 %v2593_v20, 0.0  ;;  %v6884_v20 = vor.u32 %v8147_v16, %v6883_v14  ;;  %3353 = vmatpush.bf16.msra.mxu1 %v6744_v19  ;;  %v6659_v14 = vld [vmem:[%s12344_s12 + $0x20] sm:$0xf]  ;;  %v8089_v16 = vld [vmem:[%s12344_s12 + $0x24] sm:$0xf]  ;;  %v6808_v19 = vor.u32 %v8125_v55, %v6805_v12 }
 0x1fe   : > { %v6877_v55 = vld [vmem:[%s12344_s12 + $0x1d8] sm:$0xf0] }
 0x1ff   : > { %v2650_v22 = vpack.c.bf16 %v2648_v21, %v2648_v21  ;;  %v6888_v21 = vor.u32 %v8145_v7, %v6885_v18  ;;  %3339 = vmatpush.bf16.msrb.mxu0 %v6884_v20  ;;  %v6661_v7 = vld [vmem:[%s12344_s12 + $0x30] sm:$0xf0]  ;;  %v6804_v18 = vor.u32 %v8127_v10, %v6803_v9  ;;  %v6787_v20 = vld [vmem:[%s12344_s12 + $0x120] sm:$0xf]  ;;  %v6875_v9 = vld [vmem:[%s12344_s12 + $0x1c8] sm:$0xf] }
 0x200   : > { %v8144_v10 = vld [vmem:[%s12344_s12 + $0x1d4] sm:$0xf0] }
 0x201   : > { %2792 = vmatmul.bf16.vlgmr.msra.gmra.mxu3 %v2650_v22  ;;  %v6723_v22 = vld [vmem:[%s12344_s12 + $0xa0] sm:$0xf] }
 0x202   : > { %v2594_v23 = vpop.f32.mrf.mxu0 }
 0x203   : > { %v8107_v23 = vld [vmem:[%s12344_s12 + $0xac] sm:$0xf0] }
 0x20a   : > { %v2644_v25 = vpop.f32.mrf.mxu0 }
 0x20b   : > { %v2645_v26 = vadd.f32 %v2644_v25, %v2632_v24  ;;  %v8105_v24 = vld [vmem:[%s12344_s12 + $0xa4] sm:$0xf]  ;;  %v6725_v25 = vld [vmem:[%s12344_s12 + $0xb0] sm:$0xf0] }
 0x20d   : > { %v2649_v27 = vmax.f32 %v2645_v26, 0.0  ;;  %v6867_v26 = vld [vmem:[%s12344_s12 + $0x1c0] sm:$0xf] }
 0x20f   : > { %v2651_v29 = vpack.c.bf16 %v2649_v27, %v2649_v27  ;;  %v8143_v27 = vld [vmem:[%s12344_s12 + $0x1cc] sm:$0xf0] }
 0x211   : > { %2805 = vmatmul.bf16.vlgmr.msrb.gmra.mxu1 %v2651_v29  ;;  %v6868_v29 = vor.u32 %v8143_v27, %v6867_v26  ;;  %v6643_v26 = vld [vmem:[%s12344_s12] sm:$0xf]  ;;  %v8087_v27 = vld [vmem:[%s12344_s12 + $0xc] sm:$0xf0] }
 0x212   : > { %v2646_v53 = vpop.f32.mrf.mxu0 }
 0x213   : > { %v8141_v53 = vld [vmem:[%s12344_s12 + $0x1c4] sm:$0xf]  ;;  %3340 = vmatpush.bf16.msrb.mxu0 %v6868_v29 }
 0x214   : > { %v8085_v29 = vld [vmem:[%s12344_s12 + $0x4] sm:$0xf] }
 0x284   : > { %v2793_v31 = vpop.f32.mrf.mxu3 }
 0x285   : > { %v2794_v17 = vadd.f32 %v8420_v32, %v2793_v31  ;;  %v6869_v31 = vld [vmem:[%s12344_s12 + $0x1d0] sm:$0xf0]  ;;  %v6724_v32 = vor.u32 %v8107_v23, %v6723_v22  ;;  %v8123_v22 = vld [vmem:[%s12344_s12 + $0x12c] sm:$0xf0]  ;;  %v8121_v23 = vld [vmem:[%s12344_s12 + $0x124] sm:$0xf] }
 0x287   : > { %3328 = vmatpush.bf16.msrb.mxu3 %v6724_v32  ;;  %v8116_v32 = vld [vmem:[%s12344_s12 + $0xf4] sm:$0xf0] }
 0x28c   : > { %v2795_v33 = vpop.f32.mrf.mxu3 }
 0x28d   : > { %v6872_v33 = vor.u32 %v8141_v53, %v6869_v31  ;;  %v6645_v53 = vld [vmem:[%s12344_s12 + $0x10] sm:$0xf0]  ;;  %v6763_v31 = vld [vmem:[%s12344_s12 + $0xe8] sm:$0xf] }
 0x28e   : > { %v2806_v34 = vpop.f32.mrf.mxu1 }
 0x28f   : > { %v2807_v38 = vadd.f32 %v2806_v34, %v2794_v17  ;;  %v6707_v17 = vld [vmem:[%s12344_s12 + $0x80] sm:$0xf]  ;;  %v8103_v34 = vld [vmem:[%s12344_s12 + $0x8c] sm:$0xf0] }
 0x290   : > { %v6708_v30 = vor.u32 %v8103_v34, %v6707_v17  ;;  %v8114_v17 = vld [vmem:[%s12344_s12 + $0xec] sm:$0xf]  ;;  %v6765_v34 = vld [vmem:[%s12344_s12 + $0xf8] sm:$0xf0] }
 0x291   : > { %v2810_v51 = vmax.f32 %v2807_v38, 0.0  ;;  %v6728_v38 = vor.u32 %v8105_v24, %v6725_v25  ;;  %v6789_v24 = vld [vmem:[%s12344_s12 + $0x130] sm:$0xf0]  ;;  %v6664_v25 = vor.u32 %v8089_v16, %v6661_v7  ;;  %v6717_v7 = vld [vmem:[%s12344_s12 + $0x98] sm:$0xf0] }
 0x292   : > { %3329 = vmatpush.bf16.msrb.mxu3 %v6708_v30  ;;  %v6891_v30 = vld [vmem:[%s12344_s12 + $0x1e8] sm:$0xf] }
 0x293   : > { %v2812_v42 = vadd.f32 %v2811_v39, %v2810_v51  ;;  %v2819_v44 = vsel %vm2815_vm1, %v2810_v51, -inf  ;;  %v6851_v39 = vld [vmem:[%s12344_s12 + $0x1a0] sm:$0xf]  ;;  %3354 = vmatpush.bf16.msra.mxu1 %v6728_v38  ;;  %v6788_v38 = vor.u32 %v8123_v22, %v6787_v20  ;;  %v6892_v62 = vor.u32 %v8148_v47, %v6891_v30  ;;  %v8140_v20 = vld [vmem:[%s12344_s12 + $0x1b4] sm:$0xf0] }
 0x294   : > { %v8130_v30 = vld [vmem:[%s12344_s12 + $0x16c] sm:$0xf] }
 0x295   : > { %v2814_v57 = vmul.f32 %v2813_v40, %v2812_v42  ;;  %v8137_v40 = vld [vmem:[%s12344_s12 + $0x1a4] sm:$0xf] }
 0x296   : > { %v2808_v28 = vpop.f32.mrf.mxu1  ;;  %v8101_v42 = vld [vmem:[%s12344_s12 + $0x84] sm:$0xf] }
 0x297   : > { %v2816_v43 = vsel %vm2815_vm1, %v2814_v57, -inf  ;;  %v6853_v28 = vld [vmem:[%s12344_s12 + $0x1b0] sm:$0xf0] }
 0x298   : > { %2817 = vmax.xlane.f32.xlu0 %v2816_v43 }
 0x2a0   : > { %2820 = vmax.xlane.f32.xlu0 %v2819_v44  ;;  %v6856_v44 = vor.u32 %v8137_v40, %v6853_v28  ;;  %v8119_v28 = vld [vmem:[%s12344_s12 + $0x10c] sm:$0xf0] }
 0x30b   : > { %v2818_v49 = vpop.xlane.xlu0 %2817 }
 0x30c   : > { %v2822_v36 = vsub.f32 %v2814_v57, %v2818_v49  ;;  %v6709_v57 = vld [vmem:[%s12344_s12 + $0x90] sm:$0xf0] }
 0x30d   : > { %v6837_v49 = vld [vmem:[%s12344_s12 + $0x190] sm:$0xf0] }
 0x30e   : > { %v2824_v50 = vmul.f32 1.442695, %v2822_v36  ;;  %v6712_v36 = vor.u32 %v8101_v42, %v6709_v57  ;;  %v6840_v60 = vor.u32 %v8133_v48, %v6837_v49  ;;  %v6644_v57 = vor.u32 %v8087_v27, %v6643_v26  ;;  %v8100_v26 = vld [vmem:[%s12344_s12 + $0x74] sm:$0xf0]  ;;  %v8098_v27 = vld [vmem:[%s12344_s12 + $0x6c] sm:$0xf] }
 0x30f   : > { %v6648_v48 = vor.u32 %v8085_v29, %v6645_v53  ;;  %v6764_v49 = vor.u32 %v8116_v32, %v6763_v31  ;;  %v6701_v53 = vld [vmem:[%s12344_s12 + $0x78] sm:$0xf0]  ;;  %v6843_v32 = vld [vmem:[%s12344_s12 + $0x188] sm:$0xf] }
 0x310   : > { %8421 = vpow2.f32 %v2824_v50  ;;  %v6691_v50 = vld [vmem:[%s12344_s12 + $0x60] sm:$0xf]  ;;  %3355 = vmatpush.bf16.msra.mxu1 %v6712_v36  ;;  %v6893_v36 = vld [vmem:[%s12344_s12 + $0x1f8] sm:$0xf0]  ;;  %v6704_v31 = vor.u32 %v8098_v27, %v6701_v53  ;;  %v8194_v53 = vld [vmem:[%s12346_s14 + $0x168] sm:$0xf0] }
 0x313   : > { %v2821_v52 = vpop.xlane.xlu0 %2820 }
 0x314   : > { %v2823_v54 = vsub.f32 %v2810_v51, %v2821_v52  ;;  %v8139_v51 = vld [vmem:[%s12344_s12 + $0x1ac] sm:$0xf0] }
 0x315   : > { %v6852_v43 = vor.u32 %v8139_v51, %v6851_v39  ;;  %v8099_v52 = vld [vmem:[%s12344_s12 + $0x6c] sm:$0xf0]  ;;  %v6792_v39 = vor.u32 %v8121_v23, %v6789_v24  ;;  %v6771_v51 = vld [vmem:[%s12344_s12 + $0x100] sm:$0xf]  ;;  %v6861_v23 = vld [vmem:[%s12344_s12 + $0x1b8] sm:$0xf0] }
 0x316   : > { %v10417_v56 = vpop.eup %8421  ;;  %v2826_v35 = vmul.f32 1.442695, %v2823_v54  ;;  %v8097_v54 = vld [vmem:[%s12344_s12 + $0x64] sm:$0xf]  ;;  %v6692_v61 = vor.u32 %v8099_v52, %v6691_v50  ;;  %v6768_v52 = vor.u32 %v8114_v17, %v6765_v34  ;;  %v8134_v17 = vld [vmem:[%s12344_s12 + $0x18c] sm:$0xf] }
 0x317   : > { %6621 = vmatmul.msk.f32.vlgmr.msrb.gmra.mxu2 %vm2815_vm1, %v10417_v56  ;;  %3341 = vmatpush.bf16.msrb.mxu0 %v6852_v43  ;;  %v8117_v43 = vld [vmem:[%s12344_s12 + $0x104] sm:$0xf] }
 0x318   : > { %8423 = vpow2.f32 %v2826_v35  ;;  %3365 = vmatpush.bf16.msrb.mxu2 %v6888_v21  ;;  %v6693_v35 = vld [vmem:[%s12344_s12 + $0x70] sm:$0xf0]  ;;  %3330 = vmatpush.bf16.msrb.mxu3 %v6692_v61  ;;  %v6660_v21 = vor.u32 %v8091_v15, %v6659_v14  ;;  %v6776_v61 = vor.u32 %v8117_v43, %v6773_v46  ;;  %v8104_v14 = vld [vmem:[%s12344_s12 + $0x94] sm:$0xf0]  ;;  %v8102_v15 = vld [vmem:[%s12344_s12 + $0x8c] sm:$0xf] }
 0x319   : > { %v6696_v0 = vor.u32 %v8097_v54, %v6693_v35  ;;  %v6747_v54 = vld [vmem:[%s12344_s12 + $0xc8] sm:$0xf]  ;;  %v8112_v35 = vld [vmem:[%s12344_s12 + $0xd4] sm:$0xf0] }
 0x31a   : > { %v6748_v63 = vor.u32 %v8112_v35, %v6747_v54  ;;  %v8132_v46 = vld [vmem:[%s12344_s12 + $0x174] sm:$0xf0]  ;;  %v6669_v54 = vld [vmem:[%s12344_s12 + $0x38] sm:$0xf0]  ;;  %v6811_v35 = vld [vmem:[%s12344_s12 + $0x148] sm:$0xf] }
 0x31b   : > { %3342 = vmatpush.bf16.msrb.mxu0 %v6836_v59  ;;  %3356 = vmatpush.bf16.msra.mxu1 %v6696_v0  ;;  %v6772_v59 = vor.u32 %v8119_v28, %v6771_v51  ;;  %v6683_v51 = vld [vmem:[%s12344_s12 + $0x48] sm:$0xf]  ;;  %v6685_v28 = vld [vmem:[%s12344_s12 + $0x58] sm:$0xf0] }
 0x31c   : > { %3366 = vmatpush.bf16.msrb.mxu2 %v6872_v33  ;;  %3331 = vmatpush.bf16.msrb.mxu3 %v6676_v45  ;;  %v6876_v45 = vor.u32 %v8144_v10, %v6875_v9  ;;  %v6797_v9 = vld [vmem:[%s12344_s12 + $0x138] sm:$0xf0] }
 0x31e   : > { %v10421_v58 = vpop.eup %8423 }
 0x31f   : > { %6622 = vmatmul.msk.f32.gmra.mxu2 %vm2815_vm1, %v10421_v58  ;;  %3343 = vmatpush.bf16.msrb.mxu0 %v6820_v6  ;;  %v6733_v6 = vld [vmem:[%s12344_s12 + $0xb8] sm:$0xf0] }
 0x320   : > { %3367 = vmatpush.bf16.msrb.mxu2 %v6856_v44  ;;  %3357 = vmatpush.bf16.msra.mxu1 %v6680_v13  ;;  %v6715_v13 = vld [vmem:[%s12344_s12 + $0x88] sm:$0xf] }
 0x321   : > { %3332 = vmatpush.bf16.msrb.mxu3 %v6660_v21  ;;  %v6716_v16 = vor.u32 %v8104_v14, %v6715_v13  ;;  %v8138_v21 = vld [vmem:[%s12344_s12 + $0x1ac] sm:$0xf]  ;;  %v6781_v13 = vld [vmem:[%s12344_s12 + $0x118] sm:$0xf0] }
 0x322   : > { %v6864_v24 = vor.u32 %v8138_v21, %v6861_v23  ;;  %v7543_v23 = vld [vmem:[%s12346_s14 + $0x508] sm:$0xf] }
 0x323   : > { %3344 = vmatpush.bf16.msrb.mxu0 %v6804_v18  ;;  %v6720_v18 = vor.u32 %v8102_v15, %v6717_v7  ;;  %v2873_v15 = vld [vmem:[%s12343_s11] sm:$0x3] }
 0x324   : > { %3368 = vmatpush.bf16.msrb.mxu2 %v6840_v60  ;;  %3358 = vmatpush.bf16.msra.mxu1 %v6664_v25  ;;  %v8110_v60 = vld [vmem:[%s12344_s12 + $0xcc] sm:$0xf]  ;;  %v6699_v25 = vld [vmem:[%s12344_s12 + $0x68] sm:$0xf] }
 0x325   : > { %3333 = vmatpush.bf16.msrb.mxu3 %v6644_v57  ;;  %v6752_v0 = vor.u32 %v8110_v60, %v6749_v37  ;;  %v6700_v29 = vor.u32 %v8100_v26, %v6699_v25  ;;  %v7067_v26 = vld [vmem:[%s12346_s14 + $0x150] sm:$0xf] }
 0x327   : > { %3345 = vmatpush.bf16.msrb.mxu0 %v6788_v38  ;;  %v6845_v38 = vld [vmem:[%s12344_s12 + $0x198] sm:$0xf0] }
 0x328   : > { %3369 = vmatpush.bf16.msrb.mxu2 %v6824_v8  ;;  %3359 = vmatpush.bf16.msra.mxu1 %v6648_v48  ;;  %v6829_v48 = vld [vmem:[%s12344_s12 + $0x178] sm:$0xf0] }
 0x329   : > { %3378 = vmatpush.bf16.msra.mxu3 %v6764_v49  ;;  %v6832_v49 = vor.u32 %v8130_v30, %v6829_v48  ;;  %v8299_v30 = vld [vmem:[%s12346_s14 + $0x4b0] sm:$0xf0]  ;;  %v7291_v48 = vld [vmem:[%s12346_s14 + $0x310] sm:$0xf] }
 0x32b   : > { %3346 = vmatpush.bf16.msrb.mxu0 %v6772_v59  ;;  %v8128_v59 = vld [vmem:[%s12344_s12 + $0x154] sm:$0xf0] }
 0x32c   : > { %3370 = vmatpush.bf16.msrb.mxu2 %v6808_v19  ;;  %3404 = vmatpush.bf16.msrb.mxu1 %v6768_v52  ;;  %v6859_v19 = vld [vmem:[%s12344_s12 + $0x1a8] sm:$0xf]  ;;  %v6812_v37 = vor.u32 %v8128_v59, %v6811_v35  ;;  %v7011_v35 = vld [vmem:[%s12346_s14 + $0xe0] sm:$0xf] }
 0x32d   : > { %3379 = vmatpush.bf16.msra.mxu3 %v6748_v63  ;;  %v6860_v22 = vor.u32 %v8140_v20, %v6859_v19  ;;  %v7095_v19 = vld [vmem:[%s12346_s14 + $0x188] sm:$0xf]  ;;  %v8201_v20 = vld [vmem:[%s12346_s14 + $0x1a0] sm:$0xf0] }
 0x32e   : > { %v7096_v25 = vor.u32 %v8201_v20, %v7095_v19  ;;  %v8278_v19 = vld [vmem:[%s12346_s14 + $0x408] sm:$0xf0] }
 0x330   : > { %3371 = vmatpush.bf16.msrb.mxu2 %v6792_v39  ;;  %3405 = vmatpush.bf16.msrb.mxu1 %v6752_v0  ;;  %v6848_v39 = vor.u32 %v8134_v17, %v6845_v38  ;;  %v8088_v0 = vld [vmem:[%s12344_s12 + $0x14] sm:$0xf0]  ;;  %v7319_v17 = vld [vmem:[%s12346_s14 + $0x348] sm:$0xf]  ;;  %v8257_v38 = vld [vmem:[%s12346_s14 + $0x360] sm:$0xf0] }
 0x334   : > { %3372 = vmatpush.bf16.msrb.mxu2 %v6776_v61  ;;  %v8126_v61 = vld [vmem:[%s12344_s12 + $0x14c] sm:$0xf] }
 0x39a   : > { %v2855_v5 = vpop.f32.mrf.mxu2 }
 0x39b   : > { %v2861_v11 = vmax.f32 %v2855_v5, 1e-30  ;;  %v8106_v5 = vld [vmem:[%s12344_s12 + $0xac] sm:$0xf] }
 0x39c   : > { %v6736_v8 = vor.u32 %v8106_v5, %v6733_v6  ;;  %v6795_v5 = vld [vmem:[%s12344_s12 + $0x128] sm:$0xf]  ;;  %v8122_v6 = vld [vmem:[%s12344_s12 + $0x12c] sm:$0xf] }
 0x39d   : > { %8425 = vrcp.f32 %v2861_v11  ;;  %v8142_v11 = vld [vmem:[%s12344_s12 + $0x1cc] sm:$0xf]  ;;  %v6800_v10 = vor.u32 %v8122_v6, %v6797_v9  ;;  %v8173_v6 = vld [vmem:[%s12346_s14 + $0xc0] sm:$0xf0] }
 0x39e   : > { %3406 = vmatpush.bf16.msrb.mxu1 %v6736_v8  ;;  %v6880_v12 = vor.u32 %v8142_v11, %v6877_v55  ;;  %v6779_v11 = vld [vmem:[%s12344_s12 + $0x108] sm:$0xf]  ;;  %v8118_v55 = vld [vmem:[%s12344_s12 + $0x10c] sm:$0xf]  ;;  %v8285_v9 = vld [vmem:[%s12346_s14 + $0x440] sm:$0xf0] }
 0x39f   : > { %v6784_v14 = vor.u32 %v8118_v55, %v6781_v13  ;;  %v8236_v55 = vld [vmem:[%s12346_s14 + $0x2b8] sm:$0xf0] }
 0x3a0   : > { %v8348_v13 = vld [vmem:[%s12346_s14 + $0x638] sm:$0xf0] }
 0x3a2   : > { %v2858_v33 = vpop.f32.mrf.mxu2  ;;  %3407 = vmatpush.bf16.msrb.mxu1 %v6720_v18 }
 0x3a3   : > { %v8426_v40 = vpop.eup %8425  ;;  %v2862_v42 = vmax.f32 %v2858_v33, 1e-30  ;;  %v8136_v33 = vld [vmem:[%s12344_s12 + $0x194] sm:$0xf0] }
 0x3a4   : > { %v2865_v44 = vmul.f32 %v8426_v40, %v10417_v56  ;;  %v8146_v56 = vld [vmem:[%s12344_s12 + $0x1ec] sm:$0xf]  ;;  %v6844_v34 = vor.u32 %v8136_v33, %v6843_v32  ;;  %v8096_v40 = vld [vmem:[%s12344_s12 + $0x54] sm:$0xf0] }
 0x3a5   : > { %8427 = vrcp.f32 %v2862_v42  ;;  %v6896_v41 = vor.u32 %v8146_v56, %v6893_v36  ;;  %v8094_v42 = vld [vmem:[%s12344_s12 + $0x4c] sm:$0xf]  ;;  %v6684_v57 = vor.u32 %v8096_v40, %v6683_v51  ;;  %v6667_v56 = vld [vmem:[%s12344_s12 + $0x28] sm:$0xf]  ;;  %v8092_v36 = vld [vmem:[%s12344_s12 + $0x34] sm:$0xf0] }
 0x3a6   : > { %v2868_v50 = vpack.c.bf16 %v2865_v44, %v2865_v44  ;;  %3408 = vmatpush.bf16.msrb.mxu1 %v6704_v31  ;;  %v6688_v43 = vor.u32 %v8094_v42, %v6685_v28  ;;  %v6827_v44 = vld [vmem:[%s12344_s12 + $0x168] sm:$0xf]  ;;  %v6668_v52 = vor.u32 %v8092_v36, %v6667_v56  ;;  %v7515_v31 = vld [vmem:[%s12346_s14 + $0x4d0] sm:$0xf]  ;;  %v8306_v32 = vld [vmem:[%s12346_s14 + $0x4e8] sm:$0xf0]  ;;  %v7068_v42 = vor.u32 %v8194_v53, %v7067_v26 }
 0x3a7   : > { %v6828_v47 = vor.u32 %v8132_v46, %v6827_v44  ;;  %v8369_v51 = vld [vmem:[%s12346_s14 + $0x6e0] sm:$0xf0]  ;;  %v8187_v28 = vld [vmem:[%s12346_s14 + $0x130] sm:$0xf0]  ;;  %v7487_v46 = vld [vmem:[%s12346_s14 + $0x498] sm:$0xf] }
 0x3a8   : > { %6639 = vmatmul.msk.bf16.vlgmr.msra.gmra.mxu0 %vm2815_vm1, %v2868_v50  ;;  %6640 = vmatmul.msk.bf16.vlgmr.msra.gmra.mxu2 %vm2815_vm1, %v2868_v50  ;;  %v8090_v50 = vld [vmem:[%s12344_s12 + $0x2c] sm:$0xf]  ;;  %v7488_v59 = vor.u32 %v8299_v30, %v7487_v46  ;;  %v8159_v53 = vld [vmem:[%s12346_s14 + $0x50] sm:$0xf0]  ;;  %v7097_v46 = vld [vmem:[%s12346_s14 + $0x1a4] sm:$0xf0] }
 0x3a9   : > { %3391 = vmatpush.bf16.msra.mxu0 %v6892_v62  ;;  %3417 = vmatpush.bf16.msra.mxu2 %v6896_v41  ;;  %v6672_v60 = vor.u32 %v8090_v50, %v6669_v54  ;;  %v6813_v62 = vld [vmem:[%s12344_s12 + $0x158] sm:$0xf0]  ;;  %v6651_v41 = vld [vmem:[%s12344_s12 + $0x8] sm:$0xf]  ;;  %v8250_v36 = vld [vmem:[%s12346_s14 + $0x328] sm:$0xf0] }
 0x3aa   : > { %3409 = vmatpush.bf16.msrb.mxu1 %v6688_v43  ;;  %v6816_v63 = vor.u32 %v8126_v61, %v6813_v62  ;;  %v7516_v43 = vor.u32 %v8306_v32, %v7515_v31  ;;  %v7739_v50 = vld [vmem:[%s12346_s14 + $0x690] sm:$0xf]  ;;  %v8292_v61 = vld [vmem:[%s12346_s14 + $0x478] sm:$0xf0]  ;;  %v7375_v31 = vld [vmem:[%s12346_s14 + $0x3b8] sm:$0xf] }
 0x3ab   : > { %v8428_v1 = vpop.eup %8427  ;;  %v8271_v32 = vld [vmem:[%s12346_s14 + $0x3d0] sm:$0xf0] }
 0x3ac   : > { %v2866_v2 = vmul.f32 %v8428_v1, %v10421_v58  ;;  %v6732_v58 = vor.u32 %v8108_v4, %v6731_v3  ;;  %v8086_v1 = vld [vmem:[%s12344_s12 + $0xc] sm:$0xf]  ;;  %v6652_v3 = vor.u32 %v8088_v0, %v6651_v41  ;;  %v7292_v41 = vor.u32 %v8250_v36, %v7291_v48  ;;  %v8215_v48 = vld [vmem:[%s12346_s14 + $0x210] sm:$0xf0] }
 0x3ad   : > { %3392 = vmatpush.bf16.msra.mxu0 %v6876_v45  ;;  %3418 = vmatpush.bf16.msra.mxu2 %v6880_v12  ;;  %v8120_v45 = vld [vmem:[%s12344_s12 + $0x114] sm:$0xf0] }
 0x3ae   : > { %2867 = vst.msk [vmem:[%s10685_s2] sm:$0xff] %vm2815_vm1, %v2866_v2  ;;  %3380 = vmatpush.bf16.msra.mxu3 %v6732_v58  ;;  %v6653_v2 = vld [vmem:[%s12344_s12 + $0x18] sm:$0xf0]  ;;  %3410 = vmatpush.bf16.msrb.mxu1 %v6672_v60  ;;  %v8124_v58 = vld [vmem:[%s12344_s12 + $0x134] sm:$0xf0]  ;;  %v6780_v12 = vor.u32 %v8120_v45, %v6779_v11 }
 0x3af   : > { %v6656_v4 = vor.u32 %v8086_v1, %v6653_v2  ;;  %v6796_v8 = vor.u32 %v8124_v58, %v6795_v5  ;;  %v8180_v60 = vld [vmem:[%s12346_s14 + $0xf8] sm:$0xf0]  ;;  %v8243_v1 = vld [vmem:[%s12346_s14 + $0x2f0] sm:$0xf0]  ;;  %v7711_v2 = vld [vmem:[%s12346_s14 + $0x658] sm:$0xf] }
 0x3b0   : > { %v6983_v5 = vld [vmem:[%s12346_s14 + $0xa8] sm:$0xf]  ;;  %v7235_v11 = vld [vmem:[%s12346_s14 + $0x2a0] sm:$0xf] }
 0x3b1   : > { %3393 = vmatpush.bf16.msra.mxu0 %v6860_v22  ;;  %3419 = vmatpush.bf16.msra.mxu2 %v6864_v24  ;;  %v2876_v22 = vperm.slane %v2873_v15, 1  ;;  %v8313_v24 = vld [vmem:[%s12346_s14 + $0x520] sm:$0xf0]  ;;  %v7236_v20 = vor.u32 %v8236_v55, %v7235_v11  ;;  %v8264_v11 = vld [vmem:[%s12346_s14 + $0x398] sm:$0xf0] }
 0x3b2   : > { %3381 = vmatpush.bf16.msra.mxu3 %v6716_v16  ;;  %3411 = vmatpush.bf16.msrb.mxu1 %v6656_v4  ;;  %v2875_v16 = vperm.slane %v2873_v15, 0  ;;  %v7544_v27 = vor.u32 %v8313_v24, %v7543_v23  ;;  %v7012_v4 = vor.u32 %v8180_v60, %v7011_v35  ;;  %v6955_v15 = vld [vmem:[%s12346_s14 + $0x70] sm:$0xf]  ;;  %v8229_v23 = vld [vmem:[%s12346_s14 + $0x280] sm:$0xf0] }
 0x3b3   : > { %v7655_v24 = vld [vmem:[%s12346_s14 + $0x5e8] sm:$0xf]  ;;  %v8208_v35 = vld [vmem:[%s12346_s14 + $0x1d8] sm:$0xf0] }
 0x3b4   : > { %v7321_v60 = vld [vmem:[%s12346_s14 + $0x364] sm:$0xf0] }
 0x3b5   : > { %3394 = vmatpush.bf16.msra.mxu0 %v6844_v34  ;;  %3420 = vmatpush.bf16.msra.mxu2 %v6848_v39  ;;  %v7767_v39 = vld [vmem:[%s12346_s14 + $0x6c8] sm:$0xf] }
 0x3b6   : > { %3382 = vmatpush.bf16.msra.mxu3 %v6700_v29 }
 0x3b9   : > { %3395 = vmatpush.bf16.msra.mxu0 %v6828_v47  ;;  %3421 = vmatpush.bf16.msra.mxu2 %v6832_v49  ;;  %v7320_v47 = vor.u32 %v8257_v38, %v7319_v17  ;;  %v7768_v49 = vor.u32 %v8369_v51, %v7767_v39  ;;  %v7179_v17 = vld [vmem:[%s12346_s14 + $0x230] sm:$0xf]  ;;  %v8222_v38 = vld [vmem:[%s12346_s14 + $0x248] sm:$0xf0] }
 0x3ba   : > { %3383 = vmatpush.bf16.msra.mxu3 %v6684_v57  ;;  %v7039_v57 = vld [vmem:[%s12346_s14 + $0x118] sm:$0xf]  ;;  %v7627_v39 = vld [vmem:[%s12346_s14 + $0x5b0] sm:$0xf]  ;;  %v8334_v51 = vld [vmem:[%s12346_s14 + $0x5c8] sm:$0xf0] }
 0x3bb   : > { %v7040_v54 = vor.u32 %v8187_v28, %v7039_v57  ;;  %v6899_v57 = vld [vmem:[%s12346_s14] sm:$0xf]  ;;  %v8152_v28 = vld [vmem:[%s12346_s14 + $0x18] sm:$0xf0]  ;;  %v7628_v30 = vor.u32 %v8334_v51, %v7627_v39  ;;  %v7769_v39 = vld [vmem:[%s12346_s14 + $0x6e4] sm:$0xf0] }
 0x3bd   : > { %3396 = vmatpush.bf16.msra.mxu0 %v6812_v37  ;;  %3422 = vmatpush.bf16.msra.mxu2 %v6816_v63  ;;  %v7459_v37 = vld [vmem:[%s12346_s14 + $0x460] sm:$0xf]  ;;  %v7263_v63 = vld [vmem:[%s12346_s14 + $0x2d8] sm:$0xf] }
 0x3be   : > { %3384 = vmatpush.bf16.msra.mxu3 %v6668_v52  ;;  %v8362_v52 = vld [vmem:[%s12346_s14 + $0x6a8] sm:$0xf0]  ;;  %v7460_v58 = vor.u32 %v8292_v61, %v7459_v37 }
 0x3bf   : > { %v7740_v0 = vor.u32 %v8362_v52, %v7739_v50  ;;  %v8191_v50 = vld [vmem:[%s12346_s14 + $0x154] sm:$0xf]  ;;  %v7069_v52 = vld [vmem:[%s12346_s14 + $0x16c] sm:$0xf0] }
 0x3c0   : > { %v7072_v37 = vor.u32 %v8191_v50, %v7069_v52  ;;  %v6901_v50 = vld [vmem:[%s12346_s14 + $0x1c] sm:$0xf0]  ;;  %v8212_v52 = vld [vmem:[%s12346_s14 + $0x1fc] sm:$0xf] }
 0x3c1   : > { %3397 = vmatpush.bf16.msra.mxu0 %v6796_v8  ;;  %3423 = vmatpush.bf16.msra.mxu2 %v6800_v10  ;;  %v7431_v8 = vld [vmem:[%s12346_s14 + $0x428] sm:$0xf]  ;;  %v7264_v10 = vor.u32 %v8243_v1, %v7263_v63  ;;  %v7293_v1 = vld [vmem:[%s12346_s14 + $0x32c] sm:$0xf0] }
 0x3c2   : > { %3385 = vmatpush.bf16.msra.mxu3 %v6652_v3  ;;  %v8355_v3 = vld [vmem:[%s12346_s14 + $0x670] sm:$0xf0] }
 0x3c3   : > { %v7712_v45 = vor.u32 %v8355_v3, %v7711_v2  ;;  %v8177_v3 = vld [vmem:[%s12346_s14 + $0xe4] sm:$0xf] }
 0x3c5   : > { %3398 = vmatpush.bf16.msra.mxu0 %v6780_v12  ;;  %3424 = vmatpush.bf16.msra.mxu2 %v6784_v14  ;;  %v7683_v12 = vld [vmem:[%s12346_s14 + $0x620] sm:$0xf]  ;;  %v6984_v14 = vor.u32 %v8173_v6, %v6983_v5  ;;  %v7265_v6 = vld [vmem:[%s12346_s14 + $0x2f4] sm:$0xf0] }
 0x425   : > { %v2911_v7 = vpop.f32.mrf.mxu0 }
 0x426   : > { %v2912_v18 = vadd.f32 %v2911_v7, %v2875_v16  ;;  %v7432_v16 = vor.u32 %v8285_v9, %v7431_v8  ;;  %v8166_v7 = vld [vmem:[%s12346_s14 + $0x88] sm:$0xf0] }
 0x427   : > { %v6956_v26 = vor.u32 %v8166_v7, %v6955_v15  ;;  %v8233_v7 = vld [vmem:[%s12346_s14 + $0x2a4] sm:$0xf] }
 0x428   : > { %v2928_v21 = vmax.f32 %v2912_v18, 0.0  ;;  %v7403_v18 = vld [vmem:[%s12346_s14 + $0x3f0] sm:$0xf] }
 0x42a   : > { %v10863_v29 = vpack.c.bf16 %v2928_v21, %v2928_v21  ;;  %v7207_v21 = vld [vmem:[%s12346_s14 + $0x268] sm:$0xf] }
 0x42b   : > { %v2924_v33 = vpop.f32.mrf.mxu2 }
 0x42c   : > { %v2925_v34 = vadd.f32 %v2924_v33, %v2876_v22  ;;  %3334 = vmatmul.bf16.vlgmr.msrb.gmra.mxu3 %v10863_v29  ;;  %3360 = vmatmul.bf16.vlgmr.msra.gmra.mxu1 %v10863_v29  ;;  %v7684_v22 = vor.u32 %v8348_v13, %v7683_v12  ;;  %v7208_v33 = vor.u32 %v8229_v23, %v7207_v21  ;;  %v8327_v12 = vld [vmem:[%s12346_s14 + $0x590] sm:$0xf0]  ;;  %v8170_v13 = vld [vmem:[%s12346_s14 + $0xac] sm:$0xf]  ;;  %v7545_v21 = vld [vmem:[%s12346_s14 + $0x524] sm:$0xf0] }
 0x42d   : > { %v2913_v40 = vpop.f32.mrf.mxu0  ;;  %4862 = vmatpush.bf16.msrb.mxu3 %v7096_v25  ;;  %4888 = vmatpush.bf16.msra.mxu1 %v7544_v27  ;;  %v8341_v25 = vld [vmem:[%s12346_s14 + $0x600] sm:$0xf0]  ;;  %v6927_v27 = vld [vmem:[%s12346_s14 + $0x38] sm:$0xf]  ;;  %v8320_v23 = vld [vmem:[%s12346_s14 + $0x558] sm:$0xf0] }
 0x42e   : > { %v2929_v44 = vmax.f32 %v2925_v34, 0.0  ;;  %v7656_v34 = vor.u32 %v8341_v25, %v7655_v24  ;;  %v6928_v40 = vor.u32 %v8159_v53, %v6927_v27  ;;  %v6957_v27 = vld [vmem:[%s12346_s14 + $0x8c] sm:$0xf0] }
 0x430   : > { %v10903_v56 = vpack.c.bf16 %v2929_v44, %v2929_v44  ;;  %v8198_v44 = vld [vmem:[%s12346_s14 + $0x18c] sm:$0xf] }
 0x431   : > { %4863 = vmatpush.bf16.msrb.mxu3 %v7068_v42  ;;  %4889 = vmatpush.bf16.msra.mxu1 %v7516_v43  ;;  %v7376_v42 = vor.u32 %v8271_v32, %v7375_v31  ;;  %v7180_v43 = vor.u32 %v8222_v38, %v7179_v17  ;;  %v7209_v31 = vld [vmem:[%s12346_s14 + $0x284] sm:$0xf0]  ;;  %v8303_v32 = vld [vmem:[%s12346_s14 + $0x4d4] sm:$0xf]  ;;  %v8366_v38 = vld [vmem:[%s12346_s14 + $0x6cc] sm:$0xf] }
 0x432   : > { %3347 = vmatmul.bf16.vlgmr.msrb.gmra.mxu0 %v10903_v56  ;;  %3373 = vmatmul.bf16.vlgmr.msrb.gmra.mxu2 %v10903_v56  ;;  %v7772_v51 = vor.u32 %v8366_v38, %v7769_v39 }
 0x433   : > { %v2926_v62 = vpop.f32.mrf.mxu2  ;;  %4875 = vmatpush.bf16.msrb.mxu0 %v7320_v47  ;;  %4901 = vmatpush.bf16.msrb.mxu2 %v7768_v49  ;;  %v7151_v47 = vld [vmem:[%s12346_s14 + $0x1f8] sm:$0xf]  ;;  %v6900_v49 = vor.u32 %v8152_v28, %v6899_v57  ;;  %v8219_v57 = vld [vmem:[%s12346_s14 + $0x234] sm:$0xf] }
 0x434   : > { %v7152_v36 = vor.u32 %v8215_v48, %v7151_v47  ;;  %v8184_v62 = vld [vmem:[%s12346_s14 + $0x11c] sm:$0xf]  ;;  %v8359_v48 = vld [vmem:[%s12346_s14 + $0x694] sm:$0xf] }
 0x435   : > { %4864 = vmatpush.bf16.msrb.mxu3 %v7040_v54  ;;  %4890 = vmatpush.bf16.msra.mxu1 %v7488_v59  ;;  %v7123_v54 = vld [vmem:[%s12346_s14 + $0x1c0] sm:$0xf]  ;;  %v8254_v59 = vld [vmem:[%s12346_s14 + $0x34c] sm:$0xf] }
 0x436   : > { %v7124_v61 = vor.u32 %v8208_v35, %v7123_v54  ;;  %v7324_v63 = vor.u32 %v8254_v59, %v7321_v60  ;;  %v7153_v35 = vld [vmem:[%s12346_s14 + $0x214] sm:$0xf0]  ;;  %v8289_v59 = vld [vmem:[%s12346_s14 + $0x464] sm:$0xf]  ;;  %v7461_v60 = vld [vmem:[%s12346_s14 + $0x47c] sm:$0xf0] }
 0x437   : > { %4876 = vmatpush.bf16.msrb.mxu0 %v7292_v41  ;;  %4902 = vmatpush.bf16.msrb.mxu2 %v7740_v0  ;;  %v7041_v41 = vld [vmem:[%s12346_s14 + $0x134] sm:$0xf0]  ;;  %v8247_v0 = vld [vmem:[%s12346_s14 + $0x314] sm:$0xf] }
 0x438   : > { %v7044_v2 = vor.u32 %v8184_v62, %v7041_v41  ;;  %v7296_v5 = vor.u32 %v8247_v0, %v7293_v1  ;;  %v8352_v62 = vld [vmem:[%s12346_s14 + $0x65c] sm:$0xf]  ;;  %v7713_v41 = vld [vmem:[%s12346_s14 + $0x674] sm:$0xf0]  ;;  %v8205_v0 = vld [vmem:[%s12346_s14 + $0x1c4] sm:$0xf] }
 0x439   : > { %4865 = vmatpush.bf16.msrb.mxu3 %v7012_v4  ;;  %4891 = vmatpush.bf16.msra.mxu1 %v7460_v58  ;;  %v7013_v4 = vld [vmem:[%s12346_s14 + $0xfc] sm:$0xf0]  ;;  %v8240_v58 = vld [vmem:[%s12346_s14 + $0x2dc] sm:$0xf] }
 0x43a   : > { %v7016_v8 = vor.u32 %v8177_v3, %v7013_v4  ;;  %v7268_v9 = vor.u32 %v8240_v58, %v7265_v6  ;;  %v7125_v1 = vld [vmem:[%s12346_s14 + $0x1dc] sm:$0xf0]  ;;  %v8282_v3 = vld [vmem:[%s12346_s14 + $0x42c] sm:$0xf]  ;;  %v7433_v4 = vld [vmem:[%s12346_s14 + $0x444] sm:$0xf0] }
 0x43b   : > { %4877 = vmatpush.bf16.msrb.mxu0 %v7264_v10  ;;  %4903 = vmatpush.bf16.msrb.mxu2 %v7712_v45  ;;  %v7347_v10 = vld [vmem:[%s12346_s14 + $0x380] sm:$0xf]  ;;  %v7599_v45 = vld [vmem:[%s12346_s14 + $0x578] sm:$0xf]  ;;  %v7436_v58 = vor.u32 %v8282_v3, %v7433_v4  ;;  %v8181_v3 = vld [vmem:[%s12346_s14 + $0x100] sm:$0xf0] }
 0x43c   : > { %3386 = vmatmul.bf16.vlgmr.msra.gmra.mxu3 %v10863_v29  ;;  %3412 = vmatmul.bf16.vlgmr.msrb.gmra.mxu1 %v10863_v29  ;;  %v7404_v29 = vor.u32 %v8278_v19, %v7403_v18  ;;  %v7348_v55 = vor.u32 %v8264_v11, %v7347_v10  ;;  %v7600_v15 = vor.u32 %v8327_v12, %v7599_v45  ;;  %v7237_v18 = vld [vmem:[%s12346_s14 + $0x2bc] sm:$0xf0]  ;;  %v8310_v19 = vld [vmem:[%s12346_s14 + $0x50c] sm:$0xf]  ;;  %v7405_v10 = vld [vmem:[%s12346_s14 + $0x40c] sm:$0xf0] }
 0x43d   : > { %4866 = vmatpush.bf16.msrb.mxu3 %v6984_v14  ;;  %4892 = vmatpush.bf16.msra.mxu1 %v7432_v16  ;;  %v6985_v14 = vld [vmem:[%s12346_s14 + $0xc4] sm:$0xf0]  ;;  %v7548_v24 = vor.u32 %v8310_v19, %v7545_v21  ;;  %v7685_v6 = vld [vmem:[%s12346_s14 + $0x63c] sm:$0xf0]  ;;  %v8338_v45 = vld [vmem:[%s12346_s14 + $0x5ec] sm:$0xf] }
 0x43e   : > { %v6988_v16 = vor.u32 %v8170_v13, %v6985_v14  ;;  %v8268_v13 = vld [vmem:[%s12346_s14 + $0x3bc] sm:$0xf]  ;;  %v7377_v14 = vld [vmem:[%s12346_s14 + $0x3d4] sm:$0xf0]  ;;  %v8261_v19 = vld [vmem:[%s12346_s14 + $0x384] sm:$0xf] }
 0x43f   : > { %4878 = vmatpush.bf16.msrb.mxu0 %v7236_v20  ;;  %4904 = vmatpush.bf16.msrb.mxu2 %v7684_v22  ;;  %v7240_v20 = vor.u32 %v8233_v7, %v7237_v18  ;;  %v7571_v22 = vld [vmem:[%s12346_s14 + $0x540] sm:$0xf]  ;;  %v7629_v7 = vld [vmem:[%s12346_s14 + $0x5cc] sm:$0xf0]  ;;  %v8324_v21 = vld [vmem:[%s12346_s14 + $0x57c] sm:$0xf] }
 0x440   : > { %v7572_v25 = vor.u32 %v8320_v23, %v7571_v22  ;;  %v7601_v23 = vld [vmem:[%s12346_s14 + $0x594] sm:$0xf0]  ;;  %v7271_v4 = vld [vmem:[%s12346_s14 + $0x2e0] sm:$0xf] }
 0x441   : > { %4867 = vmatpush.bf16.msrb.mxu3 %v6956_v26  ;;  %4893 = vmatpush.bf16.msra.mxu1 %v7404_v29  ;;  %v8163_v26 = vld [vmem:[%s12346_s14 + $0x74] sm:$0xf]  ;;  %v8226_v29 = vld [vmem:[%s12346_s14 + $0x26c] sm:$0xf] }
 0x442   : > { %3399 = vmatmul.bf16.vlgmr.msra.gmra.mxu0 %v10903_v56  ;;  %3425 = vmatmul.bf16.vlgmr.msra.gmra.mxu2 %v10903_v56  ;;  %v7100_v56 = vor.u32 %v8198_v44, %v7097_v46  ;;  %v6960_v53 = vor.u32 %v8163_v26, %v6957_v27  ;;  %v7212_v17 = vor.u32 %v8226_v29, %v7209_v31  ;;  %v8296_v44 = vld [vmem:[%s12346_s14 + $0x49c] sm:$0xf]  ;;  %v7489_v46 = vld [vmem:[%s12346_s14 + $0x4b4] sm:$0xf0]  ;;  %v8317_v26 = vld [vmem:[%s12346_s14 + $0x544] sm:$0xf] }
 0x443   : > { %4879 = vmatpush.bf16.msrb.mxu0 %v7208_v33  ;;  %4905 = vmatpush.bf16.msrb.mxu2 %v7656_v34  ;;  %v7517_v33 = vld [vmem:[%s12346_s14 + $0x4ec] sm:$0xf0]  ;;  %v7492_v47 = vor.u32 %v8296_v44, %v7489_v46  ;;  %v7573_v27 = vld [vmem:[%s12346_s14 + $0x55c] sm:$0xf0]  ;;  %v7075_v44 = vld [vmem:[%s12346_s14 + $0x158] sm:$0xf] }
 0x444   : > { %v7520_v34 = vor.u32 %v8303_v32, %v7517_v33  ;;  %v11247_v29 = vld [vmem:[%s12345_s13] sm:$0xf] }
 0x445   : > { %4868 = vmatpush.bf16.msrb.mxu3 %v6928_v40  ;;  %4894 = vmatpush.bf16.msra.mxu1 %v7376_v42  ;;  %v8156_v40 = vld [vmem:[%s12346_s14 + $0x3c] sm:$0xf]  ;;  %v6929_v42 = vld [vmem:[%s12346_s14 + $0x54] sm:$0xf0]  ;;  %v2998_v31 = vperm.slane %v11247_v29, 0 }
 0x446   : > { %v6932_v28 = vor.u32 %v8156_v40, %v6929_v42  ;;  %v8202_v40 = vld [vmem:[%s12346_s14 + $0x1a8] sm:$0xf0] }
 0x447   : > { %4880 = vmatpush.bf16.msrb.mxu0 %v7180_v43  ;;  %4906 = vmatpush.bf16.msrb.mxu2 %v7628_v30  ;;  %v7181_v43 = vld [vmem:[%s12346_s14 + $0x24c] sm:$0xf0] }
 0x448   : > { %v7184_v30 = vor.u32 %v8219_v57, %v7181_v43 }
 0x449   : > { %4869 = vmatpush.bf16.msrb.mxu3 %v6900_v49  ;;  %4895 = vmatpush.bf16.msra.mxu1 %v7348_v55  ;;  %v7741_v49 = vld [vmem:[%s12346_s14 + $0x6ac] sm:$0xf0]  ;;  %v7657_v55 = vld [vmem:[%s12346_s14 + $0x604] sm:$0xf0] }
 0x44a   : > { %v7660_v12 = vor.u32 %v8338_v45, %v7657_v55  ;;  %v6991_v55 = vld [vmem:[%s12346_s14 + $0xb0] sm:$0xf] }
 0x44b   : > { %4881 = vmatpush.bf16.msrb.mxu0 %v7152_v36  ;;  %4907 = vmatpush.bf16.msrb.mxu2 %v7600_v15  ;;  %v8149_v36 = vld [vmem:[%s12346_s14 + $0x4] sm:$0xf]  ;;  %v8331_v15 = vld [vmem:[%s12346_s14 + $0x5b4] sm:$0xf] }
 0x44c   : > { %v6904_v54 = vor.u32 %v8149_v36, %v6901_v50  ;;  %v7632_v18 = vor.u32 %v8331_v15, %v7629_v7  ;;  %v8237_v15 = vld [vmem:[%s12346_s14 + $0x2c0] sm:$0xf0]  ;;  %v8314_v7 = vld [vmem:[%s12346_s14 + $0x528] sm:$0xf0] }
 0x44d   : > { %4914 = vmatpush.bf16.msra.mxu3 %v7100_v56  ;;  %4940 = vmatpush.bf16.msrb.mxu1 %v7548_v24  ;;  %v7744_v56 = vor.u32 %v8359_v48, %v7741_v49  ;;  %v7604_v24 = vor.u32 %v8324_v21, %v7601_v23  ;;  %v7327_v48 = vld [vmem:[%s12346_s14 + $0x350] sm:$0xf]  ;;  %v8258_v49 = vld [vmem:[%s12346_s14 + $0x368] sm:$0xf0]  ;;  %v6963_v23 = vld [vmem:[%s12346_s14 + $0x78] sm:$0xf] }
 0x44f   : > { %4882 = vmatpush.bf16.msrb.mxu0 %v7124_v61  ;;  %4908 = vmatpush.bf16.msrb.mxu2 %v7572_v25  ;;  %v7464_v61 = vor.u32 %v8289_v59, %v7461_v60  ;;  %v7047_v59 = vld [vmem:[%s12346_s14 + $0x120] sm:$0xf] }
 0x451   : > { %4915 = vmatpush.bf16.msra.mxu3 %v7072_v37  ;;  %4941 = vmatpush.bf16.msrb.mxu1 %v7520_v34  ;;  %v7156_v37 = vor.u32 %v8212_v52, %v7153_v35  ;;  %v7328_v35 = vor.u32 %v8258_v49, %v7327_v48  ;;  %v7495_v48 = vld [vmem:[%s12346_s14 + $0x4a0] sm:$0xf]  ;;  %v8300_v49 = vld [vmem:[%s12346_s14 + $0x4b8] sm:$0xf0] }
 0x453   : > { %4927 = vmatpush.bf16.msra.mxu0 %v7324_v63  ;;  %4953 = vmatpush.bf16.msra.mxu2 %v7772_v51  ;;  %v7716_v63 = vor.u32 %v8352_v62, %v7713_v41  ;;  %v7103_v51 = vld [vmem:[%s12346_s14 + $0x190] sm:$0xf]  ;;  %v8251_v62 = vld [vmem:[%s12346_s14 + $0x330] sm:$0xf0]  ;;  %v3000_v41 = vperm.slane %v11247_v29, 2 }
 0x454   : > { %v7104_v43 = vor.u32 %v8202_v40, %v7103_v51 }
 0x455   : > { %4916 = vmatpush.bf16.msra.mxu3 %v7044_v2  ;;  %4942 = vmatpush.bf16.msrb.mxu1 %v7492_v47  ;;  %v7128_v2 = vor.u32 %v8205_v0, %v7125_v1  ;;  %v8195_v47 = vld [vmem:[%s12346_s14 + $0x170] sm:$0xf0] }
 0x457   : > { %4928 = vmatpush.bf16.msra.mxu0 %v7296_v5  ;;  %4954 = vmatpush.bf16.msra.mxu2 %v7744_v56  ;;  %v8345_v5 = vld [vmem:[%s12346_s14 + $0x624] sm:$0xf] }
 0x459   : > { %4917 = vmatpush.bf16.msra.mxu3 %v7016_v8  ;;  %4943 = vmatpush.bf16.msrb.mxu1 %v7464_v61  ;;  %v7688_v8 = vor.u32 %v8345_v5, %v7685_v6  ;;  %v7299_v61 = vld [vmem:[%s12346_s14 + $0x318] sm:$0xf]  ;;  %v8244_v5 = vld [vmem:[%s12346_s14 + $0x2f8] sm:$0xf0] }
 0x45a   : > { %v7300_v1 = vor.u32 %v8251_v62, %v7299_v61  ;;  %v7272_v45 = vor.u32 %v8244_v5, %v7271_v4  ;;  %v7159_v62 = vld [vmem:[%s12346_s14 + $0x200] sm:$0xf]  ;;  %v7105_v4 = vld [vmem:[%s12346_s14 + $0x1ac] sm:$0xf0] }
 0x45b   : > { %4929 = vmatpush.bf16.msra.mxu0 %v7268_v9  ;;  %4955 = vmatpush.bf16.msra.mxu2 %v7716_v63  ;;  %v8275_v9 = vld [vmem:[%s12346_s14 + $0x3f4] sm:$0xf] }
 0x45c   : > { %v7408_v11 = vor.u32 %v8275_v9, %v7405_v10 }
 0x45d   : > { %4918 = vmatpush.bf16.msra.mxu3 %v6988_v16  ;;  %4944 = vmatpush.bf16.msrb.mxu1 %v7436_v58  ;;  %v7380_v16 = vor.u32 %v8268_v13, %v7377_v14  ;;  %v8174_v13 = vld [vmem:[%s12346_s14 + $0xc8] sm:$0xf0]  ;;  %v7243_v14 = vld [vmem:[%s12346_s14 + $0x2a8] sm:$0xf] }
 0x45e   : > { %v6992_v21 = vor.u32 %v8174_v13, %v6991_v55  ;;  %v8349_v13 = vld [vmem:[%s12346_s14 + $0x640] sm:$0xf0] }
 0x45f   : > { %4930 = vmatpush.bf16.msra.mxu0 %v7240_v20  ;;  %4956 = vmatpush.bf16.msra.mxu2 %v7688_v8  ;;  %v7349_v20 = vld [vmem:[%s12346_s14 + $0x39c] sm:$0xf0]  ;;  %v3001_v8 = vperm.slane %v11247_v29, 3 }
 0x460   : > { %v7352_v22 = vor.u32 %v8261_v19, %v7349_v20 }
 0x461   : > { %4919 = vmatpush.bf16.msra.mxu3 %v6960_v53  ;;  %4945 = vmatpush.bf16.msrb.mxu1 %v7408_v11  ;;  %v7576_v53 = vor.u32 %v8317_v26, %v7573_v27 }
 0x463   : > { %4931 = vmatpush.bf16.msra.mxu0 %v7212_v17  ;;  %4957 = vmatpush.bf16.msra.mxu2 %v7660_v12  ;;  %v2999_v17 = vperm.slane %v11247_v29, 1  ;;  %v7215_v29 = vld [vmem:[%s12346_s14 + $0x270] sm:$0xf] }
 0x465   : > { %4920 = vmatpush.bf16.msra.mxu3 %v6932_v28  ;;  %4946 = vmatpush.bf16.msrb.mxu1 %v7380_v16  ;;  %v7551_v16 = vld [vmem:[%s12346_s14 + $0x510] sm:$0xf] }
 0x466   : > { %v7552_v27 = vor.u32 %v8314_v7, %v7551_v16  ;;  %v8255_v16 = vld [vmem:[%s12346_s14 + $0x354] sm:$0xf]  ;;  %v7329_v7 = vld [vmem:[%s12346_s14 + $0x36c] sm:$0xf0] }
 0x467   : > { %4932 = vmatpush.bf16.msra.mxu0 %v7184_v30  ;;  %4958 = vmatpush.bf16.msra.mxu2 %v7632_v18 }
 0x469   : > { %4921 = vmatpush.bf16.msra.mxu3 %v6904_v54  ;;  %4947 = vmatpush.bf16.msrb.mxu1 %v7352_v22  ;;  %v7076_v54 = vor.u32 %v8195_v47, %v7075_v44  ;;  %v7244_v22 = vor.u32 %v8237_v15, %v7243_v14  ;;  %v8223_v47 = vld [vmem:[%s12346_s14 + $0x250] sm:$0xf0]  ;;  %v8192_v14 = vld [vmem:[%s12346_s14 + $0x15c] sm:$0xf]  ;;  %v7077_v15 = vld [vmem:[%s12346_s14 + $0x174] sm:$0xf0] }
 0x46b   : > { %4933 = vmatpush.bf16.msra.mxu0 %v7156_v37  ;;  %4959 = vmatpush.bf16.msra.mxu2 %v7604_v24  ;;  %v8188_v37 = vld [vmem:[%s12346_s14 + $0x138] sm:$0xf0]  ;;  %v8167_v24 = vld [vmem:[%s12346_s14 + $0x90] sm:$0xf0] }
 0x46c   : > { %v7048_v0 = vor.u32 %v8188_v37, %v7047_v59  ;;  %v6964_v51 = vor.u32 %v8167_v24, %v6963_v23  ;;  %v8153_v59 = vld [vmem:[%s12346_s14 + $0x20] sm:$0xf0]  ;;  %v7496_v37 = vor.u32 %v8300_v49, %v7495_v48  ;;  %v7080_v23 = vor.u32 %v8192_v14, %v7077_v15  ;;  %v7355_v49 = vld [vmem:[%s12346_s14 + $0x388] sm:$0xf] }
 0x46d   : > { %v7332_v24 = vor.u32 %v8255_v16, %v7329_v7  ;;  %v8157_v15 = vld [vmem:[%s12346_s14 + $0x44] sm:$0xf]  ;;  %v6937_v16 = vld [vmem:[%s12346_s14 + $0x5c] sm:$0xf0] }
 0x46f   : > { %4934 = vmatpush.bf16.msra.mxu0 %v7128_v2  ;;  %4960 = vmatpush.bf16.msra.mxu2 %v7576_v53  ;;  %v7019_v2 = vld [vmem:[%s12346_s14 + $0xe8] sm:$0xf]  ;;  %v8230_v53 = vld [vmem:[%s12346_s14 + $0x288] sm:$0xf0] }
 0x470   : > { %v7020_v11 = vor.u32 %v8181_v3, %v7019_v2  ;;  %v7216_v40 = vor.u32 %v8230_v53, %v7215_v29  ;;  %v8356_v2 = vld [vmem:[%s12346_s14 + $0x678] sm:$0xf0]  ;;  %v8199_v3 = vld [vmem:[%s12346_s14 + $0x194] sm:$0xf]  ;;  %v8185_v29 = vld [vmem:[%s12346_s14 + $0x124] sm:$0xf] }
 0x471   : > { %v7108_v55 = vor.u32 %v8199_v3, %v7105_v4  ;;  %v7049_v53 = vld [vmem:[%s12346_s14 + $0x13c] sm:$0xf0]  ;;  %v8321_v4 = vld [vmem:[%s12346_s14 + $0x560] sm:$0xf0] }
 0x4a9   : > { %v3361_v25 = vpop.f32.mrf.mxu1 }
 0x4aa   : > { %v3362_v42 = vadd.f32 %v3361_v25, %v2999_v17  ;;  %v8307_v17 = vld [vmem:[%s12346_s14 + $0x4f0] sm:$0xf0] }
 0x4af   : > { %v3335_v32 = vpop.f32.mrf.mxu3  ;;  %v3348_v33 = vpop.f32.mrf.mxu0 }
 0x4b0   : > { %v3336_v34 = vadd.f32 %v3335_v32, %v2998_v31  ;;  %v7523_v31 = vld [vmem:[%s12346_s14 + $0x4d8] sm:$0xf] }
 0x4b1   : > { %v3363_v38 = vpop.f32.mrf.mxu1 }
 0x4b2   : > { %v3349_v39 = vadd.f32 %v3348_v33, %v3336_v34  ;;  %v7775_v34 = vld [vmem:[%s12346_s14 + $0x6d0] sm:$0xf]  ;;  %v8370_v38 = vld [vmem:[%s12346_s14 + $0x6e8] sm:$0xf0] }
 0x4b3   : > { %v7776_v44 = vor.u32 %v8370_v38, %v7775_v34  ;;  %v7383_v34 = vld [vmem:[%s12346_s14 + $0x3c0] sm:$0xf]  ;;  %v8272_v38 = vld [vmem:[%s12346_s14 + $0x3d8] sm:$0xf0] }
 0x4b4   : > { %v3430_v57 = vmax.f32 %v3349_v39, 0.0 }
 0x4b5   : > { %v3374_v28 = vpop.f32.mrf.mxu2 }
 0x4b6   : > { %v11260_v46 = vpack.c.bf16 %v3430_v57, %v3430_v57  ;;  %v3375_v30 = vadd.f32 %v3374_v28, %v3362_v42  ;;  %v6935_v42 = vld [vmem:[%s12346_s14 + $0x40] sm:$0xf]  ;;  %v8160_v57 = vld [vmem:[%s12346_s14 + $0x58] sm:$0xf0] }
 0x4b7   : > { %v3337_v56 = vpop.f32.mrf.mxu3  ;;  %v3350_v36 = vpop.f32.mrf.mxu0 }
 0x4b8   : > { %v3431_v50 = vmax.f32 %v3375_v30, 0.0  ;;  %4870 = vmatmul.bf16.vlgmr.msrb.gmra.mxu3 %v11260_v46  ;;  %v7187_v30 = vld [vmem:[%s12346_s14 + $0x238] sm:$0xf]  ;;  %v8363_v36 = vld [vmem:[%s12346_s14 + $0x6b0] sm:$0xf0] }
 0x4b9   : > { %4966 = vmatpush.bf16.msrb.mxu3 %v7104_v43  ;;  %v3413_v52 = vpop.f32.mrf.mxu1  ;;  %v7524_v43 = vor.u32 %v8307_v17, %v7523_v31  ;;  %v7747_v56 = vld [vmem:[%s12346_s14 + $0x698] sm:$0xf]  ;;  %v8248_v31 = vld [vmem:[%s12346_s14 + $0x31c] sm:$0xf] }
 0x4ba   : > { %v11275_v60 = vpack.c.bf16 %v3431_v50, %v3431_v50  ;;  %v3414_v18 = vadd.f32 %v3413_v52, %v3001_v8  ;;  %v6936_v52 = vor.u32 %v8160_v57, %v6935_v42  ;;  %v7748_v61 = vor.u32 %v8363_v36, %v7747_v56  ;;  %v8335_v42 = vld [vmem:[%s12346_s14 + $0x5d0] sm:$0xf0]  ;;  %v8178_v57 = vld [vmem:[%s12346_s14 + $0xec] sm:$0xf]  ;;  %v8265_v56 = vld [vmem:[%s12346_s14 + $0x3a0] sm:$0xf0] }
 0x4bc   : > { %4883 = vmatmul.bf16.vlgmr.msrb.gmra.mxu0 %v11275_v60 }
 0x4bd   : > { %4967 = vmatpush.bf16.msrb.mxu3 %v7076_v54  ;;  %4979 = vmatpush.bf16.msrb.mxu0 %v7328_v35  ;;  %v3376_v63 = vpop.f32.mrf.mxu2  ;;  %v7188_v54 = vor.u32 %v8223_v47, %v7187_v30  ;;  %v6907_v35 = vld [vmem:[%s12346_s14 + $0x8] sm:$0xf]  ;;  %v7273_v30 = vld [vmem:[%s12346_s14 + $0x2fc] sm:$0xf0]  ;;  %v7384_v47 = vor.u32 %v8272_v38, %v7383_v34  ;;  %v8290_v34 = vld [vmem:[%s12346_s14 + $0x46c] sm:$0xf] }
 0x4be   : > { %v7467_v63 = vld [vmem:[%s12346_s14 + $0x468] sm:$0xf]  ;;  %v6908_v5 = vor.u32 %v8153_v59, %v6907_v35  ;;  %v8171_v35 = vld [vmem:[%s12346_s14 + $0xb4] sm:$0xf]  ;;  %v6993_v59 = vld [vmem:[%s12346_s14 + $0xcc] sm:$0xf0] }
 0x4bf   : > { %v3387_v58 = vpop.f32.mrf.mxu3  ;;  %v3400_v6 = vpop.f32.mrf.mxu0  ;;  %v7469_v38 = vld [vmem:[%s12346_s14 + $0x484] sm:$0xf0] }
 0x4c0   : > { %v3388_v9 = vadd.f32 %v3387_v58, %v3000_v41  ;;  %v8216_v41 = vld [vmem:[%s12346_s14 + $0x218] sm:$0xf0] }
 0x4c1   : > { %4968 = vmatpush.bf16.msrb.mxu3 %v7048_v0  ;;  %4980 = vmatpush.bf16.msrb.mxu0 %v7300_v1  ;;  %v3415_v10 = vpop.f32.mrf.mxu1  ;;  %v8293_v0 = vld [vmem:[%s12346_s14 + $0x480] sm:$0xf0]  ;;  %v7719_v1 = vld [vmem:[%s12346_s14 + $0x660] sm:$0xf]  ;;  %v7160_v58 = vor.u32 %v8216_v41, %v7159_v62  ;;  %v8311_v62 = vld [vmem:[%s12346_s14 + $0x514] sm:$0xf] }
 0x4c2   : > { %v3401_v12 = vadd.f32 %v3400_v6, %v3388_v9  ;;  %v7131_v6 = vld [vmem:[%s12346_s14 + $0x1c8] sm:$0xf]  ;;  %v7468_v8 = vor.u32 %v8293_v0, %v7467_v63  ;;  %v7720_v9 = vor.u32 %v8356_v2, %v7719_v1  ;;  %v8209_v10 = vld [vmem:[%s12346_s14 + $0x1e0] sm:$0xf0]  ;;  %v7553_v41 = vld [vmem:[%s12346_s14 + $0x52c] sm:$0xf0]  ;;  %v7356_v63 = vor.u32 %v8265_v56, %v7355_v49 }
 0x4c3   : > { %v7579_v1 = vld [vmem:[%s12346_s14 + $0x548] sm:$0xf]  ;;  %v6996_v2 = vor.u32 %v8171_v35, %v6993_v59  ;;  %v8283_v49 = vld [vmem:[%s12346_s14 + $0x434] sm:$0xf]  ;;  %v7441_v56 = vld [vmem:[%s12346_s14 + $0x44c] sm:$0xf0] }
 0x4c4   : > { %v3432_v19 = vmax.f32 %v3401_v12, 0.0  ;;  %v7691_v12 = vld [vmem:[%s12346_s14 + $0x628] sm:$0xf]  ;;  %v8196_v35 = vld [vmem:[%s12346_s14 + $0x178] sm:$0xf0] }
 0x4c5   : > { %4969 = vmatpush.bf16.msrb.mxu3 %v7020_v11  ;;  %4981 = vmatpush.bf16.msrb.mxu0 %v7272_v45  ;;  %v3426_v20 = vpop.f32.mrf.mxu2  ;;  %v7439_v11 = vld [vmem:[%s12346_s14 + $0x430] sm:$0xf]  ;;  %v8286_v45 = vld [vmem:[%s12346_s14 + $0x448] sm:$0xf0]  ;;  %v7335_v59 = vld [vmem:[%s12346_s14 + $0x358] sm:$0xf] }
 0x4c6   : > { %v11325_v25 = vpack.c.bf16 %v3432_v19, %v3432_v19  ;;  %v3427_v26 = vadd.f32 %v3426_v20, %v3414_v18  ;;  %v7132_v18 = vor.u32 %v8209_v10, %v7131_v6  ;;  %v7440_v19 = vor.u32 %v8286_v45, %v7439_v11  ;;  %v8304_v10 = vld [vmem:[%s12346_s14 + $0x4dc] sm:$0xf]  ;;  %v7525_v11 = vld [vmem:[%s12346_s14 + $0x4f4] sm:$0xf0]  ;;  %v8367_v45 = vld [vmem:[%s12346_s14 + $0x6d4] sm:$0xf] }
 0x4c7   : > { %v3389_v32 = vpop.f32.mrf.mxu3  ;;  %v3402_v33 = vpop.f32.mrf.mxu0  ;;  %v7692_v20 = vor.u32 %v8349_v13, %v7691_v12  ;;  %v7556_v6 = vor.u32 %v8311_v62, %v7553_v41  ;;  %v7580_v12 = vor.u32 %v8321_v4, %v7579_v1  ;;  %v7528_v7 = vor.u32 %v8304_v10, %v7525_v11  ;;  %v7665_v4 = vld [vmem:[%s12346_s14 + $0x60c] sm:$0xf0]  ;;  %v8269_v11 = vld [vmem:[%s12346_s14 + $0x3c4] sm:$0xf] }
 0x4c8   : > { %v3433_v39 = vmax.f32 %v3427_v26, 0.0  ;;  %4896 = vmatmul.bf16.vlgmr.msra.gmra.mxu1 %v11325_v25  ;;  %4922 = vmatmul.bf16.vlgmr.msra.gmra.mxu3 %v11260_v46  ;;  %v7663_v26 = vld [vmem:[%s12346_s14 + $0x5f0] sm:$0xf]  ;;  %v7301_v32 = vld [vmem:[%s12346_s14 + $0x334] sm:$0xf0]  ;;  %v7444_v62 = vor.u32 %v8283_v49, %v7441_v56 }
 0x4c9   : > { %4970 = vmatpush.bf16.msrb.mxu3 %v6992_v21  ;;  %4982 = vmatpush.bf16.msrb.mxu0 %v7244_v22  ;;  %v7411_v21 = vld [vmem:[%s12346_s14 + $0x3f8] sm:$0xf]  ;;  %v8279_v22 = vld [vmem:[%s12346_s14 + $0x410] sm:$0xf0]  ;;  %v8308_v49 = vld [vmem:[%s12346_s14 + $0x4f8] sm:$0xf0] }
 0x4ca   : > { %v11353_v28 = vpack.c.bf16 %v3433_v39, %v3433_v39  ;;  %4992 = vmatpush.bf16.msra.mxu1 %v7552_v27  ;;  %v8342_v27 = vld [vmem:[%s12346_s14 + $0x608] sm:$0xf0]  ;;  %v7412_v33 = vor.u32 %v8279_v22, %v7411_v21  ;;  %v7052_v39 = vor.u32 %v8185_v29, %v7049_v53  ;;  %v8297_v21 = vld [vmem:[%s12346_s14 + $0x4a4] sm:$0xf]  ;;  %v7497_v22 = vld [vmem:[%s12346_s14 + $0x4bc] sm:$0xf0] }
 0x4cb   : > { %v7664_v17 = vor.u32 %v8342_v27, %v7663_v26  ;;  %v6940_v26 = vor.u32 %v8157_v15, %v6937_v16  ;;  %v8150_v29 = vld [vmem:[%s12346_s14 + $0xc] sm:$0xf]  ;;  %v6909_v53 = vld [vmem:[%s12346_s14 + $0x24] sm:$0xf0]  ;;  %v7027_v15 = vld [vmem:[%s12346_s14 + $0xf0] sm:$0xf] }
 0x4cc   : > { %4909 = vmatmul.bf16.vlgmr.msrb.gmra.mxu2 %v11353_v28  ;;  %4935 = vmatmul.bf16.vlgmr.msra.gmra.mxu0 %v11275_v60  ;;  %v8182_v16 = vld [vmem:[%s12346_s14 + $0x108] sm:$0xf0]  ;;  %v7783_v56 = vld [vmem:[%s12346_s14 + $0x6d8] sm:$0xf] }
 0x4cd   : > { %4971 = vmatpush.bf16.msrb.mxu3 %v6964_v51  ;;  %4983 = vmatpush.bf16.msrb.mxu0 %v7216_v40  ;;  %v3428_v50 = vpop.f32.mrf.mxu2  ;;  %v7304_v51 = vor.u32 %v8248_v31, %v7301_v32  ;;  %v7635_v40 = vld [vmem:[%s12346_s14 + $0x5b8] sm:$0xf]  ;;  %v7500_v31 = vor.u32 %v8297_v21, %v7497_v22  ;;  %v8262_v21 = vld [vmem:[%s12346_s14 + $0x38c] sm:$0xf]  ;;  %v7357_v22 = vld [vmem:[%s12346_s14 + $0x3a4] sm:$0xf0] }
 0x4ce   : > { %4993 = vmatpush.bf16.msra.mxu1 %v7524_v43  ;;  %5005 = vmatpush.bf16.msrb.mxu2 %v7776_v44  ;;  %v7021_v43 = vld [vmem:[%s12346_s14 + $0x104] sm:$0xf0]  ;;  %v8241_v44 = vld [vmem:[%s12346_s14 + $0x2e4] sm:$0xf]  ;;  %v7636_v48 = vor.u32 %v8335_v42, %v7635_v40  ;;  %v7111_v40 = vld [vmem:[%s12346_s14 + $0x198] sm:$0xf] }
 0x4cf   : > { %v7024_v36 = vor.u32 %v8178_v57, %v7021_v43  ;;  %v7276_v50 = vor.u32 %v8241_v44, %v7273_v30  ;;  %v8203_v42 = vld [vmem:[%s12346_s14 + $0x1b0] sm:$0xf0]  ;;  %v6912_v57 = vor.u32 %v8150_v29, %v6909_v53  ;;  %v8206_v44 = vld [vmem:[%s12346_s14 + $0x1cc] sm:$0xf]  ;;  %v7472_v30 = vor.u32 %v8290_v34, %v7469_v38  ;;  %v6999_v29 = vld [vmem:[%s12346_s14 + $0xb8] sm:$0xf] }
 0x4d0   : > { %v8175_v53 = vld [vmem:[%s12346_s14 + $0xd0] sm:$0xf0]  ;;  %v7360_v34 = vor.u32 %v8262_v21, %v7357_v22  ;;  %v7447_v21 = vld [vmem:[%s12346_s14 + $0x438] sm:$0xf] }
 0x4d1   : > { %4972 = vmatpush.bf16.msrb.mxu3 %v6936_v52  ;;  %4984 = vmatpush.bf16.msrb.mxu0 %v7188_v54  ;;  %v7607_v52 = vld [vmem:[%s12346_s14 + $0x580] sm:$0xf]  ;;  %v8328_v54 = vld [vmem:[%s12346_s14 + $0x598] sm:$0xf0]  ;;  %v8287_v22 = vld [vmem:[%s12346_s14 + $0x450] sm:$0xf0] }
 0x4d2   : > { %4994 = vmatpush.bf16.msra.mxu1 %v7496_v37  ;;  %5006 = vmatpush.bf16.msrb.mxu2 %v7748_v61  ;;  %v8234_v37 = vld [vmem:[%s12346_s14 + $0x2ac] sm:$0xf]  ;;  %v7245_v61 = vld [vmem:[%s12346_s14 + $0x2c4] sm:$0xf0]  ;;  %v7608_v0 = vor.u32 %v8328_v54, %v7607_v52  ;;  %v7083_v54 = vld [vmem:[%s12346_s14 + $0x160] sm:$0xf] }
 0x4d3   : > { %v7248_v3 = vor.u32 %v8234_v37, %v7245_v61  ;;  %v7693_v52 = vld [vmem:[%s12346_s14 + $0x644] sm:$0xf0]  ;;  %v8259_v37 = vld [vmem:[%s12346_s14 + $0x370] sm:$0xf0]  ;;  %v7084_v1 = vor.u32 %v8196_v35, %v7083_v54 }
 0x4d4   : > { %v6943_v35 = vld [vmem:[%s12346_s14 + $0x48] sm:$0xf] }
 0x4d5   : > { %4973 = vmatpush.bf16.msrb.mxu3 %v6908_v5  ;;  %4985 = vmatpush.bf16.msrb.mxu0 %v7160_v58  ;;  %v8164_v5 = vld [vmem:[%s12346_s14 + $0x7c] sm:$0xf]  ;;  %v6965_v58 = vld [vmem:[%s12346_s14 + $0x94] sm:$0xf0] }
 0x4d6   : > { %4995 = vmatpush.bf16.msra.mxu1 %v7468_v8  ;;  %5007 = vmatpush.bf16.msrb.mxu2 %v7720_v9  ;;  %v8227_v8 = vld [vmem:[%s12346_s14 + $0x274] sm:$0xf]  ;;  %v7217_v9 = vld [vmem:[%s12346_s14 + $0x28c] sm:$0xf0]  ;;  %v6968_v13 = vor.u32 %v8164_v5, %v6965_v58  ;;  %v7055_v5 = vld [vmem:[%s12346_s14 + $0x128] sm:$0xf] }
 0x4d7   : > { %v7220_v14 = vor.u32 %v8227_v8, %v7217_v9  ;;  %v8189_v58 = vld [vmem:[%s12346_s14 + $0x140] sm:$0xf0]  ;;  %v8252_v8 = vld [vmem:[%s12346_s14 + $0x338] sm:$0xf0] }
 0x4d8   : > { %4948 = vmatmul.bf16.vlgmr.msrb.gmra.mxu1 %v11325_v25  ;;  %4974 = vmatmul.bf16.vlgmr.msrb.gmra.mxu3 %v11260_v46 }
 0x4d9   : > { %5018 = vmatpush.bf16.msra.mxu3 %v7108_v55  ;;  %4986 = vmatpush.bf16.msrb.mxu0 %v7132_v18  ;;  %v7777_v55 = vld [vmem:[%s12346_s14 + $0x6ec] sm:$0xf0] }
 0x4da   : > { %4996 = vmatpush.bf16.msra.mxu1 %v7440_v19  ;;  %5008 = vmatpush.bf16.msrb.mxu2 %v7692_v20  ;;  %v7780_v18 = vor.u32 %v8367_v45, %v7777_v55  ;;  %v8220_v19 = vld [vmem:[%s12346_s14 + $0x23c] sm:$0xf]  ;;  %v7189_v20 = vld [vmem:[%s12346_s14 + $0x254] sm:$0xf0]  ;;  %v7385_v45 = vld [vmem:[%s12346_s14 + $0x3dc] sm:$0xf0]  ;;  %v7056_v55 = vor.u32 %v8189_v58, %v7055_v5 }
 0x4db   : > { %v7192_v27 = vor.u32 %v8220_v19, %v7189_v20  ;;  %v7388_v19 = vor.u32 %v8269_v11, %v7385_v45  ;;  %v6915_v5 = vld [vmem:[%s12346_s14 + $0x10] sm:$0xf]  ;;  %v8154_v58 = vld [vmem:[%s12346_s14 + $0x28] sm:$0xf0] }
 0x4dc   : > { %4961 = vmatmul.bf16.vlgmr.msra.gmra.mxu2 %v11353_v28  ;;  %4987 = vmatmul.bf16.vlgmr.msrb.gmra.mxu0 %v11275_v60  ;;  %v7475_v11 = vld [vmem:[%s12346_s14 + $0x470] sm:$0xf]  ;;  %v8294_v45 = vld [vmem:[%s12346_s14 + $0x488] sm:$0xf0] }
 0x4dd   : > { %5019 = vmatpush.bf16.msra.mxu3 %v7080_v23  ;;  %5031 = vmatpush.bf16.msra.mxu0 %v7332_v24  ;;  %v8360_v23 = vld [vmem:[%s12346_s14 + $0x69c] sm:$0xf]  ;;  %v7749_v24 = vld [vmem:[%s12346_s14 + $0x6b4] sm:$0xf0] }
 0x4de   : > { %4997 = vmatpush.bf16.msra.mxu1 %v7412_v33  ;;  %5009 = vmatpush.bf16.msrb.mxu2 %v7664_v17  ;;  %v7752_v32 = vor.u32 %v8360_v23, %v7749_v24  ;;  %v8213_v33 = vld [vmem:[%s12346_s14 + $0x204] sm:$0xf]  ;;  %v7161_v17 = vld [vmem:[%s12346_s14 + $0x21c] sm:$0xf0]  ;;  %v7028_v23 = vor.u32 %v8182_v16, %v7027_v15  ;;  %v6916_v15 = vor.u32 %v8154_v58, %v6915_v5  ;;  %v8172_v5 = vld [vmem:[%s12346_s14 + $0xbc] sm:$0xf] }
 0x4df   : > { %v7164_v43 = vor.u32 %v8213_v33, %v7161_v17  ;;  %v7559_v33 = vld [vmem:[%s12346_s14 + $0x518] sm:$0xf]  ;;  %v8315_v17 = vld [vmem:[%s12346_s14 + $0x530] sm:$0xf0] }
 0x4e0   : > { %v7001_v58 = vld [vmem:[%s12346_s14 + $0xd4] sm:$0xf0] }
 0x4e1   : > { %5020 = vmatpush.bf16.msra.mxu3 %v7052_v39  ;;  %5032 = vmatpush.bf16.msra.mxu0 %v7304_v51  ;;  %v8353_v39 = vld [vmem:[%s12346_s14 + $0x664] sm:$0xf]  ;;  %v7721_v51 = vld [vmem:[%s12346_s14 + $0x67c] sm:$0xf0] }
 0x4e2   : > { %4998 = vmatpush.bf16.msra.mxu1 %v7384_v47  ;;  %5010 = vmatpush.bf16.msrb.mxu2 %v7636_v48  ;;  %v7724_v47 = vor.u32 %v8353_v39, %v7721_v51  ;;  %v7133_v48 = vld [vmem:[%s12346_s14 + $0x1e4] sm:$0xf0]  ;;  %v8318_v39 = vld [vmem:[%s12346_s14 + $0x54c] sm:$0xf]  ;;  %v7000_v51 = vor.u32 %v8175_v53, %v6999_v29  ;;  %v7085_v29 = vld [vmem:[%s12346_s14 + $0x17c] sm:$0xf0] }
 0x4e3   : > { %v7136_v61 = vor.u32 %v8206_v44, %v7133_v48  ;;  %v7560_v44 = vor.u32 %v8315_v17, %v7559_v33  ;;  %v7531_v48 = vld [vmem:[%s12346_s14 + $0x4e0] sm:$0xf]  ;;  %v8256_v53 = vld [vmem:[%s12346_s14 + $0x35c] sm:$0xf]  ;;  %v7448_v33 = vor.u32 %v8287_v22, %v7447_v21 }
 0x4e4   : > { %v7533_v21 = vld [vmem:[%s12346_s14 + $0x4fc] sm:$0xf0]  ;;  %v8368_v22 = vld [vmem:[%s12346_s14 + $0x6dc] sm:$0xf] }
 0x4e5   : > { %5021 = vmatpush.bf16.msra.mxu3 %v7024_v36  ;;  %5033 = vmatpush.bf16.msra.mxu0 %v7276_v50  ;;  %v7112_v36 = vor.u32 %v8203_v42, %v7111_v40  ;;  %v8346_v50 = vld [vmem:[%s12346_s14 + $0x62c] sm:$0xf]  ;;  %v7581_v42 = vld [vmem:[%s12346_s14 + $0x564] sm:$0xf0] }
 0x4e6   : > { %4999 = vmatpush.bf16.msra.mxu1 %v7356_v63  ;;  %5011 = vmatpush.bf16.msrb.mxu2 %v7608_v0  ;;  %v7696_v41 = vor.u32 %v8346_v50, %v7693_v52  ;;  %v8276_v63 = vld [vmem:[%s12346_s14 + $0x3fc] sm:$0xf]  ;;  %v7413_v0 = vld [vmem:[%s12346_s14 + $0x414] sm:$0xf0]  ;;  %v7584_v50 = vor.u32 %v8318_v39, %v7581_v42  ;;  %v8343_v42 = vld [vmem:[%s12346_s14 + $0x610] sm:$0xf0] }
 0x4e7   : > { %v7416_v9 = vor.u32 %v8276_v63, %v7413_v0  ;;  %v7503_v63 = vld [vmem:[%s12346_s14 + $0x4a8] sm:$0xf]  ;;  %v8301_v0 = vld [vmem:[%s12346_s14 + $0x4c0] sm:$0xf0] }
 0x4e9   : > { %5022 = vmatpush.bf16.msra.mxu3 %v6996_v2  ;;  %5034 = vmatpush.bf16.msra.mxu0 %v7248_v3  ;;  %v7336_v2 = vor.u32 %v8259_v37, %v7335_v59  ;;  %v8339_v3 = vld [vmem:[%s12346_s14 + $0x5f4] sm:$0xf]  ;;  %v8161_v59 = vld [vmem:[%s12346_s14 + $0x60] sm:$0xf0]  ;;  %v7532_v37 = vor.u32 %v8308_v49, %v7531_v48  ;;  %v7391_v49 = vld [vmem:[%s12346_s14 + $0x3c8] sm:$0xf] }
 0x4ea   : > { %5044 = vmatpush.bf16.msrb.mxu1 %v7556_v6  ;;  %5012 = vmatpush.bf16.msrb.mxu2 %v7580_v12  ;;  %v7307_v6 = vld [vmem:[%s12346_s14 + $0x320] sm:$0xf]  ;;  %v7668_v10 = vor.u32 %v8339_v3, %v7665_v4  ;;  %v6944_v3 = vor.u32 %v8161_v59, %v6943_v35  ;;  %v8179_v35 = vld [vmem:[%s12346_s14 + $0xf4] sm:$0xf]  ;;  %v7029_v59 = vld [vmem:[%s12346_s14 + $0x10c] sm:$0xf0] }
 0x4eb   : > { %5000 = vmatmul.bf16.vlgmr.msra.gmra.mxu1 %v11325_v25  ;;  %v7308_v12 = vor.u32 %v8252_v8, %v7307_v6  ;;  %v7504_v6 = vor.u32 %v8301_v0, %v7503_v63  ;;  %v7363_v63 = vld [vmem:[%s12346_s14 + $0x390] sm:$0xf]  ;;  %v8266_v0 = vld [vmem:[%s12346_s14 + $0x3a8] sm:$0xf0] }
 0x4ed   : > { %5023 = vmatpush.bf16.msra.mxu3 %v6968_v13  ;;  %5035 = vmatpush.bf16.msra.mxu0 %v7220_v14  ;;  %v8332_v13 = vld [vmem:[%s12346_s14 + $0x5bc] sm:$0xf]  ;;  %v7637_v14 = vld [vmem:[%s12346_s14 + $0x5d4] sm:$0xf0] }
 0x4ee   : > { %5045 = vmatpush.bf16.msrb.mxu1 %v7528_v7  ;;  %5057 = vmatpush.bf16.msra.mxu2 %v7780_v18  ;;  %v7279_v7 = vld [vmem:[%s12346_s14 + $0x2e8] sm:$0xf]  ;;  %v8245_v18 = vld [vmem:[%s12346_s14 + $0x300] sm:$0xf0]  ;;  %v7640_v20 = vor.u32 %v8332_v13, %v7637_v14  ;;  %v8200_v13 = vld [vmem:[%s12346_s14 + $0x19c] sm:$0xf] }
 0x4ef   : > { %5013 = vmatmul.bf16.vlgmr.msrb.gmra.mxu2 %v11353_v28  ;;  %v7280_v24 = vor.u32 %v8245_v18, %v7279_v7  ;;  %v7113_v14 = vld [vmem:[%s12346_s14 + $0x1b4] sm:$0xf0]  ;;  %v7139_v7 = vld [vmem:[%s12346_s14 + $0x1d0] sm:$0xf]  ;;  %v7476_v18 = vor.u32 %v8294_v45, %v7475_v11  ;;  %v7364_v11 = vor.u32 %v8266_v0, %v7363_v63  ;;  %v8284_v63 = vld [vmem:[%s12346_s14 + $0x43c] sm:$0xf] }
 0x4f0   : > { %v7449_v0 = vld [vmem:[%s12346_s14 + $0x454] sm:$0xf0] }
 0x4f1   : > { %5024 = vmatpush.bf16.msra.mxu3 %v6940_v26  ;;  %5036 = vmatpush.bf16.msra.mxu0 %v7192_v27  ;;  %v8325_v26 = vld [vmem:[%s12346_s14 + $0x584] sm:$0xf]  ;;  %v7609_v27 = vld [vmem:[%s12346_s14 + $0x59c] sm:$0xf0] }
 0x4f2   : > { %5046 = vmatpush.bf16.msrb.mxu1 %v7500_v31  ;;  %5058 = vmatpush.bf16.msra.mxu2 %v7752_v32  ;;  %v7251_v31 = vld [vmem:[%s12346_s14 + $0x2b0] sm:$0xf]  ;;  %v8238_v32 = vld [vmem:[%s12346_s14 + $0x2c8] sm:$0xf0]  ;;  %v7612_v38 = vor.u32 %v8325_v26, %v7609_v27  ;;  %v8193_v27 = vld [vmem:[%s12346_s14 + $0x164] sm:$0xf] }
 0x4f3   : > { %v7252_v40 = vor.u32 %v8238_v32, %v7251_v31  ;;  %v8350_v26 = vld [vmem:[%s12346_s14 + $0x648] sm:$0xf0]  ;;  %v7337_v31 = vld [vmem:[%s12346_s14 + $0x374] sm:$0xf0]  ;;  %v7088_v39 = vor.u32 %v8193_v27, %v7085_v29 }
 0x4f4   : > { %v8158_v29 = vld [vmem:[%s12346_s14 + $0x4c] sm:$0xf] }
 0x4f5   : > { %5025 = vmatpush.bf16.msra.mxu3 %v6912_v57  ;;  %5037 = vmatpush.bf16.msra.mxu0 %v7164_v43  ;;  %v6971_v57 = vld [vmem:[%s12346_s14 + $0x80] sm:$0xf]  ;;  %v8168_v43 = vld [vmem:[%s12346_s14 + $0x98] sm:$0xf0] }
 0x4f6   : > { %5047 = vmatpush.bf16.msrb.mxu1 %v7472_v30  ;;  %5059 = vmatpush.bf16.msra.mxu2 %v7724_v47  ;;  %v7223_v30 = vld [vmem:[%s12346_s14 + $0x278] sm:$0xf]  ;;  %v8231_v47 = vld [vmem:[%s12346_s14 + $0x290] sm:$0xf0]  ;;  %v6972_v52 = vor.u32 %v8168_v43, %v6971_v57  ;;  %v8186_v57 = vld [vmem:[%s12346_s14 + $0x12c] sm:$0xf] }
 0x4f7   : > { %v7224_v54 = vor.u32 %v8231_v47, %v7223_v30  ;;  %v7057_v43 = vld [vmem:[%s12346_s14 + $0x144] sm:$0xf0]  ;;  %v7309_v30 = vld [vmem:[%s12346_s14 + $0x33c] sm:$0xf0] }
 0x4f8   : > { %5026 = vmatmul.bf16.vlgmr.msra.gmra.mxu3 %v11260_v46 }
 0x4f9   : > { %5070 = vmatpush.bf16.msrb.mxu3 %v7112_v36  ;;  %5038 = vmatpush.bf16.msra.mxu0 %v7136_v61  ;;  %v8371_v36 = vld [vmem:[%s12346_s14 + $0x6f0] sm:$0xf0] }
 0x4fa   : > { %5048 = vmatpush.bf16.msrb.mxu1 %v7444_v62  ;;  %5060 = vmatpush.bf16.msra.mxu2 %v7696_v41  ;;  %v7784_v61 = vor.u32 %v8371_v36, %v7783_v56  ;;  %v7195_v62 = vld [vmem:[%s12346_s14 + $0x240] sm:$0xf]  ;;  %v8224_v41 = vld [vmem:[%s12346_s14 + $0x258] sm:$0xf0]  ;;  %v8273_v56 = vld [vmem:[%s12346_s14 + $0x3e0] sm:$0xf0]  ;;  %v7060_v36 = vor.u32 %v8186_v57, %v7057_v43 }
 0x4fb   : > { %v7196_v4 = vor.u32 %v8224_v41, %v7195_v62  ;;  %v7392_v62 = vor.u32 %v8273_v56, %v7391_v49  ;;  %v8151_v57 = vld [vmem:[%s12346_s14 + $0x14] sm:$0xf]  ;;  %v6917_v43 = vld [vmem:[%s12346_s14 + $0x2c] sm:$0xf0] }
 0x4fc   : > { %5039 = vmatmul.bf16.vlgmr.msra.gmra.mxu0 %v11275_v60  ;;  %v8291_v49 = vld [vmem:[%s12346_s14 + $0x474] sm:$0xf]  ;;  %v7477_v56 = vld [vmem:[%s12346_s14 + $0x48c] sm:$0xf0] }
 0x4fd   : > { %5071 = vmatpush.bf16.msrb.mxu3 %v7084_v1  ;;  %5083 = vmatpush.bf16.msrb.mxu0 %v7336_v2  ;;  %v7755_v1 = vld [vmem:[%s12346_s14 + $0x6a0] sm:$0xf]  ;;  %v8364_v2 = vld [vmem:[%s12346_s14 + $0x6b8] sm:$0xf0] }
 0x4fe   : > { %5049 = vmatpush.bf16.msrb.mxu1 %v7416_v9  ;;  %5061 = vmatpush.bf16.msra.mxu2 %v7668_v10  ;;  %v7756_v8 = vor.u32 %v8364_v2, %v7755_v1  ;;  %v7167_v9 = vld [vmem:[%s12346_s14 + $0x208] sm:$0xf]  ;;  %v8217_v10 = vld [vmem:[%s12346_s14 + $0x220] sm:$0xf0]  ;;  %v7032_v1 = vor.u32 %v8179_v35, %v7029_v59  ;;  %v6920_v35 = vor.u32 %v8151_v57, %v6917_v43  ;;  %v7007_v43 = vld [vmem:[%s12346_s14 + $0xc0] sm:$0xf] }
 0x4ff   : > { %v7168_v16 = vor.u32 %v8217_v10, %v7167_v9  ;;  %v8312_v9 = vld [vmem:[%s12346_s14 + $0x51c] sm:$0xf]  ;;  %v7561_v10 = vld [vmem:[%s12346_s14 + $0x534] sm:$0xf0]  ;;  %v7617_v57 = vld [vmem:[%s12346_s14 + $0x5a4] sm:$0xf0] }
 0x501   : > { %5072 = vmatpush.bf16.msrb.mxu3 %v7056_v55  ;;  %5084 = vmatpush.bf16.msrb.mxu0 %v7308_v12  ;;  %v7727_v55 = vld [vmem:[%s12346_s14 + $0x668] sm:$0xf]  ;;  %v8357_v12 = vld [vmem:[%s12346_s14 + $0x680] sm:$0xf0] }
 0x502   : > { %5050 = vmatpush.bf16.msrb.mxu1 %v7388_v19  ;;  %5062 = vmatpush.bf16.msra.mxu2 %v7640_v20  ;;  %v7728_v19 = vor.u32 %v8357_v12, %v7727_v55  ;;  %v8210_v20 = vld [vmem:[%s12346_s14 + $0x1e8] sm:$0xf0]  ;;  %v7587_v55 = vld [vmem:[%s12346_s14 + $0x550] sm:$0xf]  ;;  %v7004_v12 = vor.u32 %v8172_v5, %v7001_v58  ;;  %v8197_v5 = vld [vmem:[%s12346_s14 + $0x180] sm:$0xf0] }
 0x503   : > { %v7140_v32 = vor.u32 %v8210_v20, %v7139_v7  ;;  %v7564_v7 = vor.u32 %v8312_v9, %v7561_v10  ;;  %v8305_v20 = vld [vmem:[%s12346_s14 + $0x4e4] sm:$0xf]  ;;  %v7343_v58 = vld [vmem:[%s12346_s14 + $0x360] sm:$0xf]  ;;  %v7452_v9 = vor.u32 %v8284_v63, %v7449_v0  ;;  %v8232_v63 = vld [vmem:[%s12346_s14 + $0x298] sm:$0xf0] }
 0x504   : > { %v7539_v0 = vld [vmem:[%s12346_s14 + $0x4e8] sm:$0xf] }
 0x505   : > { %5073 = vmatpush.bf16.msrb.mxu3 %v7028_v23  ;;  %5085 = vmatpush.bf16.msrb.mxu0 %v7280_v24  ;;  %v7116_v23 = vor.u32 %v8200_v13, %v7113_v14  ;;  %v7699_v24 = vld [vmem:[%s12346_s14 + $0x630] sm:$0xf]  ;;  %v8322_v14 = vld [vmem:[%s12346_s14 + $0x568] sm:$0xf0] }
 0x506   : > { %5051 = vmatpush.bf16.msrb.mxu1 %v7360_v34  ;;  %5063 = vmatpush.bf16.msra.mxu2 %v7612_v38  ;;  %v7700_v17 = vor.u32 %v8350_v26, %v7699_v24  ;;  %v7419_v34 = vld [vmem:[%s12346_s14 + $0x400] sm:$0xf]  ;;  %v8280_v38 = vld [vmem:[%s12346_s14 + $0x418] sm:$0xf0]  ;;  %v7588_v24 = vor.u32 %v8322_v14, %v7587_v55  ;;  %v7673_v14 = vld [vmem:[%s12346_s14 + $0x614] sm:$0xf0] }
 0x507   : > { %v7420_v47 = vor.u32 %v8280_v38, %v7419_v34  ;;  %v8298_v34 = vld [vmem:[%s12346_s14 + $0x4ac] sm:$0xf]  ;;  %v7505_v38 = vld [vmem:[%s12346_s14 + $0x4c4] sm:$0xf0] }
 0x509   : > { %5074 = vmatpush.bf16.msrb.mxu3 %v7000_v51  ;;  %5086 = vmatpush.bf16.msrb.mxu0 %v7252_v40  ;;  %v7340_v51 = vor.u32 %v8256_v53, %v7337_v31  ;;  %v7671_v40 = vld [vmem:[%s12346_s14 + $0x5f8] sm:$0xf]  ;;  %v6945_v53 = vld [vmem:[%s12346_s14 + $0x64] sm:$0xf0]  ;;  %v7536_v31 = vor.u32 %v8305_v20, %v7533_v21  ;;  %v8270_v21 = vld [vmem:[%s12346_s14 + $0x3cc] sm:$0xf] }
 0x50a   : > { %5096 = vmatpush.bf16.msra.mxu1 %v7560_v44  ;;  %5064 = vmatpush.bf16.msra.mxu2 %v7584_v50  ;;  %v8249_v44 = vld [vmem:[%s12346_s14 + $0x324] sm:$0xf]  ;;  %v7672_v48 = vor.u32 %v8343_v42, %v7671_v40  ;;  %v6948_v40 = vor.u32 %v8158_v29, %v6945_v53  ;;  %v7035_v29 = vld [vmem:[%s12346_s14 + $0xf8] sm:$0xf]  ;;  %v8183_v53 = vld [vmem:[%s12346_s14 + $0x110] sm:$0xf0] }
 0x50b   : > { %5052 = vmatmul.bf16.vlgmr.msrb.gmra.mxu1 %v11325_v25  ;;  %v7312_v50 = vor.u32 %v8249_v44, %v7309_v30  ;;  %v7508_v44 = vor.u32 %v8298_v34, %v7505_v38  ;;  %v8263_v34 = vld [vmem:[%s12346_s14 + $0x394] sm:$0xf]  ;;  %v7365_v38 = vld [vmem:[%s12346_s14 + $0x3ac] sm:$0xf0] }
 0x50d   : > { %5075 = vmatpush.bf16.msrb.mxu3 %v6972_v52  ;;  %5087 = vmatpush.bf16.msrb.mxu0 %v7224_v54  ;;  %v7643_v52 = vld [vmem:[%s12346_s14 + $0x5c0] sm:$0xf]  ;;  %v8336_v54 = vld [vmem:[%s12346_s14 + $0x5d8] sm:$0xf0] }
 0x50e   : > { %5097 = vmatpush.bf16.msra.mxu1 %v7532_v37  ;;  %5109 = vmatpush.bf16.msrb.mxu2 %v7784_v61  ;;  %v8242_v37 = vld [vmem:[%s12346_s14 + $0x2ec] sm:$0xf]  ;;  %v7281_v61 = vld [vmem:[%s12346_s14 + $0x304] sm:$0xf0]  ;;  %v7644_v41 = vor.u32 %v8336_v54, %v7643_v52  ;;  %v7119_v52 = vld [vmem:[%s12346_s14 + $0x1a0] sm:$0xf] }
 0x50f   : > { %5065 = vmatmul.bf16.vlgmr.msra.gmra.mxu2 %v11353_v28  ;;  %v7284_v2 = vor.u32 %v8242_v37, %v7281_v61  ;;  %v8204_v54 = vld [vmem:[%s12346_s14 + $0x1b8] sm:$0xf0]  ;;  %v8207_v37 = vld [vmem:[%s12346_s14 + $0x1d4] sm:$0xf]  ;;  %v7480_v61 = vor.u32 %v8291_v49, %v7477_v56  ;;  %v7567_v49 = vld [vmem:[%s12346_s14 + $0x520] sm:$0xf] }
 0x510   : > { %v8316_v56 = vld [vmem:[%s12346_s14 + $0x538] sm:$0xf0] }
 0x511   : > { %5076 = vmatpush.bf16.msrb.mxu3 %v6944_v3  ;;  %5088 = vmatpush.bf16.msrb.mxu0 %v7196_v4  ;;  %v7615_v3 = vld [vmem:[%s12346_s14 + $0x588] sm:$0xf]  ;;  %v8329_v4 = vld [vmem:[%s12346_s14 + $0x5a0] sm:$0xf0] }
 0x512   : > { %5098 = vmatpush.bf16.msra.mxu1 %v7504_v6  ;;  %5110 = vmatpush.bf16.msrb.mxu2 %v7756_v8  ;;  %v8235_v6 = vld [vmem:[%s12346_s14 + $0x2b4] sm:$0xf]  ;;  %v7253_v8 = vld [vmem:[%s12346_s14 + $0x2cc] sm:$0xf0]  ;;  %v7616_v45 = vor.u32 %v8329_v4, %v7615_v3  ;;  %v7091_v4 = vld [vmem:[%s12346_s14 + $0x168] sm:$0xf] }
 0x513   : > { %v7256_v13 = vor.u32 %v8235_v6, %v7253_v8  ;;  %v7701_v3 = vld [vmem:[%s12346_s14 + $0x64c] sm:$0xf0]  ;;  %v8260_v6 = vld [vmem:[%s12346_s14 + $0x378] sm:$0xf0]  ;;  %v7092_v55 = vor.u32 %v8197_v5, %v7091_v4  ;;  %v12142_v5 = vld [vmem:[%s12347_s15] sm:$0x7f] }
 0x515   : > { %5077 = vmatpush.bf16.msrb.mxu3 %v6916_v15  ;;  %5089 = vmatpush.bf16.msrb.mxu0 %v7168_v16  ;;  %v8165_v15 = vld [vmem:[%s12346_s14 + $0x84] sm:$0xf]  ;;  %v6973_v16 = vld [vmem:[%s12346_s14 + $0x9c] sm:$0xf0] }
 0x516   : > { %5099 = vmatpush.bf16.msra.mxu1 %v7476_v18  ;;  %5111 = vmatpush.bf16.msrb.mxu2 %v7728_v19  ;;  %v8228_v18 = vld [vmem:[%s12346_s14 + $0x27c] sm:$0xf]  ;;  %v7225_v19 = vld [vmem:[%s12346_s14 + $0x294] sm:$0xf0]  ;;  %v6976_v26 = vor.u32 %v8165_v15, %v6973_v16  ;;  %v7063_v15 = vld [vmem:[%s12346_s14 + $0x130] sm:$0xf] }
 0x517   : > { %v7228_v27 = vor.u32 %v8228_v18, %v7225_v19  ;;  %v8190_v16 = vld [vmem:[%s12346_s14 + $0x148] sm:$0xf0]  ;;  %v8253_v18 = vld [vmem:[%s12346_s14 + $0x340] sm:$0xf0] }
 0x518   : > { %5078 = vmatmul.bf16.vlgmr.msrb.gmra.mxu3 %v11260_v46 }
 0x519   : > { %5122 = vmatpush.bf16.msra.mxu3 %v7116_v23  ;;  %5090 = vmatpush.bf16.msrb.mxu0 %v7140_v32  ;;  %v7785_v23 = vld [vmem:[%s12346_s14 + $0x6f4] sm:$0xf0] }
 0x51a   : > { %5100 = vmatpush.bf16.msra.mxu1 %v7448_v33  ;;  %5112 = vmatpush.bf16.msrb.mxu2 %v7700_v17  ;;  %v7788_v32 = vor.u32 %v8368_v22, %v7785_v23  ;;  %v8221_v33 = vld [vmem:[%s12346_s14 + $0x244] sm:$0xf]  ;;  %v7197_v17 = vld [vmem:[%s12346_s14 + $0x25c] sm:$0xf0]  ;;  %v7393_v22 = vld [vmem:[%s12346_s14 + $0x3e4] sm:$0xf0]  ;;  %v7064_v23 = vor.u32 %v8190_v16, %v7063_v15 }
 0x51b   : > { %v7200_v42 = vor.u32 %v8221_v33, %v7197_v17  ;;  %v7396_v33 = vor.u32 %v8270_v21, %v7393_v22  ;;  %v8302_v15 = vld [vmem:[%s12346_s14 + $0x4c8] sm:$0xf0]  ;;  %v7763_v16 = vld [vmem:[%s12346_s14 + $0x6a8] sm:$0xf]  ;;  %v6923_v22 = vld [vmem:[%s12346_s14 + $0x18] sm:$0xf] }
 0x51c   : > { %5091 = vmatmul.bf16.vlgmr.msrb.gmra.mxu0 %v11275_v60 }
 0x51d   : > { %5123 = vmatpush.bf16.msra.mxu3 %v7088_v39  ;;  %5135 = vmatpush.bf16.msra.mxu0 %v7340_v51  ;;  %v8361_v39 = vld [vmem:[%s12346_s14 + $0x6a4] sm:$0xf]  ;;  %v7757_v51 = vld [vmem:[%s12346_s14 + $0x6bc] sm:$0xf0] }
 0x51e   : > { %5101 = vmatpush.bf16.msra.mxu1 %v7420_v47  ;;  %5113 = vmatpush.bf16.msrb.mxu2 %v7672_v48  ;;  %v7760_v30 = vor.u32 %v8361_v39, %v7757_v51  ;;  %v8214_v47 = vld [vmem:[%s12346_s14 + $0x20c] sm:$0xf]  ;;  %v7169_v48 = vld [vmem:[%s12346_s14 + $0x224] sm:$0xf0]  ;;  %v7036_v39 = vor.u32 %v8183_v53, %v7035_v29  ;;  %v7483_v53 = vld [vmem:[%s12346_s14 + $0x478] sm:$0xf] }
 0x51f   : > { %v7172_v59 = vor.u32 %v8214_v47, %v7169_v48  ;;  %v8239_v47 = vld [vmem:[%s12346_s14 + $0x2d0] sm:$0xf0]  ;;  %v8218_v29 = vld [vmem:[%s12346_s14 + $0x228] sm:$0xf0] }
 0x521   : > { %5124 = vmatpush.bf16.msra.mxu3 %v7060_v36  ;;  %5136 = vmatpush.bf16.msra.mxu0 %v7312_v50  ;;  %v8354_v36 = vld [vmem:[%s12346_s14 + $0x66c] sm:$0xf]  ;;  %v7729_v50 = vld [vmem:[%s12346_s14 + $0x684] sm:$0xf0] }
 0x522   : > { %5102 = vmatpush.bf16.msra.mxu1 %v7392_v62  ;;  %5114 = vmatpush.bf16.msrb.mxu2 %v7644_v41  ;;  %v7732_v62 = vor.u32 %v8354_v36, %v7729_v50  ;;  %v7141_v41 = vld [vmem:[%s12346_s14 + $0x1ec] sm:$0xf0]  ;;  %v7368_v36 = vor.u32 %v8263_v34, %v7365_v38 }
 0x523   : > { %v7144_v8 = vor.u32 %v8207_v37, %v7141_v41  ;;  %v6979_v37 = vld [vmem:[%s12346_s14 + $0x88] sm:$0xf]  ;;  %v7231_v41 = vld [vmem:[%s12346_s14 + $0x280] sm:$0xf] }
 0x525   : > { %5125 = vmatpush.bf16.msra.mxu3 %v7032_v1  ;;  %5137 = vmatpush.bf16.msra.mxu0 %v7284_v2  ;;  %v7120_v1 = vor.u32 %v8204_v54, %v7119_v52  ;;  %v8347_v2 = vld [vmem:[%s12346_s14 + $0x634] sm:$0xf] }
 0x526   : > { %5103 = vmatpush.bf16.msra.mxu1 %v7364_v11  ;;  %5115 = vmatpush.bf16.msrb.mxu2 %v7616_v45  ;;  %v7704_v10 = vor.u32 %v8347_v2, %v7701_v3  ;;  %v8277_v11 = vld [vmem:[%s12346_s14 + $0x404] sm:$0xf]  ;;  %v7421_v45 = vld [vmem:[%s12346_s14 + $0x41c] sm:$0xf0]  ;;  %v8319_v52 = vld [vmem:[%s12346_s14 + $0x554] sm:$0xf] }
 0x527   : > { %v7424_v19 = vor.u32 %v8277_v11, %v7421_v45  ;;  %v7791_v2 = vld [vmem:[%s12346_s14 + $0x6e0] sm:$0xf]  ;;  %v8372_v3 = vld [vmem:[%s12346_s14 + $0x6f8] sm:$0xf0] }
 0x528   : > { %v7792_v45 = vor.u32 %v8372_v3, %v7791_v2  ;;  %v7399_v3 = vld [vmem:[%s12346_s14 + $0x3d0] sm:$0xf] }
 0x529   : > { %5126 = vmatpush.bf16.msra.mxu3 %v7004_v12  ;;  %5138 = vmatpush.bf16.msra.mxu0 %v7256_v13  ;;  %v7344_v12 = vor.u32 %v8260_v6, %v7343_v58  ;;  %v8340_v13 = vld [vmem:[%s12346_s14 + $0x5fc] sm:$0xf]  ;;  %v7232_v6 = vor.u32 %v8232_v63, %v7231_v41 }
 0x52a   : > { %5148 = vmatpush.bf16.msrb.mxu1 %v7564_v7  ;;  %5116 = vmatpush.bf16.msrb.mxu2 %v7588_v24  ;;  %v7315_v7 = vld [vmem:[%s12346_s14 + $0x328] sm:$0xf]  ;;  %v7676_v20 = vor.u32 %v8340_v13, %v7673_v14  ;;  %v7511_v13 = vld [vmem:[%s12346_s14 + $0x4b0] sm:$0xf] }
 0x52b   : > { %5104 = vmatmul.bf16.vlgmr.msra.gmra.mxu1 %v11325_v25  ;;  %v7316_v24 = vor.u32 %v8253_v18, %v7315_v7  ;;  %v8365_v7 = vld [vmem:[%s12346_s14 + $0x6c0] sm:$0xf0]  ;;  %v3696_v18 = vperm.slane %v12142_v5, 0 }
 0x52d   : > { %5127 = vmatpush.bf16.msra.mxu3 %v6976_v26  ;;  %5139 = vmatpush.bf16.msra.mxu0 %v7228_v27  ;;  %v8333_v26 = vld [vmem:[%s12346_s14 + $0x5c4] sm:$0xf]  ;;  %v7645_v27 = vld [vmem:[%s12346_s14 + $0x5dc] sm:$0xf0] }
 0x52e   : > { %5149 = vmatpush.bf16.msrb.mxu1 %v7536_v31  ;;  %5161 = vmatpush.bf16.msra.mxu2 %v7788_v32  ;;  %v7287_v31 = vld [vmem:[%s12346_s14 + $0x2f0] sm:$0xf]  ;;  %v8246_v32 = vld [vmem:[%s12346_s14 + $0x308] sm:$0xf0]  ;;  %v7648_v17 = vor.u32 %v8333_v26, %v7645_v27  ;;  %v7764_v26 = vor.u32 %v8365_v7, %v7763_v16 }
 0x52f   : > { %5117 = vmatmul.bf16.vlgmr.msrb.gmra.mxu2 %v11353_v28  ;;  %v7288_v51 = vor.u32 %v8246_v32, %v7287_v31  ;;  %v7175_v27 = vld [vmem:[%s12346_s14 + $0x210] sm:$0xf]  ;;  %v8295_v31 = vld [vmem:[%s12346_s14 + $0x490] sm:$0xf0] }
 0x530   : > { %v7735_v32 = vld [vmem:[%s12346_s14 + $0x670] sm:$0xf]  ;;  %v7176_v38 = vor.u32 %v8218_v29, %v7175_v27 }
 0x531   : > { %5128 = vmatpush.bf16.msra.mxu3 %v6948_v40  ;;  %5140 = vmatpush.bf16.msra.mxu0 %v7200_v42  ;;  %v8326_v42 = vld [vmem:[%s12346_s14 + $0x58c] sm:$0xf] }
 0x532   : > { %5150 = vmatpush.bf16.msrb.mxu1 %v7508_v44  ;;  %5162 = vmatpush.bf16.msra.mxu2 %v7760_v30  ;;  %v8176_v44 = vld [vmem:[%s12346_s14 + $0xd8] sm:$0xf0]  ;;  %v7259_v30 = vld [vmem:[%s12346_s14 + $0x2b8] sm:$0xf]  ;;  %v7620_v50 = vor.u32 %v8326_v42, %v7617_v57 }
 0x533   : > { %v7008_v54 = vor.u32 %v8176_v44, %v7007_v43  ;;  %v7147_v57 = vld [vmem:[%s12346_s14 + $0x1d8] sm:$0xf]  ;;  %v8211_v43 = vld [vmem:[%s12346_s14 + $0x1f0] sm:$0xf0]  ;;  %v7455_v44 = vld [vmem:[%s12346_s14 + $0x440] sm:$0xf] }
 0x535   : > { %5129 = vmatpush.bf16.msra.mxu3 %v6920_v35  ;;  %5141 = vmatpush.bf16.msra.mxu0 %v7172_v59  ;;  %v7260_v35 = vor.u32 %v8239_v47, %v7259_v30  ;;  %v7589_v59 = vld [vmem:[%s12346_s14 + $0x56c] sm:$0xf0]  ;;  %v8288_v47 = vld [vmem:[%s12346_s14 + $0x458] sm:$0xf0] }
 0x536   : > { %5151 = vmatpush.bf16.msrb.mxu1 %v7480_v61  ;;  %5163 = vmatpush.bf16.msra.mxu2 %v7732_v62  ;;  %v8169_v61 = vld [vmem:[%s12346_s14 + $0xa0] sm:$0xf0]  ;;  %v7568_v62 = vor.u32 %v8316_v56, %v7567_v49  ;;  %v7592_v4 = vor.u32 %v8319_v52, %v7589_v59  ;;  %v8351_v49 = vld [vmem:[%s12346_s14 + $0x650] sm:$0xf0]  ;;  %v7427_v59 = vld [vmem:[%s12346_s14 + $0x408] sm:$0xf] }
 0x537   : > { %v6980_v58 = vor.u32 %v8169_v61, %v6979_v37  ;;  %v8281_v61 = vld [vmem:[%s12346_s14 + $0x420] sm:$0xf0] }
 0x538   : > { %5130 = vmatmul.bf16.vlgmr.msra.gmra.mxu3 %v11260_v46 }
 0x539   : > { %5174 = vmatpush.bf16.msrb.mxu3 %v7120_v1  ;;  %5142 = vmatpush.bf16.msra.mxu0 %v7144_v8  ;;  %v12081_v40 = vpop.f32.mrf.mxu0  ;;  %v8309_v1 = vld [vmem:[%s12346_s14 + $0x500] sm:$0xf0] }
 0x53a   : > { %5152 = vmatpush.bf16.msrb.mxu1 %v7452_v9  ;;  %5164 = vmatpush.bf16.msra.mxu2 %v7704_v10  ;;  %v6951_v9 = vld [vmem:[%s12346_s14 + $0x50] sm:$0xf]  ;;  %v8162_v10 = vld [vmem:[%s12346_s14 + $0x68] sm:$0xf0]  ;;  %v7540_v11 = vor.u32 %v8309_v1, %v7539_v0  ;;  %v7428_v1 = vor.u32 %v8281_v61, %v7427_v59 }
 0x53b   : > { %v12101_v48 = vpop.f32.mrf.mxu3 }
 0x53c   : > { %5143 = vmatmul.bf16.vlgmr.msra.gmra.mxu0 %v11275_v60 }
 0x53d   : > { %5175 = vmatpush.bf16.msrb.mxu3 %v7092_v55  ;;  %5187 = vmatpush.bf16.msrb.mxu0 %v7344_v12  ;;  %v7203_v55 = vld [vmem:[%s12346_s14 + $0x248] sm:$0xf]  ;;  %v8225_v12 = vld [vmem:[%s12346_s14 + $0x260] sm:$0xf0] }
 0x53e   : > { %5153 = vmatpush.bf16.msrb.mxu1 %v7424_v19  ;;  %5165 = vmatpush.bf16.msra.mxu2 %v7676_v20  ;;  %v6952_v19 = vor.u32 %v8162_v10, %v6951_v9  ;;  %v7204_v20 = vor.u32 %v8225_v12, %v7203_v55  ;;  %v8267_v12 = vld [vmem:[%s12346_s14 + $0x3b0] sm:$0xf0] }
 0x541   : > { %5176 = vmatpush.bf16.msrb.mxu3 %v7064_v23  ;;  %5188 = vmatpush.bf16.msrb.mxu0 %v7316_v24  ;;  %v4886_v8 = vpop.f32.mrf.mxu0  ;;  %v8155_v23 = vld [vmem:[%s12346_s14 + $0x30] sm:$0xf0]  ;;  %v7512_v24 = vor.u32 %v8302_v15, %v7511_v13  ;;  %v7623_v13 = vld [vmem:[%s12346_s14 + $0x590] sm:$0xf] }
 0x542   : > { %5154 = vmatpush.bf16.msrb.mxu1 %v7396_v33  ;;  %5166 = vmatpush.bf16.msra.mxu2 %v7648_v17  ;;  %v8358_v33 = vld [vmem:[%s12346_s14 + $0x688] sm:$0xf0]  ;;  %v4872_v17 = vadd.f32 %v12101_v48, %v3696_v18  ;;  %v6924_v34 = vor.u32 %v8155_v23, %v6923_v22  ;;  %v7707_v48 = vld [vmem:[%s12346_s14 + $0x638] sm:$0xf]  ;;  %v3697_v8 = vperm.slane %v12142_v5, 1 }
 0x543   : > { %v4873_v14 = vpop.f32.mrf.mxu3  ;;  %v7736_v42 = vor.u32 %v8358_v33, %v7735_v32  ;;  %v8323_v22 = vld [vmem:[%s12346_s14 + $0x570] sm:$0xf0] }
 0x544   : > { %v4885_v56 = vadd.f32 %v12081_v40, %v4872_v17  ;;  %v7679_v40 = vld [vmem:[%s12346_s14 + $0x600] sm:$0xf] }
 0x545   : > { %5177 = vmatpush.bf16.msrb.mxu3 %v7036_v39  ;;  %5189 = vmatpush.bf16.msrb.mxu0 %v7288_v51  ;;  %v4897_v21 = vpop.f32.mrf.mxu1  ;;  %v7484_v51 = vor.u32 %v8295_v31, %v7483_v53 }
 0x546   : > { %5155 = vmatpush.bf16.msrb.mxu1 %v7368_v36  ;;  %5167 = vmatpush.bf16.msra.mxu2 %v7620_v50  ;;  %v7148_v36 = vor.u32 %v8211_v43, %v7147_v57  ;;  %v4898_v52 = vadd.f32 %v4897_v21, %v4885_v56  ;;  %v7595_v21 = vld [vmem:[%s12346_s14 + $0x558] sm:$0xf] }
 0x547   : > { %v7596_v27 = vor.u32 %v8323_v22, %v7595_v21 }
 0x549   : > { %5178 = vmatpush.bf16.msrb.mxu3 %v7008_v54  ;;  %5190 = vmatpush.bf16.msrb.mxu0 %v7260_v35  ;;  %v12196_v39 = vpop.f32.mrf.mxu0  ;;  %v7456_v54 = vor.u32 %v8288_v47, %v7455_v44  ;;  %v7708_v35 = vor.u32 %v8351_v49, %v7707_v48 }
 0x54a   : > { %5200 = vmatpush.bf16.msra.mxu1 %v7568_v62  ;;  %5168 = vmatpush.bf16.msra.mxu2 %v7592_v4  ;;  %v8344_v62 = vld [vmem:[%s12346_s14 + $0x618] sm:$0xf0] }
 0x54b   : > { %5156 = vmatmul.bf16.vlgmr.msrb.gmra.mxu1 %v11325_v25  ;;  %v4923_v30 = vpop.f32.mrf.mxu3  ;;  %v7680_v2 = vor.u32 %v8344_v62, %v7679_v40 }
 0x54c   : > { %v4924_v14 = vadd.f32 %v4923_v30, %v3697_v8 }
 0x54d   : > { %5179 = vmatpush.bf16.msrb.mxu3 %v6980_v58  ;;  %5191 = vmatpush.bf16.msrb.mxu0 %v7232_v6  ;;  %v4899_v50 = vpop.f32.mrf.mxu1  ;;  %v8274_v58 = vld [vmem:[%s12346_s14 + $0x3e8] sm:$0xf0]  ;;  %v8337_v6 = vld [vmem:[%s12346_s14 + $0x5e0] sm:$0xf0] }
 0x54e   : > { %5201 = vmatpush.bf16.msra.mxu1 %v7540_v11  ;;  %5213 = vmatpush.bf16.msrb.mxu2 %v7792_v45  ;;  %v7400_v10 = vor.u32 %v8274_v58, %v7399_v3  ;;  %v7371_v45 = vld [vmem:[%s12346_s14 + $0x398] sm:$0xf]  ;;  %v4937_v23 = vadd.f32 %v12196_v39, %v4924_v14 }
 0x54f   : > { %5169 = vmatmul.bf16.vlgmr.msra.gmra.mxu2 %v11353_v28  ;;  %v4910_v37 = vpop.f32.mrf.mxu2  ;;  %v7372_v7 = vor.u32 %v8267_v12, %v7371_v45 }
 0x550   : > { %v4911_v41 = vadd.f32 %v4910_v37, %v4898_v52 }
 0x551   : > { %5180 = vmatpush.bf16.msrb.mxu3 %v6952_v19  ;;  %5192 = vmatpush.bf16.msrb.mxu0 %v7204_v20  ;;  %v4938_v63 = vpop.f32.mrf.mxu0 }
 0x552   : > { %5202 = vmatpush.bf16.msra.mxu1 %v7512_v24  ;;  %5214 = vmatpush.bf16.msrb.mxu2 %v7764_v26  ;;  %v7793_v0 = vmul.f32 -1.442695, %v4911_v41 }
 0x553   : > { %v4925_v4 = vpop.f32.mrf.mxu3 }
 0x554   : > { %8429 = vpow2.f32 %v7793_v0 }
 0x555   : > { %5181 = vmatpush.bf16.msrb.mxu3 %v6924_v34  ;;  %5193 = vmatpush.bf16.msrb.mxu0 %v7176_v38  ;;  %v4949_v9 = vpop.f32.mrf.mxu1  ;;  %v3698_v38 = vperm.slane %v12142_v5, 2 }
 0x556   : > { %5203 = vmatpush.bf16.msra.mxu1 %v7484_v51  ;;  %5215 = vmatpush.bf16.msrb.mxu2 %v7736_v42  ;;  %v4950_v26 = vadd.f32 %v4949_v9, %v4937_v23 }
 0x557   : > { %v4912_v55 = vpop.f32.mrf.mxu2 }
 0x558   : > { %5182 = vmatmul.bf16.vlgmr.msrb.gmra.mxu3 %v11260_v46  ;;  %v7651_v46 = vld [vmem:[%s12346_s14 + $0x5c8] sm:$0xf] }
 0x559   : > { %5194 = vmatpush.bf16.msrb.mxu0 %v7148_v36  ;;  %v7652_v11 = vor.u32 %v8337_v6, %v7651_v46  ;;  %v4988_v15 = vpop.f32.mrf.mxu0 }
 0x55a   : > { %5204 = vmatpush.bf16.msra.mxu1 %v7456_v54  ;;  %5216 = vmatpush.bf16.msrb.mxu2 %v7708_v35  ;;  %v8430_v16 = vpop.eup %8429 }
 0x55b   : > { %v5247_v19 = vadd.f32 1.0, %v8430_v16  ;;  %v4975_v20 = vpop.f32.mrf.mxu3 }
 0x55c   : > { %5195 = vmatmul.bf16.vlgmr.msrb.gmra.mxu0 %v11275_v60  ;;  %v8330_v60 = vld [vmem:[%s12346_s14 + $0x5a8] sm:$0xf0] }
 0x55d   : > { %v7624_v18 = vor.u32 %v8330_v60, %v7623_v13  ;;  %8431 = vrcp.f32 %v5247_v19  ;;  %v4951_v24 = vpop.f32.mrf.mxu1  ;;  %v5265_v42 = vand.u32 2147483648, %v5247_v19  ;;  %v5263_v44 = vand.u32 2147483647, %v5247_v19 }
 0x55e   : > { %5205 = vmatpush.bf16.msra.mxu1 %v7428_v1  ;;  %5217 = vmatpush.bf16.msrb.mxu2 %v7680_v2  ;;  %vm5259_vm3 = vweird.f32 %v5247_v19 }
 0x55f   : > { %v4962_v29 = vpop.f32.mrf.mxu2  ;;  %v5266_v48 = vor.u32 1.1754944e-38, %v5265_v42  ;;  %vm5264_vm5 = vcmp.eq.f32.partialorder %v5263_v44, 8.507059e+37 }
 0x560   : > { %v4963_v53 = vadd.f32 %v4962_v29, %v4950_v26 }
 0x561   : > { %v4990_v31 = vpop.f32.mrf.mxu0 }
 0x562   : > { %5206 = vmatpush.bf16.msra.mxu1 %v7400_v10  ;;  %5218 = vmatpush.bf16.msrb.mxu2 %v7652_v11  ;;  %v7794_v32 = vmul.f32 -1.442695, %v4963_v53  ;;  %v3699_v11 = vperm.slane %v12142_v5, 3 }
 0x563   : > { %v8432_v33 = vpop.eup %8431  ;;  %v4977_v17 = vpop.f32.mrf.mxu3 }
 0x564   : > { %v5255_v34 = vmul.f32 %v8432_v33, %v5247_v19  ;;  %8433 = vpow2.f32 %v7794_v32  ;;  %vm5260_vm2 = vweird.f32 %v8432_v33 }
 0x565   : > { %vm5261_vm4 = vmor %vm5259_vm3, %vm5260_vm2 }
 0x566   : > { %5207 = vmatpush.bf16.msra.mxu1 %v7372_v7  ;;  %5219 = vmatpush.bf16.msrb.mxu2 %v7624_v18  ;;  %v5256_v39 = vsub.f32 1.0, %v5255_v34 }
 0x567   : > { %v4964_v57 = vpop.f32.mrf.mxu2 }
 0x568   : > { %v5001_v51 = vpop.f32.mrf.mxu1  ;;  %v5257_v43 = vmul.f32 %v8432_v33, %v5256_v39 }
 0x569   : > { %5208 = vmatmul.bf16.vlgmr.msra.gmra.mxu1 %v11325_v25  ;;  %v4976_v25 = vadd.f32 %v4975_v20, %v3698_v38 }
 0x56a   : > { %5220 = vmatpush.bf16.msrb.mxu2 %v7596_v27  ;;  %v8434_v30 = vpop.eup %8433  ;;  %v5258_v47 = vadd.f32 %v8432_v33, %v5257_v43 }
 0x56b   : > { %v5248_v49 = vadd.f32 1.0, %v8434_v30 }
 0x56c   : > { %v5262_v56 = vsel %vm5261_vm4, %v8432_v33, %v5258_v47 }
 0x56d   : > { %5221 = vmatmul.bf16.vlgmr.msrb.gmra.mxu2 %v11353_v28  ;;  %v5267_v36 = vsel %vm5264_vm5, %v5266_v48, %v5262_v56  ;;  %8435 = vrcp.f32 %v5248_v49  ;;  %v4989_v28 = vadd.f32 %v4988_v15, %v4976_v25  ;;  %v5280_v62 = vand.u32 2147483648, %v5248_v49 }
 0x56e   : > { %5359 = vst [vmem:[%s12267_s1] sm:$0xff] %v5267_v36  ;;  %v5278_v0 = vand.u32 2147483647, %v5248_v49  ;;  %vm5274_vm7 = vweird.f32 %v5248_v49 }
 0x56f   : > { %v5002_v52 = vadd.f32 %v5001_v51, %v4989_v28  ;;  %v5281_v58 = vor.u32 1.1754944e-38, %v5280_v62 }
 0x570   : > { %v5003_v50 = vpop.f32.mrf.mxu1  ;;  %vm5279_vm9 = vcmp.eq.f32.partialorder %v5278_v0, 8.507059e+37 }
 0x572   : > { %v5014_v54 = vpop.f32.mrf.mxu2 }
 0x573   : > { %v5015_v35 = vadd.f32 %v5014_v54, %v5002_v52  ;;  %v8436_v59 = vpop.eup %8435 }
 0x574   : > { %v5270_v61 = vmul.f32 %v8436_v59, %v5248_v49  ;;  %vm5275_vm6 = vweird.f32 %v8436_v59 }
 0x575   : > { %v7795_v37 = vmul.f32 -1.442695, %v5015_v35  ;;  %vm5276_vm8 = vmor %vm5274_vm7, %vm5275_vm6 }
 0x576   : > { %v5271_v40 = vsub.f32 1.0, %v5270_v61 }
 0x577   : > { %8437 = vpow2.f32 %v7795_v37 }
 0x578   : > { %v5272_v63 = vmul.f32 %v8436_v59, %v5271_v40 }
 0x579   : > { %v5040_v41 = vpop.f32.mrf.mxu0 }
 0x57a   : > { %v5016_v1 = vpop.f32.mrf.mxu2  ;;  %v5273_v3 = vadd.f32 %v8436_v59, %v5272_v63 }
 0x57b   : > { %v5027_v2 = vpop.f32.mrf.mxu3 }
 0x57c   : > { %v5277_v46 = vsel %vm5276_vm8, %v8436_v59, %v5273_v3  ;;  %v5028_v60 = vadd.f32 %v5027_v2, %v3699_v11 }
 0x57d   : > { %v8438_v4 = vpop.eup %8437  ;;  %v5282_v8 = vsel %vm5279_vm9, %v5281_v58, %v5277_v46 }
 0x57e   : > { %v5249_v6 = vadd.f32 1.0, %v8438_v4  ;;  %5360 = vst [vmem:[%s12267_s1 + $0x8] sm:$0xff] %v5282_v8  ;;  %v5041_v18 = vadd.f32 %v5040_v41, %v5028_v60 }
 0x580   : > { %8439 = vrcp.f32 %v5249_v6  ;;  %v5295_v14 = vand.u32 2147483648, %v5249_v6  ;;  %v5293_v16 = vand.u32 2147483647, %v5249_v6  ;;  %vm5289_vm11 = vweird.f32 %v5249_v6 }
 0x581   : > { %v5042_v9 = vpop.f32.mrf.mxu0 }
 0x583   : > { %v5029_v10 = vpop.f32.mrf.mxu3 }
 0x586   : > { %v8440_v45 = vpop.eup %8439 }
 0x587   : > { %v5285_v12 = vmul.f32 %v8440_v45, %v5249_v6  ;;  %vm5290_vm10 = vweird.f32 %v8440_v45 }
 0x588   : > { %v5053_v55 = vpop.f32.mrf.mxu1 }
 0x589   : > { %v5286_v13 = vsub.f32 1.0, %v5285_v12 }
 0x58b   : > { %v5287_v15 = vmul.f32 %v8440_v45, %v5286_v13 }
 0x58d   : > { %v5288_v7 = vadd.f32 %v8440_v45, %v5287_v15 }
 0x58e   : > { %8484 = shalt.err (!%p8481_p3)
}
 0x58f   : > { %8377 = dma.vmem_to_hbm [thread:$0]  (%p8684_p5), %s5400_s24, 128, %s5402_s25, %s5372_s16   ;;  %vm5291_vm12 = vmor %vm5289_vm11, %vm5290_vm10  ;;  %v5296_v19 = vor.u32 1.1754944e-38, %v5295_v14  ;;  %vm5294_vm13 = vcmp.eq.f32.partialorder %v5293_v16, 8.507059e+37  ;;  %v5054_v22 = vadd.f32 %v5053_v55, %v5041_v18  ;;  %v3700_v38 = vperm.slane %v12142_v5, 4 }
 0x590   : > { %v5055_v20 = vpop.f32.mrf.mxu1  ;;  %v5292_v21 = vsel %vm5291_vm12, %v8440_v45, %v5288_v7  ;;  %v3701_v0 = vperm.slane %v12142_v5, 5  ;;  %s8375_s0 = smul.u32 56, %s8667_s30  ;;  %s12375_s25 = sld [smem:[#allocation19_spill]] }
 0x591   : > { %v5297_v23 = vsel %vm5294_vm13, %v5296_v19, %v5292_v21  ;;  %s5385_s21 = sshll.u32 %s12267_s1, 4  ;;  %s5367_s30 = scalar_lea.sflag [#allocation4], %s10667_s29  ;;  %s5386_s21 = int_to_ptr.vmem [resolvable:$true] %s5385_s21 }
 0x592   : > { %v5066_v24 = vpop.f32.mrf.mxu2  ;;  %5361 = vst [vmem:[%s12267_s1 + $0x10] sm:$0xff] %v5297_v23  ;;  %v3702_v23 = vperm.slane %v12142_v5, 6 }
 0x593   : > { %v5067_v26 = vadd.f32 %v5066_v24, %v5054_v22 }
 0x595   : > { %v7796_v27 = vmul.f32 -1.442695, %v5067_v26 }
 0x596   : > { %s5383_s16 = scalar_lea.hbm %s12375_s25, %s8375_s0  ;;  %s8505_s2 = scalar_lea.hbm %s12375_s25, 112 }
 0x597   : > { %8441 = vpow2.f32 %v7796_v27  ;;  %s5387_s3 = sshll.u32 %s5383_s16, 4  ;;  %s5388_s3 = int_to_ptr.hbm [resolvable:$true] %s5387_s3 }
 0x598   : > { %s8499_s26 = sshra.s32 %s5388_s3, 4  ;;  %s8500_s26 = int_to_ptr.hbm [resolvable:$true] %s8499_s26 }
 0x599   : > { %v5092_v29 = vpop.f32.mrf.mxu0  ;;  %s8501_s18 = scalar_lea.hbm %s8500_s26, 56  ;;  %p8506_p9 = scmp.lt.s32.totalorder %s8500_s26, %s12375_s25 }
 0x59a   : > { %v5068_v53 = vpop.f32.mrf.mxu2  ;;  %p8502_p4 = scmp.ne.s32.totalorder %s8500_s26, %s8501_s18  ;;  %p8507_p10 = scmp.lt.s32.totalorder %s8505_s2, %s8501_s18 }
 0x59b   : > { %v5079_v31 = vpop.f32.mrf.mxu3 }
 0x59c   : > { %v5080_v43 = vadd.f32 %v5079_v31, %v3700_v38  ;;  %p8503_p7 = pnand %p8502_p4, %p8684_p5  ;;  %p8508_p11 = por %p8507_p10, %p8506_p9 }
 0x59d   : > { %v8442_v32 = vpop.eup %8441 }
 0x59e   : > { %v5250_v33 = vadd.f32 1.0, %v8442_v32  ;;  %v5093_v48 = vadd.f32 %v5092_v29, %v5080_v43  ;;  %p8504_p8 = pneg %p8503_p7 }
 0x5a0   : > { %8443 = vrcp.f32 %v5250_v33  ;;  %v5310_v44 = vand.u32 2147483648, %v5250_v33  ;;  %v5308_v30 = vand.u32 2147483647, %v5250_v33  ;;  %vm5304_vm15 = vweird.f32 %v5250_v33  ;;  %p8509_p12 = pnand %p8508_p11, %p8504_p8 }
 0x5a1   : > { %v5094_v17 = vpop.f32.mrf.mxu0 }
 0x5a2   : > { %v5311_v49 = vor.u32 1.1754944e-38, %v5310_v44  ;;  %vm5309_vm2 = vcmp.eq.f32.partialorder %v5308_v30, 8.507059e+37 }
 0x5a3   : > { %v5081_v34 = vpop.f32.mrf.mxu3 }
 0x5a6   : > { %v8444_v39 = vpop.eup %8443 }
 0x5a7   : > { %v5300_v42 = vmul.f32 %v8444_v39, %v5250_v33  ;;  %vm5305_vm14 = vweird.f32 %v8444_v39 }
 0x5a8   : > { %v5105_v51 = vpop.f32.mrf.mxu1  ;;  %vm5306_vm1 = vmor %vm5304_vm15, %vm5305_vm14 }
 0x5a9   : > { %v5301_v57 = vsub.f32 1.0, %v5300_v42  ;;  %v5106_v28 = vadd.f32 %v5105_v51, %v5093_v48 }
 0x5ab   : > { %v5302_v25 = vmul.f32 %v8444_v39, %v5301_v57 }
 0x5ad   : > { %v5303_v47 = vadd.f32 %v8444_v39, %v5302_v25 }
 0x5af   : > { %v5307_v36 = vsel %vm5306_vm1, %v8444_v39, %v5303_v47 }
 0x5b0   : > { %v5107_v56 = vpop.f32.mrf.mxu1  ;;  %v5312_v50 = vsel %vm5309_vm2, %v5311_v49, %v5307_v36 }
 0x5b1   : > { %5362 = vst [vmem:[%s12267_s1 + $0x18] sm:$0xff] %v5312_v50 }
 0x5b2   : > { %v5118_v52 = vpop.f32.mrf.mxu2 }
 0x5b3   : > { %v5119_v54 = vadd.f32 %v5118_v52, %v5106_v28 }
 0x5b5   : > { %v7797_v35 = vmul.f32 -1.442695, %v5119_v54 }
 0x5b7   : > { %8445 = vpow2.f32 %v7797_v35 }
 0x5b9   : > { %v5144_v59 = vpop.f32.mrf.mxu0 }
 0x5ba   : > { %v5120_v37 = vpop.f32.mrf.mxu2 }
 0x5bb   : > { %v5131_v61 = vpop.f32.mrf.mxu3 }
 0x5bc   : > { %v5132_v58 = vadd.f32 %v5131_v61, %v3701_v0 }
 0x5bd   : > { %v8446_v40 = vpop.eup %8445 }
 0x5be   : > { %v5251_v62 = vadd.f32 1.0, %v8446_v40  ;;  %v5145_v10 = vadd.f32 %v5144_v59, %v5132_v58 }
 0x5c0   : > { %8447 = vrcp.f32 %v5251_v62  ;;  %v5325_v46 = vand.u32 2147483648, %v5251_v62  ;;  %v5323_v8 = vand.u32 2147483647, %v5251_v62  ;;  %vm5319_vm4 = vweird.f32 %v5251_v62 }
 0x5c1   : > { %v5146_v41 = vpop.f32.mrf.mxu0 }
 0x5c2   : > { %v5326_v11 = vor.u32 1.1754944e-38, %v5325_v46  ;;  %vm5324_vm6 = vcmp.eq.f32.partialorder %v5323_v8, 8.507059e+37 }
 0x5c3   : > { %v5133_v63 = vpop.f32.mrf.mxu3 }
 0x5c6   : > { %v8448_v1 = vpop.eup %8447 }
 0x5c7   : > { %v5315_v3 = vmul.f32 %v8448_v1, %v5251_v62  ;;  %vm5320_vm3 = vweird.f32 %v8448_v1 }
 0x5c8   : > { %v5157_v2 = vpop.f32.mrf.mxu1  ;;  %vm5321_vm5 = vmor %vm5319_vm4, %vm5320_vm3 }
 0x5c9   : > { %v5316_v4 = vsub.f32 1.0, %v5315_v3  ;;  %v5158_v12 = vadd.f32 %v5157_v2, %v5145_v10 }
 0x5cb   : > { %v5317_v6 = vmul.f32 %v8448_v1, %v5316_v4 }
 0x5cd   : > { %v5318_v9 = vadd.f32 %v8448_v1, %v5317_v6 }
 0x5cf   : > { %v5322_v55 = vsel %vm5321_vm5, %v8448_v1, %v5318_v9 }
 0x5d0   : > { %v5159_v45 = vpop.f32.mrf.mxu1  ;;  %v5327_v13 = vsel %vm5324_vm6, %v5326_v11, %v5322_v55 }
 0x5d1   : > { %5363 = vst [vmem:[%s12267_s1 + $0x20] sm:$0xff] %v5327_v13 }
 0x5d2   : > { %v5170_v60 = vpop.f32.mrf.mxu2 }
 0x5d3   : > { %v5171_v14 = vadd.f32 %v5170_v60, %v5158_v12 }
 0x5d5   : > { %v7798_v15 = vmul.f32 -1.442695, %v5171_v14 }
 0x5d7   : > { %8449 = vpow2.f32 %v7798_v15 }
 0x5d9   : > { %v5196_v16 = vpop.f32.mrf.mxu0 }
 0x5da   : > { %v5172_v7 = vpop.f32.mrf.mxu2 }
 0x5db   : > { %v5183_v18 = vpop.f32.mrf.mxu3 }
 0x5dc   : > { %v5184_v53 = vadd.f32 %v5183_v18, %v3702_v23 }
 0x5dd   : > { %v8450_v19 = vpop.eup %8449 }
 0x5de   : > { %v5252_v20 = vadd.f32 1.0, %v8450_v19  ;;  %v5197_v34 = vadd.f32 %v5196_v16, %v5184_v53 }
 0x5e0   : > { %8451 = vrcp.f32 %v5252_v20  ;;  %v5340_v31 = vand.u32 2147483648, %v5252_v20  ;;  %v5338_v33 = vand.u32 2147483647, %v5252_v20  ;;  %vm5334_vm8 = vweird.f32 %v5252_v20 }
 0x5e1   : > { %v5198_v21 = vpop.f32.mrf.mxu0 }
 0x5e2   : > { %v5341_v38 = vor.u32 1.1754944e-38, %v5340_v31  ;;  %vm5339_vm10 = vcmp.eq.f32.partialorder %v5338_v33, 8.507059e+37 }
 0x5e3   : > { %v5185_v22 = vpop.f32.mrf.mxu3 }
 0x5e6   : > { %v8452_v24 = vpop.eup %8451  ;;  %v5209_v26 = vpop.f32.mrf.mxu1 }
 0x5e7   : > { %v5330_v27 = vmul.f32 %v8452_v24, %v5252_v20  ;;  %vm5335_vm7 = vweird.f32 %v8452_v24  ;;  %v5210_v5 = vadd.f32 %v5209_v26, %v5197_v34 }
 0x5e8   : > { %vm5336_vm9 = vmor %vm5334_vm8, %vm5335_vm7 }
 0x5e9   : > { %v5331_v29 = vsub.f32 1.0, %v5330_v27 }
 0x5eb   : > { %v5332_v32 = vmul.f32 %v8452_v24, %v5331_v29 }
 0x5ed   : > { %v5333_v17 = vadd.f32 %v8452_v24, %v5332_v32 }
 0x5ee   : > { %v5211_v39 = vpop.f32.mrf.mxu1 }
 0x5ef   : > { %v5337_v51 = vsel %vm5336_vm9, %v8452_v24, %v5333_v17 }
 0x5f0   : > { %v5342_v42 = vsel %vm5339_vm10, %v5341_v38, %v5337_v51  ;;  %v5222_v57 = vpop.f32.mrf.mxu2 }
 0x5f1   : > { %5364 = vst [vmem:[%s12267_s1 + $0x28] sm:$0xff] %v5342_v42  ;;  %v5223_v43 = vadd.f32 %v5222_v57, %v5210_v5 }
 0x5f3   : > { %v7799_v44 = vmul.f32 -1.442695, %v5223_v43 }
 0x5f5   : > { %8453 = vpow2.f32 %v7799_v44 }
 0x5f8   : > { %v5224_v25 = vpop.f32.mrf.mxu2 }
 0x5fb   : > { %v8454_v30 = vpop.eup %8453 }
 0x5fc   : > { %v5253_v47 = vadd.f32 1.0, %v8454_v30 }
 0x5fe   : > { %8455 = vrcp.f32 %v5253_v47  ;;  %v5355_v36 = vand.u32 2147483648, %v5253_v47  ;;  %v5353_v50 = vand.u32 2147483647, %v5253_v47  ;;  %vm5349_vm12 = vweird.f32 %v5253_v47 }
 0x600   : > { %v5356_v54 = vor.u32 1.1754944e-38, %v5355_v36  ;;  %vm5354_vm14 = vcmp.eq.f32.partialorder %v5353_v50, 8.507059e+37 }
 0x604   : > { %v8456_v48 = vpop.eup %8455 }
 0x605   : > { %v5345_v49 = vmul.f32 %v8456_v48, %v5253_v47  ;;  %vm5350_vm11 = vweird.f32 %v8456_v48 }
 0x606   : > { %vm5351_vm13 = vmor %vm5349_vm12, %vm5350_vm11 }
 0x607   : > { %v5346_v56 = vsub.f32 1.0, %v5345_v49 }
 0x609   : > { %v5347_v28 = vmul.f32 %v8456_v48, %v5346_v56 }
 0x60b   : > { %v5348_v52 = vadd.f32 %v8456_v48, %v5347_v28 }
 0x60d   : > { %v5352_v35 = vsel %vm5351_vm13, %v8456_v48, %v5348_v52 }
 0x60e   : > { %v5357_v59 = vsel %vm5354_vm14, %v5356_v54, %v5352_v35 }
 0x60f   : > { %5365 = vst.msk [vmem:[%s12267_s1 + $0x30] sm:$0xff] %vm1778_vm0, %v5357_v59 }
 0x610   : > { %8512 = shalt.err (!%p8509_p12)
}
 0x611   : > { %8376 = dma.vmem_to_hbm [thread:$0]  (%p8684_p5), %s5386_s21, 896, %s5388_s3, %s5367_s30  }
 0x612 PF: > { %s12376_s29 = sld [smem:[#allocation11_spill]] }
 0x613   : > { %s12377_s1 = sld [smem:[#allocation9_spill]] }
 0x618   : > { %p8387_p13 = scmp.ge.s32.totalorder %s12376_s29, 2 }
 0x619   : > { %s5413_s16 = sand.u32 1, %s12377_s1  }
 0x61a   : > { %p8381_p0 = pnand %p8387_p13, %p8688_p6  ;;  %s5414_s27 = scalar_lea.sflag [#allocation4], %s5413_s16 }
 0x61c   : > { %p8382_p1 = pneg %p8381_p0 }
 0x61e   : > { %8530 = dma.done.wait (%p8382_p1), %s5414_s27, 896  }
 0x61f   : > { %8532 = vsyncadd (%p8382_p1), %s5414_s27, 4294966400  ;;  %s5424_s26 = scalar_lea.sflag [#allocation6], %s5413_s16 }
 0x620   : > { %8534 = dma.done.wait (%p8382_p1), %s5424_s26, 128  }
 0x621   : > { %8536 = vsyncadd (%p8382_p1), %s5424_s26, 4294967168  ;;  %s12379_s0 = sld [smem:[#allocation12_spill]]  ;;  %s12382_s27 = smov %s8543_s28 }
 0x622   : > { %s12380_s18 = sld [smem:[#allocation10_spill]] }
 0x623   : > { %s12381_s29 = sld [smem:[#allocation13_spill]] }
 0x627   : > { %p32_p5 = scmp.ge.s32.totalorder %s12379_s0, 4  }
 0x628   : > { %s12383_s28 = smov %s12380_s18 }
 0x629   :  { %34 = sbr.rel (!%p32_p5) target bundleno = 18 (0x12), region = 139 }
 0x62e   :  { %5430 = vsyncpa [#allocation4], 1 }
 0x62f   :  { %5432 = vsyncpa [#allocation4 + $0x1], 1 }
 0x630   :  { %5433 = vsyncpa [#allocation6], 1 }
 0x631   :  { %5435 = vsyncpa [#allocation6 + $0x1], 1 }

</bundles_post_ra>
